<compile_context>
chip_gen: v7x
topology: tpu7x:2x2x1
jax: 0.10.0
libtpu: 0.0.40
codegen_flags: <defaults>
</compile_context>

<pallas_src>
import jax
import jax.numpy as jnp
from jax.experimental import pallas as pl
from jax.experimental.pallas import tpu as pltpu

# ----------------------------- config (small, consistent with the module) ---
B = 2             # batch
C_IN = 3          # image channels
IMG = 32          # image side
PATCH = 16        # ViT-B/16 patch size
NP = (IMG // PATCH) ** 2      # num patches = 4
N = NP + 1                    # tokens incl. CLS = 5
BN = B * N                    # total token rows = 10
D = 32            # embed dim ("out_dim" of the synthetic backbone)
NH = 4            # attention heads
DH = D // NH      # head dim = 8
MLP_HID = 4 * D   # 128
DEPTH = 2         # transformer blocks
NUM_CLASSES = 10  # fc head output dim
CPP = C_IN * PATCH * PATCH    # flattened patch size = 768

# timm ViT uses eps=1e-6 (PyTorch nn.LayerNorm default would be 1e-5).
LN_EPS = 1e-6
# bf16 MXU operands + f32 accumulation; set to jnp.float32 for exact matmuls.
MXU_DTYPE = jnp.bfloat16


def _fs(shape):
    """Full-array BlockSpec for a grid=(1,) call."""
    nd = len(shape)
    return pl.BlockSpec(shape, lambda i, _nd=nd: (0,) * _nd)


# ----------------------------- the single fused kernel ----------------------
def _basenet_kernel(
    xp_ref, add_ref, mask_ref, sel_ref, patch_w_ref,
    wq_ref, bq_ref, wk_ref, bk_ref, wv_ref, bv_ref, wproj_ref, bproj_ref,
    ln1_g_ref, ln1_b_ref, ln2_g_ref, ln2_b_ref,
    fc1_w_ref, fc1_b_ref, fc2_w_ref, fc2_b_ref,
    norm_g_ref, norm_b_ref, fc_w_ref, fc_b_ref,
    logits_ref, feat_ref,
):
    f32 = jnp.float32

    def mm(a, w):
        # MXU matmul: bf16 operands, f32 accumulation.
        return jnp.dot(a.astype(MXU_DTYPE), w.astype(MXU_DTYPE),
                       preferred_element_type=f32)

    def mm_t(a, w):
        # A @ W^T via dot_general (contract last dims); no materialized transpose.
        return jax.lax.dot_general(
            a.astype(MXU_DTYPE), w.astype(MXU_DTYPE),
            dimension_numbers=(((1,), (1,)), ((), ())),
            preferred_element_type=f32)

    def layernorm(v, g, b_):
        # f32 VPU math on all generations.
        mu = jnp.mean(v, axis=-1, keepdims=True)
        var = jnp.mean((v - mu) ** 2, axis=-1, keepdims=True)
        return (v - mu) * jax.lax.rsqrt(var + LN_EPS) * g + b_

    # ---- patch embed; CLS token + positional embedding + patch bias are folded
    #      into the precomputed additive term `add` (CLS rows of xp are zero).
    x = mm(xp_ref[...], patch_w_ref[...]) + add_ref[...]            # [BN, D]

    mask = mask_ref[...]                                            # [BN, BN] block-diag
    scale = 1.0 / float(DH) ** 0.5

    # ---- transformer blocks, fully unrolled (DEPTH, NH are small & static) --
    for d in range(DEPTH):
        # --- attention ---
        xn = layernorm(x, ln1_g_ref[d], ln1_b_ref[d])               # [BN, D]
        attn = jnp.zeros((BN, D), f32)
        for h in range(NH):
            i = d * NH + h
            q = mm(xn, wq_ref[i]) + bq_ref[i]                       # [BN, DH]
            k = mm(xn, wk_ref[i]) + bk_ref[i]                       # [BN, DH]
            v = mm(xn, wv_ref[i]) + bv_ref[i]                       # [BN, DH]
            s = mm_t(q, k) * scale + mask                           # [BN, BN]
            s = s - jnp.max(s, axis=-1, keepdims=True)
            p = jnp.exp(s)
            p = p / jnp.sum(p, axis=-1, keepdims=True)              # f32 softmax
            # per-head output projection (proj_w decomposed over head rows)
            attn = attn + mm(mm(p, v), wproj_ref[i])                # [BN, D]
        x = x + attn + bproj_ref[d]                                 # residual

        # --- MLP ---
        xn2 = layernorm(x, ln2_g_ref[d], ln2_b_ref[d])
        h1 = mm(xn2, fc1_w_ref[d]) + fc1_b_ref[d]                   # [BN, 4D]
        # TODO(synk): timm ViT uses exact (erf) GELU; tanh approximation used here.
        h1 = jax.nn.gelu(h1, approximate=True)
        x = x + mm(h1, fc2_w_ref[d]) + fc2_b_ref[d]                 # residual

    # ---- final LN, CLS pooling (one-hot selection matmul), fc head ----------
    xn = layernorm(x, norm_g_ref[...], norm_b_ref[...])             # [BN, D]
    feats = jnp.dot(sel_ref[...], xn, preferred_element_type=f32)   # [B, D], exact f32
    feat_ref[...] = feats
    logits_ref[...] = mm(feats, fc_w_ref[...]) + fc_b_ref[...]      # [B, NUM_CLASSES]


# ----------------------------- params ---------------------------------------
def init_params(key):
    def nrm(k, shape, scale=0.02):
        return scale * jax.random.normal(k, shape, jnp.float32)

    keys = iter(jax.random.split(key, 8 + DEPTH * 8))
    params = {
        # TODO(synk): when importing real Conv2d weights, flatten them in (C, ph, pw)
        # order to match the patchify transpose (0, 2, 4, 1, 3, 5) used below.
        "patch_w": nrm(next(keys), (CPP, D)),
        "patch_b": jnp.zeros((D,), jnp.float32),
        "cls": nrm(next(keys), (1, 1, D)),
        "pos": nrm(next(keys), (1, N, D)),
        "norm_g": jnp.ones((D,), jnp.float32),
        "norm_b": jnp.zeros((D,), jnp.float32),
        "fc_w": nrm(next(keys), (D, NUM_CLASSES)),
        "fc_b": jnp.zeros((NUM_CLASSES,), jnp.float32),
        "blocks": [],
    }
    for _ in range(DEPTH):
        params["blocks"].append(
            {
                "ln1_g": jnp.ones((D,), jnp.float32),
                "ln1_b": jnp.zeros((D,), jnp.float32),
                "qkv_w": nrm(next(keys), (D, 3 * D)),
                "qkv_b": jnp.zeros((3 * D,), jnp.float32),
                "proj_w": nrm(next(keys), (D, D)),
                "proj_b": jnp.zeros((D,), jnp.float32),
                "ln2_g": jnp.ones((D,), jnp.float32),
                "ln2_b": jnp.zeros((D,), jnp.float32),
                "fc1_w": nrm(next(keys), (D, MLP_HID)),
                "fc1_b": jnp.zeros((MLP_HID,), jnp.float32),
                "fc2_w": nrm(next(keys), (MLP_HID, D)),
                "fc2_b": jnp.zeros((D,), jnp.float32),
            }
        )
    return params


def pack_params(p):
    """One-time repack (outside jit): stack per-block params, split QKV/proj per
    head, and fold cls/pos/patch_b into a single additive term — so the kernel
    needs zero activation transposes/reshapes."""
    pos = p["pos"].reshape(N, D)
    add_seq = jnp.concatenate(
        [p["cls"].reshape(1, D) + pos[0:1],           # CLS row (xp row is zero)
         p["patch_b"].reshape(1, D) + pos[1:]],       # patch rows
        axis=0)                                       # [N, D]
    add = jnp.tile(add_seq, (B, 1))                   # [BN, D]

    tok_b = jnp.arange(BN) // N                       # batch id of every token row
    mask = jnp.where(tok_b[:, None] == tok_b[None, :], 0.0, -1e9).astype(jnp.float32)

    sel = jnp.zeros((B, BN), jnp.float32)             # one-hot CLS-row selector
    sel = sel.at[jnp.arange(B), jnp.arange(B) * N].set(1.0)

    wq, wk, wv, bq, bk, bv, wproj = [], [], [], [], [], [], []
    for blk in p["blocks"]:
        for h in range(NH):
            sl = slice(h * DH, (h + 1) * DH)
            wq.append(blk["qkv_w"][:, 0 * D:1 * D][:, sl])              # [D, DH]
            wk.append(blk["qkv_w"][:, 1 * D:2 * D][:, sl])
            wv.append(blk["qkv_w"][:, 2 * D:3 * D][:, sl])
            bq.append(blk["qkv_b"][0 * D:1 * D][sl].reshape(1, DH))
            bk.append(blk["qkv_b"][1 * D:2 * D][sl].reshape(1, DH))
            bv.append(blk["qkv_b"][2 * D:3 * D][sl].reshape(1, DH))
            wproj.append(blk["proj_w"][sl, :])                          # [DH, D]

    def stk(fn):
        return jnp.stack([fn(blk) for blk in p["blocks"]], axis=0)

    return dict(
        add=add, mask=mask, sel=sel, patch_w=p["patch_w"],
        wq=jnp.stack(wq), bq=jnp.stack(bq),
        wk=jnp.stack(wk), bk=jnp.stack(bk),
        wv=jnp.stack(wv), bv=jnp.stack(bv),
        wproj=jnp.stack(wproj),
        bproj=stk(lambda b_: b_["proj_b"].reshape(1, D)),
        ln1_g=stk(lambda b_: b_["ln1_g"].reshape(1, D)),
        ln1_b=stk(lambda b_: b_["ln1_b"].reshape(1, D)),
        ln2_g=stk(lambda b_: b_["ln2_g"].reshape(1, D)),
        ln2_b=stk(lambda b_: b_["ln2_b"].reshape(1, D)),
        fc1_w=stk(lambda b_: b_["fc1_w"]),
        fc1_b=stk(lambda b_: b_["fc1_b"].reshape(1, MLP_HID)),
        fc2_w=stk(lambda b_: b_["fc2_w"]),
        fc2_b=stk(lambda b_: b_["fc2_b"].reshape(1, D)),
        norm_g=p["norm_g"].reshape(1, D),
        norm_b=p["norm_b"].reshape(1, D),
        fc_w=p["fc_w"],
        fc_b=p["fc_b"].reshape(1, NUM_CLASSES),
    )


# ----------------------------- forward (single pallas_call) -----------------
def basenet_forward(packed, x):
    """BaseNet.forward, vit branch.  x: NCHW [B, C, H, W] float32."""
    Bb = x.shape[0]
    assert Bb == B
    p = PATCH
    # patchify (matches Conv2d(weight [D, C, p, p], stride=p) as a matmul);
    # prepend a zero row per batch as the CLS-token slot.
    xp = x.reshape(Bb, C_IN, IMG // p, p, IMG // p, p)
    xp = jnp.transpose(xp, (0, 2, 4, 1, 3, 5)).reshape(Bb, NP, CPP)
    xp_full = jnp.concatenate(
        [jnp.zeros((Bb, 1, CPP), jnp.float32), xp], axis=1
    ).reshape(BN, CPP)

    in_arrs = [
        xp_full, packed["add"], packed["mask"], packed["sel"], packed["patch_w"],
        packed["wq"], packed["bq"], packed["wk"], packed["bk"],
        packed["wv"], packed["bv"], packed["wproj"], packed["bproj"],
        packed["ln1_g"], packed["ln1_b"], packed["ln2_g"], packed["ln2_b"],
        packed["fc1_w"], packed["fc1_b"], packed["fc2_w"], packed["fc2_b"],
        packed["norm_g"], packed["norm_b"], packed["fc_w"], packed["fc_b"],
    ]

    logits, features = pl.pallas_call(
        _basenet_kernel,
        grid=(1,),
        in_specs=[_fs(a.shape) for a in in_arrs],
        out_specs=[_fs((Bb, NUM_CLASSES)), _fs((Bb, D))],
        out_shape=(jax.ShapeDtypeStruct((Bb, NUM_CLASSES), jnp.float32),
                   jax.ShapeDtypeStruct((Bb, D), jnp.float32)),
        compiler_params=pltpu.CompilerParams(
            dimension_semantics=("arbitrary",)),
    )(*in_arrs)

    # mirrors: out = self.fc(x); out.update({'features': x})
    return {"logits": logits, "features": features}


if __name__ == "__main__":
    root = jax.random.PRNGKey(0)
    k_params, k_x = jax.random.split(root)
    params = init_params(k_params)
    packed = pack_params(params)          # one-time weight repack, outside jit
    x = jax.random.normal(k_x, (B, C_IN, IMG, IMG), jnp.float32)

    out = jax.jit(basenet_forward)(packed, x)
    jax.block_until_ready(out)

    assert out["logits"].shape == (B, NUM_CLASSES)
    assert out["features"].shape == (B, D)
    print("KERNEL_OK")
</pallas_src>

<mosaic_0001>
module attributes {stable_mosaic.version = 11 : i64} {
  func.func @_basenet_kernel(%arg0: i32, %arg1: memref<10x768xf32, #tpu.memory_space<vmem>>, %arg2: memref<10x32xf32, #tpu.memory_space<vmem>>, %arg3: memref<10x10xf32, #tpu.memory_space<vmem>>, %arg4: memref<2x10xf32, #tpu.memory_space<vmem>>, %arg5: memref<768x32xf32, #tpu.memory_space<vmem>>, %arg6: memref<8x32x8xf32, #tpu.memory_space<vmem>>, %arg7: memref<8x1x8xf32, #tpu.memory_space<vmem>>, %arg8: memref<8x32x8xf32, #tpu.memory_space<vmem>>, %arg9: memref<8x1x8xf32, #tpu.memory_space<vmem>>, %arg10: memref<8x32x8xf32, #tpu.memory_space<vmem>>, %arg11: memref<8x1x8xf32, #tpu.memory_space<vmem>>, %arg12: memref<8x8x32xf32, #tpu.memory_space<vmem>>, %arg13: memref<2x1x32xf32, #tpu.memory_space<vmem>>, %arg14: memref<2x1x32xf32, #tpu.memory_space<vmem>>, %arg15: memref<2x1x32xf32, #tpu.memory_space<vmem>>, %arg16: memref<2x1x32xf32, #tpu.memory_space<vmem>>, %arg17: memref<2x1x32xf32, #tpu.memory_space<vmem>>, %arg18: memref<2x32x128xf32, #tpu.memory_space<vmem>>, %arg19: memref<2x1x128xf32, #tpu.memory_space<vmem>>, %arg20: memref<2x128x32xf32, #tpu.memory_space<vmem>>, %arg21: memref<2x1x32xf32, #tpu.memory_space<vmem>>, %arg22: memref<1x32xf32, #tpu.memory_space<vmem>>, %arg23: memref<1x32xf32, #tpu.memory_space<vmem>>, %arg24: memref<32x10xf32, #tpu.memory_space<vmem>>, %arg25: memref<1x10xf32, #tpu.memory_space<vmem>>, %arg26: memref<2x10xf32, #tpu.memory_space<vmem>>, %arg27: memref<2x32xf32, #tpu.memory_space<vmem>>) attributes {dimension_semantics = [#tpu.dimension_semantics<arbitrary>], iteration_bounds = array<i64: 1>, scalar_prefetch = 0 : i64, scratch_operands = 0 : i64, tpu.core_type = #tpu.core_type<tc>, window_params = [{pipeline_mode = #tpu.pipeline_mode<synchronous>, transform_indices = @transform_0, window_bounds = array<i64: 10, 768>}, {pipeline_mode = #tpu.pipeline_mode<synchronous>, transform_indices = @transform_1, window_bounds = array<i64: 10, 32>}, {pipeline_mode = #tpu.pipeline_mode<synchronous>, transform_indices = @transform_2, window_bounds = array<i64: 10, 10>}, {pipeline_mode = #tpu.pipeline_mode<synchronous>, transform_indices = @transform_3, window_bounds = array<i64: 2, 10>}, {pipeline_mode = #tpu.pipeline_mode<synchronous>, transform_indices = @transform_4, window_bounds = array<i64: 768, 32>}, {pipeline_mode = #tpu.pipeline_mode<synchronous>, transform_indices = @transform_5, window_bounds = array<i64: 8, 32, 8>}, {pipeline_mode = #tpu.pipeline_mode<synchronous>, transform_indices = @transform_6, window_bounds = array<i64: 8, 1, 8>}, {pipeline_mode = #tpu.pipeline_mode<synchronous>, transform_indices = @transform_7, window_bounds = array<i64: 8, 32, 8>}, {pipeline_mode = #tpu.pipeline_mode<synchronous>, transform_indices = @transform_8, window_bounds = array<i64: 8, 1, 8>}, {pipeline_mode = #tpu.pipeline_mode<synchronous>, transform_indices = @transform_9, window_bounds = array<i64: 8, 32, 8>}, {pipeline_mode = #tpu.pipeline_mode<synchronous>, transform_indices = @transform_10, window_bounds = array<i64: 8, 1, 8>}, {pipeline_mode = #tpu.pipeline_mode<synchronous>, transform_indices = @transform_11, window_bounds = array<i64: 8, 8, 32>}, {pipeline_mode = #tpu.pipeline_mode<synchronous>, transform_indices = @transform_12, window_bounds = array<i64: 2, 1, 32>}, {pipeline_mode = #tpu.pipeline_mode<synchronous>, transform_indices = @transform_13, window_bounds = array<i64: 2, 1, 32>}, {pipeline_mode = #tpu.pipeline_mode<synchronous>, transform_indices = @transform_14, window_bounds = array<i64: 2, 1, 32>}, {pipeline_mode = #tpu.pipeline_mode<synchronous>, transform_indices = @transform_15, window_bounds = array<i64: 2, 1, 32>}, {pipeline_mode = #tpu.pipeline_mode<synchronous>, transform_indices = @transform_16, window_bounds = array<i64: 2, 1, 32>}, {pipeline_mode = #tpu.pipeline_mode<synchronous>, transform_indices = @transform_17, window_bounds = array<i64: 2, 32, 128>}, {pipeline_mode = #tpu.pipeline_mode<synchronous>, transform_indices = @transform_18, window_bounds = array<i64: 2, 1, 128>}, {pipeline_mode = #tpu.pipeline_mode<synchronous>, transform_indices = @transform_19, window_bounds = array<i64: 2, 128, 32>}, {pipeline_mode = #tpu.pipeline_mode<synchronous>, transform_indices = @transform_20, window_bounds = array<i64: 2, 1, 32>}, {pipeline_mode = #tpu.pipeline_mode<synchronous>, transform_indices = @transform_21, window_bounds = array<i64: 1, 32>}, {pipeline_mode = #tpu.pipeline_mode<synchronous>, transform_indices = @transform_22, window_bounds = array<i64: 1, 32>}, {pipeline_mode = #tpu.pipeline_mode<synchronous>, transform_indices = @transform_23, window_bounds = array<i64: 32, 10>}, {pipeline_mode = #tpu.pipeline_mode<synchronous>, transform_indices = @transform_24, window_bounds = array<i64: 1, 10>}, {pipeline_mode = #tpu.pipeline_mode<synchronous>, transform_indices = @transform_25, window_bounds = array<i64: 2, 10>}, {pipeline_mode = #tpu.pipeline_mode<synchronous>, transform_indices = @transform_26, window_bounds = array<i64: 2, 32>}]} {
    %c0 = arith.constant 0 : index
    %c0_0 = arith.constant 0 : index
    %0 = vector.load %arg1[%c0, %c0_0] : memref<10x768xf32, #tpu.memory_space<vmem>>, vector<10x768xf32>
    %c0_1 = arith.constant 0 : index
    %c0_2 = arith.constant 0 : index
    %1 = vector.load %arg5[%c0_1, %c0_2] : memref<768x32xf32, #tpu.memory_space<vmem>>, vector<768x32xf32>
    %2 = arith.truncf %0 : vector<10x768xf32> to vector<10x768xbf16>
    %3 = arith.truncf %1 : vector<768x32xf32> to vector<768x32xbf16>
    %cst = arith.constant dense<0.000000e+00> : vector<10x32xf32>
    %4 = tpu.matmul %2, %3, %cst {dimension_numbers = #tpu.dot_dimension_numbers<[1], [0], [0], [1], [0, 0, 1, 1], [], []>} : vector<10x768xbf16>, vector<768x32xbf16>, vector<10x32xf32> -> vector<10x32xf32>
    %c0_3 = arith.constant 0 : index
    %c0_4 = arith.constant 0 : index
    %5 = vector.load %arg2[%c0_3, %c0_4] : memref<10x32xf32, #tpu.memory_space<vmem>>, vector<10x32xf32>
    %6 = arith.addf %4, %5 : vector<10x32xf32>
    %c0_5 = arith.constant 0 : index
    %c0_6 = arith.constant 0 : index
    %7 = vector.load %arg3[%c0_5, %c0_6] : memref<10x10xf32, #tpu.memory_space<vmem>>, vector<10x10xf32>
    %c0_7 = arith.constant 0 : index
    %c0_8 = arith.constant 0 : index
    %c0_9 = arith.constant 0 : index
    %8 = vector.load %arg14[%c0_7, %c0_8, %c0_9] : memref<2x1x32xf32, #tpu.memory_space<vmem>>, vector<1x1x32xf32>
    %9 = vector.shape_cast %8 : vector<1x1x32xf32> to vector<1x32xf32>
    %c0_10 = arith.constant 0 : index
    %c0_11 = arith.constant 0 : index
    %c0_12 = arith.constant 0 : index
    %10 = vector.load %arg15[%c0_10, %c0_11, %c0_12] : memref<2x1x32xf32, #tpu.memory_space<vmem>>, vector<1x1x32xf32>
    %11 = vector.shape_cast %10 : vector<1x1x32xf32> to vector<1x32xf32>
    %cst_13 = arith.constant dense<0.000000e+00> : vector<10xf32>
    %12 = vector.multi_reduction <add>, %6, %cst_13 [1] : vector<10x32xf32> to vector<10xf32>
    %13 = vector.shape_cast %12 : vector<10xf32> to vector<10x1xf32>
    %cst_14 = arith.constant 3.200000e+01 : f32
    %14 = vector.broadcast %cst_14 : f32 to vector<10x1xf32>
    %15 = arith.divf %13, %14 : vector<10x1xf32>
    %16 = vector.broadcast %15 : vector<10x1xf32> to vector<10x32xf32>
    %17 = arith.subf %6, %16 : vector<10x32xf32>
    %18 = arith.mulf %17, %17 : vector<10x32xf32>
    %cst_15 = arith.constant dense<0.000000e+00> : vector<10xf32>
    %19 = vector.multi_reduction <add>, %18, %cst_15 [1] : vector<10x32xf32> to vector<10xf32>
    %20 = vector.shape_cast %19 : vector<10xf32> to vector<10x1xf32>
    %cst_16 = arith.constant 3.200000e+01 : f32
    %21 = vector.broadcast %cst_16 : f32 to vector<10x1xf32>
    %22 = arith.divf %20, %21 : vector<10x1xf32>
    %23 = vector.broadcast %15 : vector<10x1xf32> to vector<10x32xf32>
    %24 = arith.subf %6, %23 : vector<10x32xf32>
    %cst_17 = arith.constant 9.99999997E-7 : f32
    %25 = vector.broadcast %cst_17 : f32 to vector<10x1xf32>
    %26 = arith.addf %22, %25 : vector<10x1xf32>
    %27 = math.rsqrt %26 : vector<10x1xf32>
    %28 = vector.broadcast %27 : vector<10x1xf32> to vector<10x32xf32>
    %29 = arith.mulf %24, %28 : vector<10x32xf32>
    %30 = vector.broadcast %9 : vector<1x32xf32> to vector<10x32xf32>
    %31 = arith.mulf %29, %30 : vector<10x32xf32>
    %32 = vector.broadcast %11 : vector<1x32xf32> to vector<10x32xf32>
    %33 = arith.addf %31, %32 : vector<10x32xf32>
    %cst_18 = arith.constant 0.000000e+00 : f32
    %34 = vector.broadcast %cst_18 : f32 to vector<10x32xf32>
    %c0_19 = arith.constant 0 : index
    %c0_20 = arith.constant 0 : index
    %c0_21 = arith.constant 0 : index
    %35 = vector.load %arg6[%c0_19, %c0_20, %c0_21] : memref<8x32x8xf32, #tpu.memory_space<vmem>>, vector<1x32x8xf32>
    %36 = vector.shape_cast %35 : vector<1x32x8xf32> to vector<32x8xf32>
    %37 = arith.truncf %33 : vector<10x32xf32> to vector<10x32xbf16>
    %38 = arith.truncf %36 : vector<32x8xf32> to vector<32x8xbf16>
    %cst_22 = arith.constant dense<0.000000e+00> : vector<10x8xf32>
    %39 = tpu.matmul %37, %38, %cst_22 {dimension_numbers = #tpu.dot_dimension_numbers<[1], [0], [0], [1], [0, 0, 1, 1], [], []>} : vector<10x32xbf16>, vector<32x8xbf16>, vector<10x8xf32> -> vector<10x8xf32>
    %c0_23 = arith.constant 0 : index
    %c0_24 = arith.constant 0 : index
    %c0_25 = arith.constant 0 : index
    %40 = vector.load %arg7[%c0_23, %c0_24, %c0_25] : memref<8x1x8xf32, #tpu.memory_space<vmem>>, vector<1x1x8xf32>
    %41 = vector.shape_cast %40 : vector<1x1x8xf32> to vector<1x8xf32>
    %42 = vector.broadcast %41 : vector<1x8xf32> to vector<10x8xf32>
    %43 = arith.addf %39, %42 : vector<10x8xf32>
    %c0_26 = arith.constant 0 : index
    %c0_27 = arith.constant 0 : index
    %c0_28 = arith.constant 0 : index
    %44 = vector.load %arg8[%c0_26, %c0_27, %c0_28] : memref<8x32x8xf32, #tpu.memory_space<vmem>>, vector<1x32x8xf32>
    %45 = vector.shape_cast %44 : vector<1x32x8xf32> to vector<32x8xf32>
    %46 = arith.truncf %33 : vector<10x32xf32> to vector<10x32xbf16>
    %47 = arith.truncf %45 : vector<32x8xf32> to vector<32x8xbf16>
    %cst_29 = arith.constant dense<0.000000e+00> : vector<10x8xf32>
    %48 = tpu.matmul %46, %47, %cst_29 {dimension_numbers = #tpu.dot_dimension_numbers<[1], [0], [0], [1], [0, 0, 1, 1], [], []>} : vector<10x32xbf16>, vector<32x8xbf16>, vector<10x8xf32> -> vector<10x8xf32>
    %c0_30 = arith.constant 0 : index
    %c0_31 = arith.constant 0 : index
    %c0_32 = arith.constant 0 : index
    %49 = vector.load %arg9[%c0_30, %c0_31, %c0_32] : memref<8x1x8xf32, #tpu.memory_space<vmem>>, vector<1x1x8xf32>
    %50 = vector.shape_cast %49 : vector<1x1x8xf32> to vector<1x8xf32>
    %51 = vector.broadcast %50 : vector<1x8xf32> to vector<10x8xf32>
    %52 = arith.addf %48, %51 : vector<10x8xf32>
    %c0_33 = arith.constant 0 : index
    %c0_34 = arith.constant 0 : index
    %c0_35 = arith.constant 0 : index
    %53 = vector.load %arg10[%c0_33, %c0_34, %c0_35] : memref<8x32x8xf32, #tpu.memory_space<vmem>>, vector<1x32x8xf32>
    %54 = vector.shape_cast %53 : vector<1x32x8xf32> to vector<32x8xf32>
    %55 = arith.truncf %33 : vector<10x32xf32> to vector<10x32xbf16>
    %56 = arith.truncf %54 : vector<32x8xf32> to vector<32x8xbf16>
    %cst_36 = arith.constant dense<0.000000e+00> : vector<10x8xf32>
    %57 = tpu.matmul %55, %56, %cst_36 {dimension_numbers = #tpu.dot_dimension_numbers<[1], [0], [0], [1], [0, 0, 1, 1], [], []>} : vector<10x32xbf16>, vector<32x8xbf16>, vector<10x8xf32> -> vector<10x8xf32>
    %c0_37 = arith.constant 0 : index
    %c0_38 = arith.constant 0 : index
    %c0_39 = arith.constant 0 : index
    %58 = vector.load %arg11[%c0_37, %c0_38, %c0_39] : memref<8x1x8xf32, #tpu.memory_space<vmem>>, vector<1x1x8xf32>
    %59 = vector.shape_cast %58 : vector<1x1x8xf32> to vector<1x8xf32>
    %60 = vector.broadcast %59 : vector<1x8xf32> to vector<10x8xf32>
    %61 = arith.addf %57, %60 : vector<10x8xf32>
    %62 = arith.truncf %43 : vector<10x8xf32> to vector<10x8xbf16>
    %63 = arith.truncf %52 : vector<10x8xf32> to vector<10x8xbf16>
    %cst_40 = arith.constant dense<0.000000e+00> : vector<10x10xf32>
    %64 = tpu.matmul %62, %63, %cst_40 {dimension_numbers = #tpu.dot_dimension_numbers<[1], [1], [0], [0], [0, 0, 1, 0], [], []>} : vector<10x8xbf16>, vector<10x8xbf16>, vector<10x10xf32> -> vector<10x10xf32>
    %cst_41 = arith.constant 0.353553385 : f32
    %65 = vector.broadcast %cst_41 : f32 to vector<10x10xf32>
    %66 = arith.mulf %64, %65 : vector<10x10xf32>
    %67 = arith.addf %66, %7 : vector<10x10xf32>
    %cst_42 = arith.constant dense<0xFF800000> : vector<10xf32>
    %68 = vector.multi_reduction <maximumf>, %67, %cst_42 [1] : vector<10x10xf32> to vector<10xf32>
    %69 = vector.shape_cast %68 : vector<10xf32> to vector<10x1xf32>
    %70 = vector.broadcast %69 : vector<10x1xf32> to vector<10x10xf32>
    %71 = arith.subf %67, %70 : vector<10x10xf32>
    %72 = math.exp %71 : vector<10x10xf32>
    %cst_43 = arith.constant dense<0.000000e+00> : vector<10xf32>
    %73 = vector.multi_reduction <add>, %72, %cst_43 [1] : vector<10x10xf32> to vector<10xf32>
    %74 = vector.shape_cast %73 : vector<10xf32> to vector<10x1xf32>
    %75 = vector.broadcast %74 : vector<10x1xf32> to vector<10x10xf32>
    %76 = arith.divf %72, %75 : vector<10x10xf32>
    %77 = arith.truncf %76 : vector<10x10xf32> to vector<10x10xbf16>
    %78 = arith.truncf %61 : vector<10x8xf32> to vector<10x8xbf16>
    %cst_44 = arith.constant dense<0.000000e+00> : vector<10x8xf32>
    %79 = tpu.matmul %77, %78, %cst_44 {dimension_numbers = #tpu.dot_dimension_numbers<[1], [0], [0], [1], [0, 0, 1, 1], [], []>} : vector<10x10xbf16>, vector<10x8xbf16>, vector<10x8xf32> -> vector<10x8xf32>
    %c0_45 = arith.constant 0 : index
    %c0_46 = arith.constant 0 : index
    %c0_47 = arith.constant 0 : index
    %80 = vector.load %arg12[%c0_45, %c0_46, %c0_47] : memref<8x8x32xf32, #tpu.memory_space<vmem>>, vector<1x8x32xf32>
    %81 = vector.shape_cast %80 : vector<1x8x32xf32> to vector<8x32xf32>
    %82 = arith.truncf %79 : vector<10x8xf32> to vector<10x8xbf16>
    %83 = arith.truncf %81 : vector<8x32xf32> to vector<8x32xbf16>
    %cst_48 = arith.constant dense<0.000000e+00> : vector<10x32xf32>
    %84 = tpu.matmul %82, %83, %cst_48 {dimension_numbers = #tpu.dot_dimension_numbers<[1], [0], [0], [1], [0, 0, 1, 1], [], []>} : vector<10x8xbf16>, vector<8x32xbf16>, vector<10x32xf32> -> vector<10x32xf32>
    %85 = arith.addf %34, %84 : vector<10x32xf32>
    %c1 = arith.constant 1 : index
    %c0_49 = arith.constant 0 : index
    %c0_50 = arith.constant 0 : index
    %86 = vector.load %arg6[%c1, %c0_49, %c0_50] : memref<8x32x8xf32, #tpu.memory_space<vmem>>, vector<1x32x8xf32>
    %87 = vector.shape_cast %86 : vector<1x32x8xf32> to vector<32x8xf32>
    %88 = arith.truncf %33 : vector<10x32xf32> to vector<10x32xbf16>
    %89 = arith.truncf %87 : vector<32x8xf32> to vector<32x8xbf16>
    %cst_51 = arith.constant dense<0.000000e+00> : vector<10x8xf32>
    %90 = tpu.matmul %88, %89, %cst_51 {dimension_numbers = #tpu.dot_dimension_numbers<[1], [0], [0], [1], [0, 0, 1, 1], [], []>} : vector<10x32xbf16>, vector<32x8xbf16>, vector<10x8xf32> -> vector<10x8xf32>
    %c1_52 = arith.constant 1 : index
    %c0_53 = arith.constant 0 : index
    %c0_54 = arith.constant 0 : index
    %91 = vector.load %arg7[%c1_52, %c0_53, %c0_54] : memref<8x1x8xf32, #tpu.memory_space<vmem>>, vector<1x1x8xf32>
    %92 = vector.shape_cast %91 : vector<1x1x8xf32> to vector<1x8xf32>
    %93 = vector.broadcast %92 : vector<1x8xf32> to vector<10x8xf32>
    %94 = arith.addf %90, %93 : vector<10x8xf32>
    %c1_55 = arith.constant 1 : index
    %c0_56 = arith.constant 0 : index
    %c0_57 = arith.constant 0 : index
    %95 = vector.load %arg8[%c1_55, %c0_56, %c0_57] : memref<8x32x8xf32, #tpu.memory_space<vmem>>, vector<1x32x8xf32>
    %96 = vector.shape_cast %95 : vector<1x32x8xf32> to vector<32x8xf32>
    %97 = arith.truncf %33 : vector<10x32xf32> to vector<10x32xbf16>
    %98 = arith.truncf %96 : vector<32x8xf32> to vector<32x8xbf16>
    %cst_58 = arith.constant dense<0.000000e+00> : vector<10x8xf32>
    %99 = tpu.matmul %97, %98, %cst_58 {dimension_numbers = #tpu.dot_dimension_numbers<[1], [0], [0], [1], [0, 0, 1, 1], [], []>} : vector<10x32xbf16>, vector<32x8xbf16>, vector<10x8xf32> -> vector<10x8xf32>
    %c1_59 = arith.constant 1 : index
    %c0_60 = arith.constant 0 : index
    %c0_61 = arith.constant 0 : index
    %100 = vector.load %arg9[%c1_59, %c0_60, %c0_61] : memref<8x1x8xf32, #tpu.memory_space<vmem>>, vector<1x1x8xf32>
    %101 = vector.shape_cast %100 : vector<1x1x8xf32> to vector<1x8xf32>
    %102 = vector.broadcast %101 : vector<1x8xf32> to vector<10x8xf32>
    %103 = arith.addf %99, %102 : vector<10x8xf32>
    %c1_62 = arith.constant 1 : index
    %c0_63 = arith.constant 0 : index
    %c0_64 = arith.constant 0 : index
    %104 = vector.load %arg10[%c1_62, %c0_63, %c0_64] : memref<8x32x8xf32, #tpu.memory_space<vmem>>, vector<1x32x8xf32>
    %105 = vector.shape_cast %104 : vector<1x32x8xf32> to vector<32x8xf32>
    %106 = arith.truncf %33 : vector<10x32xf32> to vector<10x32xbf16>
    %107 = arith.truncf %105 : vector<32x8xf32> to vector<32x8xbf16>
    %cst_65 = arith.constant dense<0.000000e+00> : vector<10x8xf32>
    %108 = tpu.matmul %106, %107, %cst_65 {dimension_numbers = #tpu.dot_dimension_numbers<[1], [0], [0], [1], [0, 0, 1, 1], [], []>} : vector<10x32xbf16>, vector<32x8xbf16>, vector<10x8xf32> -> vector<10x8xf32>
    %c1_66 = arith.constant 1 : index
    %c0_67 = arith.constant 0 : index
    %c0_68 = arith.constant 0 : index
    %109 = vector.load %arg11[%c1_66, %c0_67, %c0_68] : memref<8x1x8xf32, #tpu.memory_space<vmem>>, vector<1x1x8xf32>
    %110 = vector.shape_cast %109 : vector<1x1x8xf32> to vector<1x8xf32>
    %111 = vector.broadcast %110 : vector<1x8xf32> to vector<10x8xf32>
    %112 = arith.addf %108, %111 : vector<10x8xf32>
    %113 = arith.truncf %94 : vector<10x8xf32> to vector<10x8xbf16>
    %114 = arith.truncf %103 : vector<10x8xf32> to vector<10x8xbf16>
    %cst_69 = arith.constant dense<0.000000e+00> : vector<10x10xf32>
    %115 = tpu.matmul %113, %114, %cst_69 {dimension_numbers = #tpu.dot_dimension_numbers<[1], [1], [0], [0], [0, 0, 1, 0], [], []>} : vector<10x8xbf16>, vector<10x8xbf16>, vector<10x10xf32> -> vector<10x10xf32>
    %cst_70 = arith.constant 0.353553385 : f32
    %116 = vector.broadcast %cst_70 : f32 to vector<10x10xf32>
    %117 = arith.mulf %115, %116 : vector<10x10xf32>
    %118 = arith.addf %117, %7 : vector<10x10xf32>
    %cst_71 = arith.constant dense<0xFF800000> : vector<10xf32>
    %119 = vector.multi_reduction <maximumf>, %118, %cst_71 [1] : vector<10x10xf32> to vector<10xf32>
    %120 = vector.shape_cast %119 : vector<10xf32> to vector<10x1xf32>
    %121 = vector.broadcast %120 : vector<10x1xf32> to vector<10x10xf32>
    %122 = arith.subf %118, %121 : vector<10x10xf32>
    %123 = math.exp %122 : vector<10x10xf32>
    %cst_72 = arith.constant dense<0.000000e+00> : vector<10xf32>
    %124 = vector.multi_reduction <add>, %123, %cst_72 [1] : vector<10x10xf32> to vector<10xf32>
    %125 = vector.shape_cast %124 : vector<10xf32> to vector<10x1xf32>
    %126 = vector.broadcast %125 : vector<10x1xf32> to vector<10x10xf32>
    %127 = arith.divf %123, %126 : vector<10x10xf32>
    %128 = arith.truncf %127 : vector<10x10xf32> to vector<10x10xbf16>
    %129 = arith.truncf %112 : vector<10x8xf32> to vector<10x8xbf16>
    %cst_73 = arith.constant dense<0.000000e+00> : vector<10x8xf32>
    %130 = tpu.matmul %128, %129, %cst_73 {dimension_numbers = #tpu.dot_dimension_numbers<[1], [0], [0], [1], [0, 0, 1, 1], [], []>} : vector<10x10xbf16>, vector<10x8xbf16>, vector<10x8xf32> -> vector<10x8xf32>
    %c1_74 = arith.constant 1 : index
    %c0_75 = arith.constant 0 : index
    %c0_76 = arith.constant 0 : index
    %131 = vector.load %arg12[%c1_74, %c0_75, %c0_76] : memref<8x8x32xf32, #tpu.memory_space<vmem>>, vector<1x8x32xf32>
    %132 = vector.shape_cast %131 : vector<1x8x32xf32> to vector<8x32xf32>
    %133 = arith.truncf %130 : vector<10x8xf32> to vector<10x8xbf16>
    %134 = arith.truncf %132 : vector<8x32xf32> to vector<8x32xbf16>
    %cst_77 = arith.constant dense<0.000000e+00> : vector<10x32xf32>
    %135 = tpu.matmul %133, %134, %cst_77 {dimension_numbers = #tpu.dot_dimension_numbers<[1], [0], [0], [1], [0, 0, 1, 1], [], []>} : vector<10x8xbf16>, vector<8x32xbf16>, vector<10x32xf32> -> vector<10x32xf32>
    %136 = arith.addf %85, %135 : vector<10x32xf32>
    %c2 = arith.constant 2 : index
    %c0_78 = arith.constant 0 : index
    %c0_79 = arith.constant 0 : index
    %137 = vector.load %arg6[%c2, %c0_78, %c0_79] : memref<8x32x8xf32, #tpu.memory_space<vmem>>, vector<1x32x8xf32>
    %138 = vector.shape_cast %137 : vector<1x32x8xf32> to vector<32x8xf32>
    %139 = arith.truncf %33 : vector<10x32xf32> to vector<10x32xbf16>
    %140 = arith.truncf %138 : vector<32x8xf32> to vector<32x8xbf16>
    %cst_80 = arith.constant dense<0.000000e+00> : vector<10x8xf32>
    %141 = tpu.matmul %139, %140, %cst_80 {dimension_numbers = #tpu.dot_dimension_numbers<[1], [0], [0], [1], [0, 0, 1, 1], [], []>} : vector<10x32xbf16>, vector<32x8xbf16>, vector<10x8xf32> -> vector<10x8xf32>
    %c2_81 = arith.constant 2 : index
    %c0_82 = arith.constant 0 : index
    %c0_83 = arith.constant 0 : index
    %142 = vector.load %arg7[%c2_81, %c0_82, %c0_83] : memref<8x1x8xf32, #tpu.memory_space<vmem>>, vector<1x1x8xf32>
    %143 = vector.shape_cast %142 : vector<1x1x8xf32> to vector<1x8xf32>
    %144 = vector.broadcast %143 : vector<1x8xf32> to vector<10x8xf32>
    %145 = arith.addf %141, %144 : vector<10x8xf32>
    %c2_84 = arith.constant 2 : index
    %c0_85 = arith.constant 0 : index
    %c0_86 = arith.constant 0 : index
    %146 = vector.load %arg8[%c2_84, %c0_85, %c0_86] : memref<8x32x8xf32, #tpu.memory_space<vmem>>, vector<1x32x8xf32>
    %147 = vector.shape_cast %146 : vector<1x32x8xf32> to vector<32x8xf32>
    %148 = arith.truncf %33 : vector<10x32xf32> to vector<10x32xbf16>
    %149 = arith.truncf %147 : vector<32x8xf32> to vector<32x8xbf16>
    %cst_87 = arith.constant dense<0.000000e+00> : vector<10x8xf32>
    %150 = tpu.matmul %148, %149, %cst_87 {dimension_numbers = #tpu.dot_dimension_numbers<[1], [0], [0], [1], [0, 0, 1, 1], [], []>} : vector<10x32xbf16>, vector<32x8xbf16>, vector<10x8xf32> -> vector<10x8xf32>
    %c2_88 = arith.constant 2 : index
    %c0_89 = arith.constant 0 : index
    %c0_90 = arith.constant 0 : index
    %151 = vector.load %arg9[%c2_88, %c0_89, %c0_90] : memref<8x1x8xf32, #tpu.memory_space<vmem>>, vector<1x1x8xf32>
    %152 = vector.shape_cast %151 : vector<1x1x8xf32> to vector<1x8xf32>
    %153 = vector.broadcast %152 : vector<1x8xf32> to vector<10x8xf32>
    %154 = arith.addf %150, %153 : vector<10x8xf32>
    %c2_91 = arith.constant 2 : index
    %c0_92 = arith.constant 0 : index
    %c0_93 = arith.constant 0 : index
    %155 = vector.load %arg10[%c2_91, %c0_92, %c0_93] : memref<8x32x8xf32, #tpu.memory_space<vmem>>, vector<1x32x8xf32>
    %156 = vector.shape_cast %155 : vector<1x32x8xf32> to vector<32x8xf32>
    %157 = arith.truncf %33 : vector<10x32xf32> to vector<10x32xbf16>
    %158 = arith.truncf %156 : vector<32x8xf32> to vector<32x8xbf16>
    %cst_94 = arith.constant dense<0.000000e+00> : vector<10x8xf32>
    %159 = tpu.matmul %157, %158, %cst_94 {dimension_numbers = #tpu.dot_dimension_numbers<[1], [0], [0], [1], [0, 0, 1, 1], [], []>} : vector<10x32xbf16>, vector<32x8xbf16>, vector<10x8xf32> -> vector<10x8xf32>
    %c2_95 = arith.constant 2 : index
    %c0_96 = arith.constant 0 : index
    %c0_97 = arith.constant 0 : index
    %160 = vector.load %arg11[%c2_95, %c0_96, %c0_97] : memref<8x1x8xf32, #tpu.memory_space<vmem>>, vector<1x1x8xf32>
    %161 = vector.shape_cast %160 : vector<1x1x8xf32> to vector<1x8xf32>
    %162 = vector.broadcast %161 : vector<1x8xf32> to vector<10x8xf32>
    %163 = arith.addf %159, %162 : vector<10x8xf32>
    %164 = arith.truncf %145 : vector<10x8xf32> to vector<10x8xbf16>
    %165 = arith.truncf %154 : vector<10x8xf32> to vector<10x8xbf16>
    %cst_98 = arith.constant dense<0.000000e+00> : vector<10x10xf32>
    %166 = tpu.matmul %164, %165, %cst_98 {dimension_numbers = #tpu.dot_dimension_numbers<[1], [1], [0], [0], [0, 0, 1, 0], [], []>} : vector<10x8xbf16>, vector<10x8xbf16>, vector<10x10xf32> -> vector<10x10xf32>
    %cst_99 = arith.constant 0.353553385 : f32
    %167 = vector.broadcast %cst_99 : f32 to vector<10x10xf32>
    %168 = arith.mulf %166, %167 : vector<10x10xf32>
    %169 = arith.addf %168, %7 : vector<10x10xf32>
    %cst_100 = arith.constant dense<0xFF800000> : vector<10xf32>
    %170 = vector.multi_reduction <maximumf>, %169, %cst_100 [1] : vector<10x10xf32> to vector<10xf32>
    %171 = vector.shape_cast %170 : vector<10xf32> to vector<10x1xf32>
    %172 = vector.broadcast %171 : vector<10x1xf32> to vector<10x10xf32>
    %173 = arith.subf %169, %172 : vector<10x10xf32>
    %174 = math.exp %173 : vector<10x10xf32>
    %cst_101 = arith.constant dense<0.000000e+00> : vector<10xf32>
    %175 = vector.multi_reduction <add>, %174, %cst_101 [1] : vector<10x10xf32> to vector<10xf32>
    %176 = vector.shape_cast %175 : vector<10xf32> to vector<10x1xf32>
    %177 = vector.broadcast %176 : vector<10x1xf32> to vector<10x10xf32>
    %178 = arith.divf %174, %177 : vector<10x10xf32>
    %179 = arith.truncf %178 : vector<10x10xf32> to vector<10x10xbf16>
    %180 = arith.truncf %163 : vector<10x8xf32> to vector<10x8xbf16>
    %cst_102 = arith.constant dense<0.000000e+00> : vector<10x8xf32>
    %181 = tpu.matmul %179, %180, %cst_102 {dimension_numbers = #tpu.dot_dimension_numbers<[1], [0], [0], [1], [0, 0, 1, 1], [], []>} : vector<10x10xbf16>, vector<10x8xbf16>, vector<10x8xf32> -> vector<10x8xf32>
    %c2_103 = arith.constant 2 : index
    %c0_104 = arith.constant 0 : index
    %c0_105 = arith.constant 0 : index
    %182 = vector.load %arg12[%c2_103, %c0_104, %c0_105] : memref<8x8x32xf32, #tpu.memory_space<vmem>>, vector<1x8x32xf32>
    %183 = vector.shape_cast %182 : vector<1x8x32xf32> to vector<8x32xf32>
    %184 = arith.truncf %181 : vector<10x8xf32> to vector<10x8xbf16>
    %185 = arith.truncf %183 : vector<8x32xf32> to vector<8x32xbf16>
    %cst_106 = arith.constant dense<0.000000e+00> : vector<10x32xf32>
    %186 = tpu.matmul %184, %185, %cst_106 {dimension_numbers = #tpu.dot_dimension_numbers<[1], [0], [0], [1], [0, 0, 1, 1], [], []>} : vector<10x8xbf16>, vector<8x32xbf16>, vector<10x32xf32> -> vector<10x32xf32>
    %187 = arith.addf %136, %186 : vector<10x32xf32>
    %c3 = arith.constant 3 : index
    %c0_107 = arith.constant 0 : index
    %c0_108 = arith.constant 0 : index
    %188 = vector.load %arg6[%c3, %c0_107, %c0_108] : memref<8x32x8xf32, #tpu.memory_space<vmem>>, vector<1x32x8xf32>
    %189 = vector.shape_cast %188 : vector<1x32x8xf32> to vector<32x8xf32>
    %190 = arith.truncf %33 : vector<10x32xf32> to vector<10x32xbf16>
    %191 = arith.truncf %189 : vector<32x8xf32> to vector<32x8xbf16>
    %cst_109 = arith.constant dense<0.000000e+00> : vector<10x8xf32>
    %192 = tpu.matmul %190, %191, %cst_109 {dimension_numbers = #tpu.dot_dimension_numbers<[1], [0], [0], [1], [0, 0, 1, 1], [], []>} : vector<10x32xbf16>, vector<32x8xbf16>, vector<10x8xf32> -> vector<10x8xf32>
    %c3_110 = arith.constant 3 : index
    %c0_111 = arith.constant 0 : index
    %c0_112 = arith.constant 0 : index
    %193 = vector.load %arg7[%c3_110, %c0_111, %c0_112] : memref<8x1x8xf32, #tpu.memory_space<vmem>>, vector<1x1x8xf32>
    %194 = vector.shape_cast %193 : vector<1x1x8xf32> to vector<1x8xf32>
    %195 = vector.broadcast %194 : vector<1x8xf32> to vector<10x8xf32>
    %196 = arith.addf %192, %195 : vector<10x8xf32>
    %c3_113 = arith.constant 3 : index
    %c0_114 = arith.constant 0 : index
    %c0_115 = arith.constant 0 : index
    %197 = vector.load %arg8[%c3_113, %c0_114, %c0_115] : memref<8x32x8xf32, #tpu.memory_space<vmem>>, vector<1x32x8xf32>
    %198 = vector.shape_cast %197 : vector<1x32x8xf32> to vector<32x8xf32>
    %199 = arith.truncf %33 : vector<10x32xf32> to vector<10x32xbf16>
    %200 = arith.truncf %198 : vector<32x8xf32> to vector<32x8xbf16>
    %cst_116 = arith.constant dense<0.000000e+00> : vector<10x8xf32>
    %201 = tpu.matmul %199, %200, %cst_116 {dimension_numbers = #tpu.dot_dimension_numbers<[1], [0], [0], [1], [0, 0, 1, 1], [], []>} : vector<10x32xbf16>, vector<32x8xbf16>, vector<10x8xf32> -> vector<10x8xf32>
    %c3_117 = arith.constant 3 : index
    %c0_118 = arith.constant 0 : index
    %c0_119 = arith.constant 0 : index
    %202 = vector.load %arg9[%c3_117, %c0_118, %c0_119] : memref<8x1x8xf32, #tpu.memory_space<vmem>>, vector<1x1x8xf32>
    %203 = vector.shape_cast %202 : vector<1x1x8xf32> to vector<1x8xf32>
    %204 = vector.broadcast %203 : vector<1x8xf32> to vector<10x8xf32>
    %205 = arith.addf %201, %204 : vector<10x8xf32>
    %c3_120 = arith.constant 3 : index
    %c0_121 = arith.constant 0 : index
    %c0_122 = arith.constant 0 : index
    %206 = vector.load %arg10[%c3_120, %c0_121, %c0_122] : memref<8x32x8xf32, #tpu.memory_space<vmem>>, vector<1x32x8xf32>
    %207 = vector.shape_cast %206 : vector<1x32x8xf32> to vector<32x8xf32>
    %208 = arith.truncf %33 : vector<10x32xf32> to vector<10x32xbf16>
    %209 = arith.truncf %207 : vector<32x8xf32> to vector<32x8xbf16>
    %cst_123 = arith.constant dense<0.000000e+00> : vector<10x8xf32>
    %210 = tpu.matmul %208, %209, %cst_123 {dimension_numbers = #tpu.dot_dimension_numbers<[1], [0], [0], [1], [0, 0, 1, 1], [], []>} : vector<10x32xbf16>, vector<32x8xbf16>, vector<10x8xf32> -> vector<10x8xf32>
    %c3_124 = arith.constant 3 : index
    %c0_125 = arith.constant 0 : index
    %c0_126 = arith.constant 0 : index
    %211 = vector.load %arg11[%c3_124, %c0_125, %c0_126] : memref<8x1x8xf32, #tpu.memory_space<vmem>>, vector<1x1x8xf32>
    %212 = vector.shape_cast %211 : vector<1x1x8xf32> to vector<1x8xf32>
    %213 = vector.broadcast %212 : vector<1x8xf32> to vector<10x8xf32>
    %214 = arith.addf %210, %213 : vector<10x8xf32>
    %215 = arith.truncf %196 : vector<10x8xf32> to vector<10x8xbf16>
    %216 = arith.truncf %205 : vector<10x8xf32> to vector<10x8xbf16>
    %cst_127 = arith.constant dense<0.000000e+00> : vector<10x10xf32>
    %217 = tpu.matmul %215, %216, %cst_127 {dimension_numbers = #tpu.dot_dimension_numbers<[1], [1], [0], [0], [0, 0, 1, 0], [], []>} : vector<10x8xbf16>, vector<10x8xbf16>, vector<10x10xf32> -> vector<10x10xf32>
    %cst_128 = arith.constant 0.353553385 : f32
    %218 = vector.broadcast %cst_128 : f32 to vector<10x10xf32>
    %219 = arith.mulf %217, %218 : vector<10x10xf32>
    %220 = arith.addf %219, %7 : vector<10x10xf32>
    %cst_129 = arith.constant dense<0xFF800000> : vector<10xf32>
    %221 = vector.multi_reduction <maximumf>, %220, %cst_129 [1] : vector<10x10xf32> to vector<10xf32>
    %222 = vector.shape_cast %221 : vector<10xf32> to vector<10x1xf32>
    %223 = vector.broadcast %222 : vector<10x1xf32> to vector<10x10xf32>
    %224 = arith.subf %220, %223 : vector<10x10xf32>
    %225 = math.exp %224 : vector<10x10xf32>
    %cst_130 = arith.constant dense<0.000000e+00> : vector<10xf32>
    %226 = vector.multi_reduction <add>, %225, %cst_130 [1] : vector<10x10xf32> to vector<10xf32>
    %227 = vector.shape_cast %226 : vector<10xf32> to vector<10x1xf32>
    %228 = vector.broadcast %227 : vector<10x1xf32> to vector<10x10xf32>
    %229 = arith.divf %225, %228 : vector<10x10xf32>
    %230 = arith.truncf %229 : vector<10x10xf32> to vector<10x10xbf16>
    %231 = arith.truncf %214 : vector<10x8xf32> to vector<10x8xbf16>
    %cst_131 = arith.constant dense<0.000000e+00> : vector<10x8xf32>
    %232 = tpu.matmul %230, %231, %cst_131 {dimension_numbers = #tpu.dot_dimension_numbers<[1], [0], [0], [1], [0, 0, 1, 1], [], []>} : vector<10x10xbf16>, vector<10x8xbf16>, vector<10x8xf32> -> vector<10x8xf32>
    %c3_132 = arith.constant 3 : index
    %c0_133 = arith.constant 0 : index
    %c0_134 = arith.constant 0 : index
    %233 = vector.load %arg12[%c3_132, %c0_133, %c0_134] : memref<8x8x32xf32, #tpu.memory_space<vmem>>, vector<1x8x32xf32>
    %234 = vector.shape_cast %233 : vector<1x8x32xf32> to vector<8x32xf32>
    %235 = arith.truncf %232 : vector<10x8xf32> to vector<10x8xbf16>
    %236 = arith.truncf %234 : vector<8x32xf32> to vector<8x32xbf16>
    %cst_135 = arith.constant dense<0.000000e+00> : vector<10x32xf32>
    %237 = tpu.matmul %235, %236, %cst_135 {dimension_numbers = #tpu.dot_dimension_numbers<[1], [0], [0], [1], [0, 0, 1, 1], [], []>} : vector<10x8xbf16>, vector<8x32xbf16>, vector<10x32xf32> -> vector<10x32xf32>
    %238 = arith.addf %187, %237 : vector<10x32xf32>
    %239 = arith.addf %6, %238 : vector<10x32xf32>
    %c0_136 = arith.constant 0 : index
    %c0_137 = arith.constant 0 : index
    %c0_138 = arith.constant 0 : index
    %240 = vector.load %arg13[%c0_136, %c0_137, %c0_138] : memref<2x1x32xf32, #tpu.memory_space<vmem>>, vector<1x1x32xf32>
    %241 = vector.shape_cast %240 : vector<1x1x32xf32> to vector<1x32xf32>
    %242 = vector.broadcast %241 : vector<1x32xf32> to vector<10x32xf32>
    %243 = arith.addf %239, %242 : vector<10x32xf32>
    %c0_139 = arith.constant 0 : index
    %c0_140 = arith.constant 0 : index
    %c0_141 = arith.constant 0 : index
    %244 = vector.load %arg16[%c0_139, %c0_140, %c0_141] : memref<2x1x32xf32, #tpu.memory_space<vmem>>, vector<1x1x32xf32>
    %245 = vector.shape_cast %244 : vector<1x1x32xf32> to vector<1x32xf32>
    %c0_142 = arith.constant 0 : index
    %c0_143 = arith.constant 0 : index
    %c0_144 = arith.constant 0 : index
    %246 = vector.load %arg17[%c0_142, %c0_143, %c0_144] : memref<2x1x32xf32, #tpu.memory_space<vmem>>, vector<1x1x32xf32>
    %247 = vector.shape_cast %246 : vector<1x1x32xf32> to vector<1x32xf32>
    %cst_145 = arith.constant dense<0.000000e+00> : vector<10xf32>
    %248 = vector.multi_reduction <add>, %243, %cst_145 [1] : vector<10x32xf32> to vector<10xf32>
    %249 = vector.shape_cast %248 : vector<10xf32> to vector<10x1xf32>
    %cst_146 = arith.constant 3.200000e+01 : f32
    %250 = vector.broadcast %cst_146 : f32 to vector<10x1xf32>
    %251 = arith.divf %249, %250 : vector<10x1xf32>
    %252 = vector.broadcast %251 : vector<10x1xf32> to vector<10x32xf32>
    %253 = arith.subf %243, %252 : vector<10x32xf32>
    %254 = arith.mulf %253, %253 : vector<10x32xf32>
    %cst_147 = arith.constant dense<0.000000e+00> : vector<10xf32>
    %255 = vector.multi_reduction <add>, %254, %cst_147 [1] : vector<10x32xf32> to vector<10xf32>
    %256 = vector.shape_cast %255 : vector<10xf32> to vector<10x1xf32>
    %cst_148 = arith.constant 3.200000e+01 : f32
    %257 = vector.broadcast %cst_148 : f32 to vector<10x1xf32>
    %258 = arith.divf %256, %257 : vector<10x1xf32>
    %259 = vector.broadcast %251 : vector<10x1xf32> to vector<10x32xf32>
    %260 = arith.subf %243, %259 : vector<10x32xf32>
    %cst_149 = arith.constant 9.99999997E-7 : f32
    %261 = vector.broadcast %cst_149 : f32 to vector<10x1xf32>
    %262 = arith.addf %258, %261 : vector<10x1xf32>
    %263 = math.rsqrt %262 : vector<10x1xf32>
    %264 = vector.broadcast %263 : vector<10x1xf32> to vector<10x32xf32>
    %265 = arith.mulf %260, %264 : vector<10x32xf32>
    %266 = vector.broadcast %245 : vector<1x32xf32> to vector<10x32xf32>
    %267 = arith.mulf %265, %266 : vector<10x32xf32>
    %268 = vector.broadcast %247 : vector<1x32xf32> to vector<10x32xf32>
    %269 = arith.addf %267, %268 : vector<10x32xf32>
    %c0_150 = arith.constant 0 : index
    %c0_151 = arith.constant 0 : index
    %c0_152 = arith.constant 0 : index
    %270 = vector.load %arg18[%c0_150, %c0_151, %c0_152] : memref<2x32x128xf32, #tpu.memory_space<vmem>>, vector<1x32x128xf32>
    %271 = vector.shape_cast %270 : vector<1x32x128xf32> to vector<32x128xf32>
    %272 = arith.truncf %269 : vector<10x32xf32> to vector<10x32xbf16>
    %273 = arith.truncf %271 : vector<32x128xf32> to vector<32x128xbf16>
    %cst_153 = arith.constant dense<0.000000e+00> : vector<10x128xf32>
    %274 = tpu.matmul %272, %273, %cst_153 {dimension_numbers = #tpu.dot_dimension_numbers<[1], [0], [0], [1], [0, 0, 1, 1], [], []>} : vector<10x32xbf16>, vector<32x128xbf16>, vector<10x128xf32> -> vector<10x128xf32>
    %c0_154 = arith.constant 0 : index
    %c0_155 = arith.constant 0 : index
    %c0_156 = arith.constant 0 : index
    %275 = vector.load %arg19[%c0_154, %c0_155, %c0_156] : memref<2x1x128xf32, #tpu.memory_space<vmem>>, vector<1x1x128xf32>
    %276 = vector.shape_cast %275 : vector<1x1x128xf32> to vector<1x128xf32>
    %277 = vector.broadcast %276 : vector<1x128xf32> to vector<10x128xf32>
    %278 = arith.addf %274, %277 : vector<10x128xf32>
    %279 = arith.mulf %278, %278 : vector<10x128xf32>
    %280 = arith.mulf %278, %279 : vector<10x128xf32>
    %cst_157 = arith.constant 4.471500e-02 : f32
    %281 = vector.broadcast %cst_157 : f32 to vector<10x128xf32>
    %282 = arith.mulf %281, %280 : vector<10x128xf32>
    %283 = arith.addf %278, %282 : vector<10x128xf32>
    %cst_158 = arith.constant 0.797884583 : f32
    %284 = vector.broadcast %cst_158 : f32 to vector<10x128xf32>
    %285 = arith.mulf %284, %283 : vector<10x128xf32>
    %286 = math.tanh %285 : vector<10x128xf32>
    %cst_159 = arith.constant 1.000000e+00 : f32
    %287 = vector.broadcast %cst_159 : f32 to vector<10x128xf32>
    %288 = arith.addf %287, %286 : vector<10x128xf32>
    %cst_160 = arith.constant 5.000000e-01 : f32
    %289 = vector.broadcast %cst_160 : f32 to vector<10x128xf32>
    %290 = arith.mulf %289, %288 : vector<10x128xf32>
    %291 = arith.mulf %278, %290 : vector<10x128xf32>
    %c0_161 = arith.constant 0 : index
    %c0_162 = arith.constant 0 : index
    %c0_163 = arith.constant 0 : index
    %292 = vector.load %arg20[%c0_161, %c0_162, %c0_163] : memref<2x128x32xf32, #tpu.memory_space<vmem>>, vector<1x128x32xf32>
    %293 = vector.shape_cast %292 : vector<1x128x32xf32> to vector<128x32xf32>
    %294 = arith.truncf %291 : vector<10x128xf32> to vector<10x128xbf16>
    %295 = arith.truncf %293 : vector<128x32xf32> to vector<128x32xbf16>
    %cst_164 = arith.constant dense<0.000000e+00> : vector<10x32xf32>
    %296 = tpu.matmul %294, %295, %cst_164 {dimension_numbers = #tpu.dot_dimension_numbers<[1], [0], [0], [1], [0, 0, 1, 1], [], []>} : vector<10x128xbf16>, vector<128x32xbf16>, vector<10x32xf32> -> vector<10x32xf32>
    %297 = arith.addf %243, %296 : vector<10x32xf32>
    %c0_165 = arith.constant 0 : index
    %c0_166 = arith.constant 0 : index
    %c0_167 = arith.constant 0 : index
    %298 = vector.load %arg21[%c0_165, %c0_166, %c0_167] : memref<2x1x32xf32, #tpu.memory_space<vmem>>, vector<1x1x32xf32>
    %299 = vector.shape_cast %298 : vector<1x1x32xf32> to vector<1x32xf32>
    %300 = vector.broadcast %299 : vector<1x32xf32> to vector<10x32xf32>
    %301 = arith.addf %297, %300 : vector<10x32xf32>
    %c1_168 = arith.constant 1 : index
    %c0_169 = arith.constant 0 : index
    %c0_170 = arith.constant 0 : index
    %302 = vector.load %arg14[%c1_168, %c0_169, %c0_170] : memref<2x1x32xf32, #tpu.memory_space<vmem>>, vector<1x1x32xf32>
    %303 = vector.shape_cast %302 : vector<1x1x32xf32> to vector<1x32xf32>
    %c1_171 = arith.constant 1 : index
    %c0_172 = arith.constant 0 : index
    %c0_173 = arith.constant 0 : index
    %304 = vector.load %arg15[%c1_171, %c0_172, %c0_173] : memref<2x1x32xf32, #tpu.memory_space<vmem>>, vector<1x1x32xf32>
    %305 = vector.shape_cast %304 : vector<1x1x32xf32> to vector<1x32xf32>
    %cst_174 = arith.constant dense<0.000000e+00> : vector<10xf32>
    %306 = vector.multi_reduction <add>, %301, %cst_174 [1] : vector<10x32xf32> to vector<10xf32>
    %307 = vector.shape_cast %306 : vector<10xf32> to vector<10x1xf32>
    %cst_175 = arith.constant 3.200000e+01 : f32
    %308 = vector.broadcast %cst_175 : f32 to vector<10x1xf32>
    %309 = arith.divf %307, %308 : vector<10x1xf32>
    %310 = vector.broadcast %309 : vector<10x1xf32> to vector<10x32xf32>
    %311 = arith.subf %301, %310 : vector<10x32xf32>
    %312 = arith.mulf %311, %311 : vector<10x32xf32>
    %cst_176 = arith.constant dense<0.000000e+00> : vector<10xf32>
    %313 = vector.multi_reduction <add>, %312, %cst_176 [1] : vector<10x32xf32> to vector<10xf32>
    %314 = vector.shape_cast %313 : vector<10xf32> to vector<10x1xf32>
    %cst_177 = arith.constant 3.200000e+01 : f32
    %315 = vector.broadcast %cst_177 : f32 to vector<10x1xf32>
    %316 = arith.divf %314, %315 : vector<10x1xf32>
    %317 = vector.broadcast %309 : vector<10x1xf32> to vector<10x32xf32>
    %318 = arith.subf %301, %317 : vector<10x32xf32>
    %cst_178 = arith.constant 9.99999997E-7 : f32
    %319 = vector.broadcast %cst_178 : f32 to vector<10x1xf32>
    %320 = arith.addf %316, %319 : vector<10x1xf32>
    %321 = math.rsqrt %320 : vector<10x1xf32>
    %322 = vector.broadcast %321 : vector<10x1xf32> to vector<10x32xf32>
    %323 = arith.mulf %318, %322 : vector<10x32xf32>
    %324 = vector.broadcast %303 : vector<1x32xf32> to vector<10x32xf32>
    %325 = arith.mulf %323, %324 : vector<10x32xf32>
    %326 = vector.broadcast %305 : vector<1x32xf32> to vector<10x32xf32>
    %327 = arith.addf %325, %326 : vector<10x32xf32>
    %cst_179 = arith.constant 0.000000e+00 : f32
    %328 = vector.broadcast %cst_179 : f32 to vector<10x32xf32>
    %c4 = arith.constant 4 : index
    %c0_180 = arith.constant 0 : index
    %c0_181 = arith.constant 0 : index
    %329 = vector.load %arg6[%c4, %c0_180, %c0_181] : memref<8x32x8xf32, #tpu.memory_space<vmem>>, vector<1x32x8xf32>
    %330 = vector.shape_cast %329 : vector<1x32x8xf32> to vector<32x8xf32>
    %331 = arith.truncf %327 : vector<10x32xf32> to vector<10x32xbf16>
    %332 = arith.truncf %330 : vector<32x8xf32> to vector<32x8xbf16>
    %cst_182 = arith.constant dense<0.000000e+00> : vector<10x8xf32>
    %333 = tpu.matmul %331, %332, %cst_182 {dimension_numbers = #tpu.dot_dimension_numbers<[1], [0], [0], [1], [0, 0, 1, 1], [], []>} : vector<10x32xbf16>, vector<32x8xbf16>, vector<10x8xf32> -> vector<10x8xf32>
    %c4_183 = arith.constant 4 : index
    %c0_184 = arith.constant 0 : index
    %c0_185 = arith.constant 0 : index
    %334 = vector.load %arg7[%c4_183, %c0_184, %c0_185] : memref<8x1x8xf32, #tpu.memory_space<vmem>>, vector<1x1x8xf32>
    %335 = vector.shape_cast %334 : vector<1x1x8xf32> to vector<1x8xf32>
    %336 = vector.broadcast %335 : vector<1x8xf32> to vector<10x8xf32>
    %337 = arith.addf %333, %336 : vector<10x8xf32>
    %c4_186 = arith.constant 4 : index
    %c0_187 = arith.constant 0 : index
    %c0_188 = arith.constant 0 : index
    %338 = vector.load %arg8[%c4_186, %c0_187, %c0_188] : memref<8x32x8xf32, #tpu.memory_space<vmem>>, vector<1x32x8xf32>
    %339 = vector.shape_cast %338 : vector<1x32x8xf32> to vector<32x8xf32>
    %340 = arith.truncf %327 : vector<10x32xf32> to vector<10x32xbf16>
    %341 = arith.truncf %339 : vector<32x8xf32> to vector<32x8xbf16>
    %cst_189 = arith.constant dense<0.000000e+00> : vector<10x8xf32>
    %342 = tpu.matmul %340, %341, %cst_189 {dimension_numbers = #tpu.dot_dimension_numbers<[1], [0], [0], [1], [0, 0, 1, 1], [], []>} : vector<10x32xbf16>, vector<32x8xbf16>, vector<10x8xf32> -> vector<10x8xf32>
    %c4_190 = arith.constant 4 : index
    %c0_191 = arith.constant 0 : index
    %c0_192 = arith.constant 0 : index
    %343 = vector.load %arg9[%c4_190, %c0_191, %c0_192] : memref<8x1x8xf32, #tpu.memory_space<vmem>>, vector<1x1x8xf32>
    %344 = vector.shape_cast %343 : vector<1x1x8xf32> to vector<1x8xf32>
    %345 = vector.broadcast %344 : vector<1x8xf32> to vector<10x8xf32>
    %346 = arith.addf %342, %345 : vector<10x8xf32>
    %c4_193 = arith.constant 4 : index
    %c0_194 = arith.constant 0 : index
    %c0_195 = arith.constant 0 : index
    %347 = vector.load %arg10[%c4_193, %c0_194, %c0_195] : memref<8x32x8xf32, #tpu.memory_space<vmem>>, vector<1x32x8xf32>
    %348 = vector.shape_cast %347 : vector<1x32x8xf32> to vector<32x8xf32>
    %349 = arith.truncf %327 : vector<10x32xf32> to vector<10x32xbf16>
    %350 = arith.truncf %348 : vector<32x8xf32> to vector<32x8xbf16>
    %cst_196 = arith.constant dense<0.000000e+00> : vector<10x8xf32>
    %351 = tpu.matmul %349, %350, %cst_196 {dimension_numbers = #tpu.dot_dimension_numbers<[1], [0], [0], [1], [0, 0, 1, 1], [], []>} : vector<10x32xbf16>, vector<32x8xbf16>, vector<10x8xf32> -> vector<10x8xf32>
    %c4_197 = arith.constant 4 : index
    %c0_198 = arith.constant 0 : index
    %c0_199 = arith.constant 0 : index
    %352 = vector.load %arg11[%c4_197, %c0_198, %c0_199] : memref<8x1x8xf32, #tpu.memory_space<vmem>>, vector<1x1x8xf32>
    %353 = vector.shape_cast %352 : vector<1x1x8xf32> to vector<1x8xf32>
    %354 = vector.broadcast %353 : vector<1x8xf32> to vector<10x8xf32>
    %355 = arith.addf %351, %354 : vector<10x8xf32>
    %356 = arith.truncf %337 : vector<10x8xf32> to vector<10x8xbf16>
    %357 = arith.truncf %346 : vector<10x8xf32> to vector<10x8xbf16>
    %cst_200 = arith.constant dense<0.000000e+00> : vector<10x10xf32>
    %358 = tpu.matmul %356, %357, %cst_200 {dimension_numbers = #tpu.dot_dimension_numbers<[1], [1], [0], [0], [0, 0, 1, 0], [], []>} : vector<10x8xbf16>, vector<10x8xbf16>, vector<10x10xf32> -> vector<10x10xf32>
    %cst_201 = arith.constant 0.353553385 : f32
    %359 = vector.broadcast %cst_201 : f32 to vector<10x10xf32>
    %360 = arith.mulf %358, %359 : vector<10x10xf32>
    %361 = arith.addf %360, %7 : vector<10x10xf32>
    %cst_202 = arith.constant dense<0xFF800000> : vector<10xf32>
    %362 = vector.multi_reduction <maximumf>, %361, %cst_202 [1] : vector<10x10xf32> to vector<10xf32>
    %363 = vector.shape_cast %362 : vector<10xf32> to vector<10x1xf32>
    %364 = vector.broadcast %363 : vector<10x1xf32> to vector<10x10xf32>
    %365 = arith.subf %361, %364 : vector<10x10xf32>
    %366 = math.exp %365 : vector<10x10xf32>
    %cst_203 = arith.constant dense<0.000000e+00> : vector<10xf32>
    %367 = vector.multi_reduction <add>, %366, %cst_203 [1] : vector<10x10xf32> to vector<10xf32>
    %368 = vector.shape_cast %367 : vector<10xf32> to vector<10x1xf32>
    %369 = vector.broadcast %368 : vector<10x1xf32> to vector<10x10xf32>
    %370 = arith.divf %366, %369 : vector<10x10xf32>
    %371 = arith.truncf %370 : vector<10x10xf32> to vector<10x10xbf16>
    %372 = arith.truncf %355 : vector<10x8xf32> to vector<10x8xbf16>
    %cst_204 = arith.constant dense<0.000000e+00> : vector<10x8xf32>
    %373 = tpu.matmul %371, %372, %cst_204 {dimension_numbers = #tpu.dot_dimension_numbers<[1], [0], [0], [1], [0, 0, 1, 1], [], []>} : vector<10x10xbf16>, vector<10x8xbf16>, vector<10x8xf32> -> vector<10x8xf32>
    %c4_205 = arith.constant 4 : index
    %c0_206 = arith.constant 0 : index
    %c0_207 = arith.constant 0 : index
    %374 = vector.load %arg12[%c4_205, %c0_206, %c0_207] : memref<8x8x32xf32, #tpu.memory_space<vmem>>, vector<1x8x32xf32>
    %375 = vector.shape_cast %374 : vector<1x8x32xf32> to vector<8x32xf32>
    %376 = arith.truncf %373 : vector<10x8xf32> to vector<10x8xbf16>
    %377 = arith.truncf %375 : vector<8x32xf32> to vector<8x32xbf16>
    %cst_208 = arith.constant dense<0.000000e+00> : vector<10x32xf32>
    %378 = tpu.matmul %376, %377, %cst_208 {dimension_numbers = #tpu.dot_dimension_numbers<[1], [0], [0], [1], [0, 0, 1, 1], [], []>} : vector<10x8xbf16>, vector<8x32xbf16>, vector<10x32xf32> -> vector<10x32xf32>
    %379 = arith.addf %328, %378 : vector<10x32xf32>
    %c5 = arith.constant 5 : index
    %c0_209 = arith.constant 0 : index
    %c0_210 = arith.constant 0 : index
    %380 = vector.load %arg6[%c5, %c0_209, %c0_210] : memref<8x32x8xf32, #tpu.memory_space<vmem>>, vector<1x32x8xf32>
    %381 = vector.shape_cast %380 : vector<1x32x8xf32> to vector<32x8xf32>
    %382 = arith.truncf %327 : vector<10x32xf32> to vector<10x32xbf16>
    %383 = arith.truncf %381 : vector<32x8xf32> to vector<32x8xbf16>
    %cst_211 = arith.constant dense<0.000000e+00> : vector<10x8xf32>
    %384 = tpu.matmul %382, %383, %cst_211 {dimension_numbers = #tpu.dot_dimension_numbers<[1], [0], [0], [1], [0, 0, 1, 1], [], []>} : vector<10x32xbf16>, vector<32x8xbf16>, vector<10x8xf32> -> vector<10x8xf32>
    %c5_212 = arith.constant 5 : index
    %c0_213 = arith.constant 0 : index
    %c0_214 = arith.constant 0 : index
    %385 = vector.load %arg7[%c5_212, %c0_213, %c0_214] : memref<8x1x8xf32, #tpu.memory_space<vmem>>, vector<1x1x8xf32>
    %386 = vector.shape_cast %385 : vector<1x1x8xf32> to vector<1x8xf32>
    %387 = vector.broadcast %386 : vector<1x8xf32> to vector<10x8xf32>
    %388 = arith.addf %384, %387 : vector<10x8xf32>
    %c5_215 = arith.constant 5 : index
    %c0_216 = arith.constant 0 : index
    %c0_217 = arith.constant 0 : index
    %389 = vector.load %arg8[%c5_215, %c0_216, %c0_217] : memref<8x32x8xf32, #tpu.memory_space<vmem>>, vector<1x32x8xf32>
    %390 = vector.shape_cast %389 : vector<1x32x8xf32> to vector<32x8xf32>
    %391 = arith.truncf %327 : vector<10x32xf32> to vector<10x32xbf16>
    %392 = arith.truncf %390 : vector<32x8xf32> to vector<32x8xbf16>
    %cst_218 = arith.constant dense<0.000000e+00> : vector<10x8xf32>
    %393 = tpu.matmul %391, %392, %cst_218 {dimension_numbers = #tpu.dot_dimension_numbers<[1], [0], [0], [1], [0, 0, 1, 1], [], []>} : vector<10x32xbf16>, vector<32x8xbf16>, vector<10x8xf32> -> vector<10x8xf32>
    %c5_219 = arith.constant 5 : index
    %c0_220 = arith.constant 0 : index
    %c0_221 = arith.constant 0 : index
    %394 = vector.load %arg9[%c5_219, %c0_220, %c0_221] : memref<8x1x8xf32, #tpu.memory_space<vmem>>, vector<1x1x8xf32>
    %395 = vector.shape_cast %394 : vector<1x1x8xf32> to vector<1x8xf32>
    %396 = vector.broadcast %395 : vector<1x8xf32> to vector<10x8xf32>
    %397 = arith.addf %393, %396 : vector<10x8xf32>
    %c5_222 = arith.constant 5 : index
    %c0_223 = arith.constant 0 : index
    %c0_224 = arith.constant 0 : index
    %398 = vector.load %arg10[%c5_222, %c0_223, %c0_224] : memref<8x32x8xf32, #tpu.memory_space<vmem>>, vector<1x32x8xf32>
    %399 = vector.shape_cast %398 : vector<1x32x8xf32> to vector<32x8xf32>
    %400 = arith.truncf %327 : vector<10x32xf32> to vector<10x32xbf16>
    %401 = arith.truncf %399 : vector<32x8xf32> to vector<32x8xbf16>
    %cst_225 = arith.constant dense<0.000000e+00> : vector<10x8xf32>
    %402 = tpu.matmul %400, %401, %cst_225 {dimension_numbers = #tpu.dot_dimension_numbers<[1], [0], [0], [1], [0, 0, 1, 1], [], []>} : vector<10x32xbf16>, vector<32x8xbf16>, vector<10x8xf32> -> vector<10x8xf32>
    %c5_226 = arith.constant 5 : index
    %c0_227 = arith.constant 0 : index
    %c0_228 = arith.constant 0 : index
    %403 = vector.load %arg11[%c5_226, %c0_227, %c0_228] : memref<8x1x8xf32, #tpu.memory_space<vmem>>, vector<1x1x8xf32>
    %404 = vector.shape_cast %403 : vector<1x1x8xf32> to vector<1x8xf32>
    %405 = vector.broadcast %404 : vector<1x8xf32> to vector<10x8xf32>
    %406 = arith.addf %402, %405 : vector<10x8xf32>
    %407 = arith.truncf %388 : vector<10x8xf32> to vector<10x8xbf16>
    %408 = arith.truncf %397 : vector<10x8xf32> to vector<10x8xbf16>
    %cst_229 = arith.constant dense<0.000000e+00> : vector<10x10xf32>
    %409 = tpu.matmul %407, %408, %cst_229 {dimension_numbers = #tpu.dot_dimension_numbers<[1], [1], [0], [0], [0, 0, 1, 0], [], []>} : vector<10x8xbf16>, vector<10x8xbf16>, vector<10x10xf32> -> vector<10x10xf32>
    %cst_230 = arith.constant 0.353553385 : f32
    %410 = vector.broadcast %cst_230 : f32 to vector<10x10xf32>
    %411 = arith.mulf %409, %410 : vector<10x10xf32>
    %412 = arith.addf %411, %7 : vector<10x10xf32>
    %cst_231 = arith.constant dense<0xFF800000> : vector<10xf32>
    %413 = vector.multi_reduction <maximumf>, %412, %cst_231 [1] : vector<10x10xf32> to vector<10xf32>
    %414 = vector.shape_cast %413 : vector<10xf32> to vector<10x1xf32>
    %415 = vector.broadcast %414 : vector<10x1xf32> to vector<10x10xf32>
    %416 = arith.subf %412, %415 : vector<10x10xf32>
    %417 = math.exp %416 : vector<10x10xf32>
    %cst_232 = arith.constant dense<0.000000e+00> : vector<10xf32>
    %418 = vector.multi_reduction <add>, %417, %cst_232 [1] : vector<10x10xf32> to vector<10xf32>
    %419 = vector.shape_cast %418 : vector<10xf32> to vector<10x1xf32>
    %420 = vector.broadcast %419 : vector<10x1xf32> to vector<10x10xf32>
    %421 = arith.divf %417, %420 : vector<10x10xf32>
    %422 = arith.truncf %421 : vector<10x10xf32> to vector<10x10xbf16>
    %423 = arith.truncf %406 : vector<10x8xf32> to vector<10x8xbf16>
    %cst_233 = arith.constant dense<0.000000e+00> : vector<10x8xf32>
    %424 = tpu.matmul %422, %423, %cst_233 {dimension_numbers = #tpu.dot_dimension_numbers<[1], [0], [0], [1], [0, 0, 1, 1], [], []>} : vector<10x10xbf16>, vector<10x8xbf16>, vector<10x8xf32> -> vector<10x8xf32>
    %c5_234 = arith.constant 5 : index
    %c0_235 = arith.constant 0 : index
    %c0_236 = arith.constant 0 : index
    %425 = vector.load %arg12[%c5_234, %c0_235, %c0_236] : memref<8x8x32xf32, #tpu.memory_space<vmem>>, vector<1x8x32xf32>
    %426 = vector.shape_cast %425 : vector<1x8x32xf32> to vector<8x32xf32>
    %427 = arith.truncf %424 : vector<10x8xf32> to vector<10x8xbf16>
    %428 = arith.truncf %426 : vector<8x32xf32> to vector<8x32xbf16>
    %cst_237 = arith.constant dense<0.000000e+00> : vector<10x32xf32>
    %429 = tpu.matmul %427, %428, %cst_237 {dimension_numbers = #tpu.dot_dimension_numbers<[1], [0], [0], [1], [0, 0, 1, 1], [], []>} : vector<10x8xbf16>, vector<8x32xbf16>, vector<10x32xf32> -> vector<10x32xf32>
    %430 = arith.addf %379, %429 : vector<10x32xf32>
    %c6 = arith.constant 6 : index
    %c0_238 = arith.constant 0 : index
    %c0_239 = arith.constant 0 : index
    %431 = vector.load %arg6[%c6, %c0_238, %c0_239] : memref<8x32x8xf32, #tpu.memory_space<vmem>>, vector<1x32x8xf32>
    %432 = vector.shape_cast %431 : vector<1x32x8xf32> to vector<32x8xf32>
    %433 = arith.truncf %327 : vector<10x32xf32> to vector<10x32xbf16>
    %434 = arith.truncf %432 : vector<32x8xf32> to vector<32x8xbf16>
    %cst_240 = arith.constant dense<0.000000e+00> : vector<10x8xf32>
    %435 = tpu.matmul %433, %434, %cst_240 {dimension_numbers = #tpu.dot_dimension_numbers<[1], [0], [0], [1], [0, 0, 1, 1], [], []>} : vector<10x32xbf16>, vector<32x8xbf16>, vector<10x8xf32> -> vector<10x8xf32>
    %c6_241 = arith.constant 6 : index
    %c0_242 = arith.constant 0 : index
    %c0_243 = arith.constant 0 : index
    %436 = vector.load %arg7[%c6_241, %c0_242, %c0_243] : memref<8x1x8xf32, #tpu.memory_space<vmem>>, vector<1x1x8xf32>
    %437 = vector.shape_cast %436 : vector<1x1x8xf32> to vector<1x8xf32>
    %438 = vector.broadcast %437 : vector<1x8xf32> to vector<10x8xf32>
    %439 = arith.addf %435, %438 : vector<10x8xf32>
    %c6_244 = arith.constant 6 : index
    %c0_245 = arith.constant 0 : index
    %c0_246 = arith.constant 0 : index
    %440 = vector.load %arg8[%c6_244, %c0_245, %c0_246] : memref<8x32x8xf32, #tpu.memory_space<vmem>>, vector<1x32x8xf32>
    %441 = vector.shape_cast %440 : vector<1x32x8xf32> to vector<32x8xf32>
    %442 = arith.truncf %327 : vector<10x32xf32> to vector<10x32xbf16>
    %443 = arith.truncf %441 : vector<32x8xf32> to vector<32x8xbf16>
    %cst_247 = arith.constant dense<0.000000e+00> : vector<10x8xf32>
    %444 = tpu.matmul %442, %443, %cst_247 {dimension_numbers = #tpu.dot_dimension_numbers<[1], [0], [0], [1], [0, 0, 1, 1], [], []>} : vector<10x32xbf16>, vector<32x8xbf16>, vector<10x8xf32> -> vector<10x8xf32>
    %c6_248 = arith.constant 6 : index
    %c0_249 = arith.constant 0 : index
    %c0_250 = arith.constant 0 : index
    %445 = vector.load %arg9[%c6_248, %c0_249, %c0_250] : memref<8x1x8xf32, #tpu.memory_space<vmem>>, vector<1x1x8xf32>
    %446 = vector.shape_cast %445 : vector<1x1x8xf32> to vector<1x8xf32>
    %447 = vector.broadcast %446 : vector<1x8xf32> to vector<10x8xf32>
    %448 = arith.addf %444, %447 : vector<10x8xf32>
    %c6_251 = arith.constant 6 : index
    %c0_252 = arith.constant 0 : index
    %c0_253 = arith.constant 0 : index
    %449 = vector.load %arg10[%c6_251, %c0_252, %c0_253] : memref<8x32x8xf32, #tpu.memory_space<vmem>>, vector<1x32x8xf32>
    %450 = vector.shape_cast %449 : vector<1x32x8xf32> to vector<32x8xf32>
    %451 = arith.truncf %327 : vector<10x32xf32> to vector<10x32xbf16>
    %452 = arith.truncf %450 : vector<32x8xf32> to vector<32x8xbf16>
    %cst_254 = arith.constant dense<0.000000e+00> : vector<10x8xf32>
    %453 = tpu.matmul %451, %452, %cst_254 {dimension_numbers = #tpu.dot_dimension_numbers<[1], [0], [0], [1], [0, 0, 1, 1], [], []>} : vector<10x32xbf16>, vector<32x8xbf16>, vector<10x8xf32> -> vector<10x8xf32>
    %c6_255 = arith.constant 6 : index
    %c0_256 = arith.constant 0 : index
    %c0_257 = arith.constant 0 : index
    %454 = vector.load %arg11[%c6_255, %c0_256, %c0_257] : memref<8x1x8xf32, #tpu.memory_space<vmem>>, vector<1x1x8xf32>
    %455 = vector.shape_cast %454 : vector<1x1x8xf32> to vector<1x8xf32>
    %456 = vector.broadcast %455 : vector<1x8xf32> to vector<10x8xf32>
    %457 = arith.addf %453, %456 : vector<10x8xf32>
    %458 = arith.truncf %439 : vector<10x8xf32> to vector<10x8xbf16>
    %459 = arith.truncf %448 : vector<10x8xf32> to vector<10x8xbf16>
    %cst_258 = arith.constant dense<0.000000e+00> : vector<10x10xf32>
    %460 = tpu.matmul %458, %459, %cst_258 {dimension_numbers = #tpu.dot_dimension_numbers<[1], [1], [0], [0], [0, 0, 1, 0], [], []>} : vector<10x8xbf16>, vector<10x8xbf16>, vector<10x10xf32> -> vector<10x10xf32>
    %cst_259 = arith.constant 0.353553385 : f32
    %461 = vector.broadcast %cst_259 : f32 to vector<10x10xf32>
    %462 = arith.mulf %460, %461 : vector<10x10xf32>
    %463 = arith.addf %462, %7 : vector<10x10xf32>
    %cst_260 = arith.constant dense<0xFF800000> : vector<10xf32>
    %464 = vector.multi_reduction <maximumf>, %463, %cst_260 [1] : vector<10x10xf32> to vector<10xf32>
    %465 = vector.shape_cast %464 : vector<10xf32> to vector<10x1xf32>
    %466 = vector.broadcast %465 : vector<10x1xf32> to vector<10x10xf32>
    %467 = arith.subf %463, %466 : vector<10x10xf32>
    %468 = math.exp %467 : vector<10x10xf32>
    %cst_261 = arith.constant dense<0.000000e+00> : vector<10xf32>
    %469 = vector.multi_reduction <add>, %468, %cst_261 [1] : vector<10x10xf32> to vector<10xf32>
    %470 = vector.shape_cast %469 : vector<10xf32> to vector<10x1xf32>
    %471 = vector.broadcast %470 : vector<10x1xf32> to vector<10x10xf32>
    %472 = arith.divf %468, %471 : vector<10x10xf32>
    %473 = arith.truncf %472 : vector<10x10xf32> to vector<10x10xbf16>
    %474 = arith.truncf %457 : vector<10x8xf32> to vector<10x8xbf16>
    %cst_262 = arith.constant dense<0.000000e+00> : vector<10x8xf32>
    %475 = tpu.matmul %473, %474, %cst_262 {dimension_numbers = #tpu.dot_dimension_numbers<[1], [0], [0], [1], [0, 0, 1, 1], [], []>} : vector<10x10xbf16>, vector<10x8xbf16>, vector<10x8xf32> -> vector<10x8xf32>
    %c6_263 = arith.constant 6 : index
    %c0_264 = arith.constant 0 : index
    %c0_265 = arith.constant 0 : index
    %476 = vector.load %arg12[%c6_263, %c0_264, %c0_265] : memref<8x8x32xf32, #tpu.memory_space<vmem>>, vector<1x8x32xf32>
    %477 = vector.shape_cast %476 : vector<1x8x32xf32> to vector<8x32xf32>
    %478 = arith.truncf %475 : vector<10x8xf32> to vector<10x8xbf16>
    %479 = arith.truncf %477 : vector<8x32xf32> to vector<8x32xbf16>
    %cst_266 = arith.constant dense<0.000000e+00> : vector<10x32xf32>
    %480 = tpu.matmul %478, %479, %cst_266 {dimension_numbers = #tpu.dot_dimension_numbers<[1], [0], [0], [1], [0, 0, 1, 1], [], []>} : vector<10x8xbf16>, vector<8x32xbf16>, vector<10x32xf32> -> vector<10x32xf32>
    %481 = arith.addf %430, %480 : vector<10x32xf32>
    %c7 = arith.constant 7 : index
    %c0_267 = arith.constant 0 : index
    %c0_268 = arith.constant 0 : index
    %482 = vector.load %arg6[%c7, %c0_267, %c0_268] : memref<8x32x8xf32, #tpu.memory_space<vmem>>, vector<1x32x8xf32>
    %483 = vector.shape_cast %482 : vector<1x32x8xf32> to vector<32x8xf32>
    %484 = arith.truncf %327 : vector<10x32xf32> to vector<10x32xbf16>
    %485 = arith.truncf %483 : vector<32x8xf32> to vector<32x8xbf16>
    %cst_269 = arith.constant dense<0.000000e+00> : vector<10x8xf32>
    %486 = tpu.matmul %484, %485, %cst_269 {dimension_numbers = #tpu.dot_dimension_numbers<[1], [0], [0], [1], [0, 0, 1, 1], [], []>} : vector<10x32xbf16>, vector<32x8xbf16>, vector<10x8xf32> -> vector<10x8xf32>
    %c7_270 = arith.constant 7 : index
    %c0_271 = arith.constant 0 : index
    %c0_272 = arith.constant 0 : index
    %487 = vector.load %arg7[%c7_270, %c0_271, %c0_272] : memref<8x1x8xf32, #tpu.memory_space<vmem>>, vector<1x1x8xf32>
    %488 = vector.shape_cast %487 : vector<1x1x8xf32> to vector<1x8xf32>
    %489 = vector.broadcast %488 : vector<1x8xf32> to vector<10x8xf32>
    %490 = arith.addf %486, %489 : vector<10x8xf32>
    %c7_273 = arith.constant 7 : index
    %c0_274 = arith.constant 0 : index
    %c0_275 = arith.constant 0 : index
    %491 = vector.load %arg8[%c7_273, %c0_274, %c0_275] : memref<8x32x8xf32, #tpu.memory_space<vmem>>, vector<1x32x8xf32>
    %492 = vector.shape_cast %491 : vector<1x32x8xf32> to vector<32x8xf32>
    %493 = arith.truncf %327 : vector<10x32xf32> to vector<10x32xbf16>
    %494 = arith.truncf %492 : vector<32x8xf32> to vector<32x8xbf16>
    %cst_276 = arith.constant dense<0.000000e+00> : vector<10x8xf32>
    %495 = tpu.matmul %493, %494, %cst_276 {dimension_numbers = #tpu.dot_dimension_numbers<[1], [0], [0], [1], [0, 0, 1, 1], [], []>} : vector<10x32xbf16>, vector<32x8xbf16>, vector<10x8xf32> -> vector<10x8xf32>
    %c7_277 = arith.constant 7 : index
    %c0_278 = arith.constant 0 : index
    %c0_279 = arith.constant 0 : index
    %496 = vector.load %arg9[%c7_277, %c0_278, %c0_279] : memref<8x1x8xf32, #tpu.memory_space<vmem>>, vector<1x1x8xf32>
    %497 = vector.shape_cast %496 : vector<1x1x8xf32> to vector<1x8xf32>
    %498 = vector.broadcast %497 : vector<1x8xf32> to vector<10x8xf32>
    %499 = arith.addf %495, %498 : vector<10x8xf32>
    %c7_280 = arith.constant 7 : index
    %c0_281 = arith.constant 0 : index
    %c0_282 = arith.constant 0 : index
    %500 = vector.load %arg10[%c7_280, %c0_281, %c0_282] : memref<8x32x8xf32, #tpu.memory_space<vmem>>, vector<1x32x8xf32>
    %501 = vector.shape_cast %500 : vector<1x32x8xf32> to vector<32x8xf32>
    %502 = arith.truncf %327 : vector<10x32xf32> to vector<10x32xbf16>
    %503 = arith.truncf %501 : vector<32x8xf32> to vector<32x8xbf16>
    %cst_283 = arith.constant dense<0.000000e+00> : vector<10x8xf32>
    %504 = tpu.matmul %502, %503, %cst_283 {dimension_numbers = #tpu.dot_dimension_numbers<[1], [0], [0], [1], [0, 0, 1, 1], [], []>} : vector<10x32xbf16>, vector<32x8xbf16>, vector<10x8xf32> -> vector<10x8xf32>
    %c7_284 = arith.constant 7 : index
    %c0_285 = arith.constant 0 : index
    %c0_286 = arith.constant 0 : index
    %505 = vector.load %arg11[%c7_284, %c0_285, %c0_286] : memref<8x1x8xf32, #tpu.memory_space<vmem>>, vector<1x1x8xf32>
    %506 = vector.shape_cast %505 : vector<1x1x8xf32> to vector<1x8xf32>
    %507 = vector.broadcast %506 : vector<1x8xf32> to vector<10x8xf32>
    %508 = arith.addf %504, %507 : vector<10x8xf32>
    %509 = arith.truncf %490 : vector<10x8xf32> to vector<10x8xbf16>
    %510 = arith.truncf %499 : vector<10x8xf32> to vector<10x8xbf16>
    %cst_287 = arith.constant dense<0.000000e+00> : vector<10x10xf32>
    %511 = tpu.matmul %509, %510, %cst_287 {dimension_numbers = #tpu.dot_dimension_numbers<[1], [1], [0], [0], [0, 0, 1, 0], [], []>} : vector<10x8xbf16>, vector<10x8xbf16>, vector<10x10xf32> -> vector<10x10xf32>
    %cst_288 = arith.constant 0.353553385 : f32
    %512 = vector.broadcast %cst_288 : f32 to vector<10x10xf32>
    %513 = arith.mulf %511, %512 : vector<10x10xf32>
    %514 = arith.addf %513, %7 : vector<10x10xf32>
    %cst_289 = arith.constant dense<0xFF800000> : vector<10xf32>
    %515 = vector.multi_reduction <maximumf>, %514, %cst_289 [1] : vector<10x10xf32> to vector<10xf32>
    %516 = vector.shape_cast %515 : vector<10xf32> to vector<10x1xf32>
    %517 = vector.broadcast %516 : vector<10x1xf32> to vector<10x10xf32>
    %518 = arith.subf %514, %517 : vector<10x10xf32>
    %519 = math.exp %518 : vector<10x10xf32>
    %cst_290 = arith.constant dense<0.000000e+00> : vector<10xf32>
    %520 = vector.multi_reduction <add>, %519, %cst_290 [1] : vector<10x10xf32> to vector<10xf32>
    %521 = vector.shape_cast %520 : vector<10xf32> to vector<10x1xf32>
    %522 = vector.broadcast %521 : vector<10x1xf32> to vector<10x10xf32>
    %523 = arith.divf %519, %522 : vector<10x10xf32>
    %524 = arith.truncf %523 : vector<10x10xf32> to vector<10x10xbf16>
    %525 = arith.truncf %508 : vector<10x8xf32> to vector<10x8xbf16>
    %cst_291 = arith.constant dense<0.000000e+00> : vector<10x8xf32>
    %526 = tpu.matmul %524, %525, %cst_291 {dimension_numbers = #tpu.dot_dimension_numbers<[1], [0], [0], [1], [0, 0, 1, 1], [], []>} : vector<10x10xbf16>, vector<10x8xbf16>, vector<10x8xf32> -> vector<10x8xf32>
    %c7_292 = arith.constant 7 : index
    %c0_293 = arith.constant 0 : index
    %c0_294 = arith.constant 0 : index
    %527 = vector.load %arg12[%c7_292, %c0_293, %c0_294] : memref<8x8x32xf32, #tpu.memory_space<vmem>>, vector<1x8x32xf32>
    %528 = vector.shape_cast %527 : vector<1x8x32xf32> to vector<8x32xf32>
    %529 = arith.truncf %526 : vector<10x8xf32> to vector<10x8xbf16>
    %530 = arith.truncf %528 : vector<8x32xf32> to vector<8x32xbf16>
    %cst_295 = arith.constant dense<0.000000e+00> : vector<10x32xf32>
    %531 = tpu.matmul %529, %530, %cst_295 {dimension_numbers = #tpu.dot_dimension_numbers<[1], [0], [0], [1], [0, 0, 1, 1], [], []>} : vector<10x8xbf16>, vector<8x32xbf16>, vector<10x32xf32> -> vector<10x32xf32>
    %532 = arith.addf %481, %531 : vector<10x32xf32>
    %533 = arith.addf %301, %532 : vector<10x32xf32>
    %c1_296 = arith.constant 1 : index
    %c0_297 = arith.constant 0 : index
    %c0_298 = arith.constant 0 : index
    %534 = vector.load %arg13[%c1_296, %c0_297, %c0_298] : memref<2x1x32xf32, #tpu.memory_space<vmem>>, vector<1x1x32xf32>
    %535 = vector.shape_cast %534 : vector<1x1x32xf32> to vector<1x32xf32>
    %536 = vector.broadcast %535 : vector<1x32xf32> to vector<10x32xf32>
    %537 = arith.addf %533, %536 : vector<10x32xf32>
    %c1_299 = arith.constant 1 : index
    %c0_300 = arith.constant 0 : index
    %c0_301 = arith.constant 0 : index
    %538 = vector.load %arg16[%c1_299, %c0_300, %c0_301] : memref<2x1x32xf32, #tpu.memory_space<vmem>>, vector<1x1x32xf32>
    %539 = vector.shape_cast %538 : vector<1x1x32xf32> to vector<1x32xf32>
    %c1_302 = arith.constant 1 : index
    %c0_303 = arith.constant 0 : index
    %c0_304 = arith.constant 0 : index
    %540 = vector.load %arg17[%c1_302, %c0_303, %c0_304] : memref<2x1x32xf32, #tpu.memory_space<vmem>>, vector<1x1x32xf32>
    %541 = vector.shape_cast %540 : vector<1x1x32xf32> to vector<1x32xf32>
    %cst_305 = arith.constant dense<0.000000e+00> : vector<10xf32>
    %542 = vector.multi_reduction <add>, %537, %cst_305 [1] : vector<10x32xf32> to vector<10xf32>
    %543 = vector.shape_cast %542 : vector<10xf32> to vector<10x1xf32>
    %cst_306 = arith.constant 3.200000e+01 : f32
    %544 = vector.broadcast %cst_306 : f32 to vector<10x1xf32>
    %545 = arith.divf %543, %544 : vector<10x1xf32>
    %546 = vector.broadcast %545 : vector<10x1xf32> to vector<10x32xf32>
    %547 = arith.subf %537, %546 : vector<10x32xf32>
    %548 = arith.mulf %547, %547 : vector<10x32xf32>
    %cst_307 = arith.constant dense<0.000000e+00> : vector<10xf32>
    %549 = vector.multi_reduction <add>, %548, %cst_307 [1] : vector<10x32xf32> to vector<10xf32>
    %550 = vector.shape_cast %549 : vector<10xf32> to vector<10x1xf32>
    %cst_308 = arith.constant 3.200000e+01 : f32
    %551 = vector.broadcast %cst_308 : f32 to vector<10x1xf32>
    %552 = arith.divf %550, %551 : vector<10x1xf32>
    %553 = vector.broadcast %545 : vector<10x1xf32> to vector<10x32xf32>
    %554 = arith.subf %537, %553 : vector<10x32xf32>
    %cst_309 = arith.constant 9.99999997E-7 : f32
    %555 = vector.broadcast %cst_309 : f32 to vector<10x1xf32>
    %556 = arith.addf %552, %555 : vector<10x1xf32>
    %557 = math.rsqrt %556 : vector<10x1xf32>
    %558 = vector.broadcast %557 : vector<10x1xf32> to vector<10x32xf32>
    %559 = arith.mulf %554, %558 : vector<10x32xf32>
    %560 = vector.broadcast %539 : vector<1x32xf32> to vector<10x32xf32>
    %561 = arith.mulf %559, %560 : vector<10x32xf32>
    %562 = vector.broadcast %541 : vector<1x32xf32> to vector<10x32xf32>
    %563 = arith.addf %561, %562 : vector<10x32xf32>
    %c1_310 = arith.constant 1 : index
    %c0_311 = arith.constant 0 : index
    %c0_312 = arith.constant 0 : index
    %564 = vector.load %arg18[%c1_310, %c0_311, %c0_312] : memref<2x32x128xf32, #tpu.memory_space<vmem>>, vector<1x32x128xf32>
    %565 = vector.shape_cast %564 : vector<1x32x128xf32> to vector<32x128xf32>
    %566 = arith.truncf %563 : vector<10x32xf32> to vector<10x32xbf16>
    %567 = arith.truncf %565 : vector<32x128xf32> to vector<32x128xbf16>
    %cst_313 = arith.constant dense<0.000000e+00> : vector<10x128xf32>
    %568 = tpu.matmul %566, %567, %cst_313 {dimension_numbers = #tpu.dot_dimension_numbers<[1], [0], [0], [1], [0, 0, 1, 1], [], []>} : vector<10x32xbf16>, vector<32x128xbf16>, vector<10x128xf32> -> vector<10x128xf32>
    %c1_314 = arith.constant 1 : index
    %c0_315 = arith.constant 0 : index
    %c0_316 = arith.constant 0 : index
    %569 = vector.load %arg19[%c1_314, %c0_315, %c0_316] : memref<2x1x128xf32, #tpu.memory_space<vmem>>, vector<1x1x128xf32>
    %570 = vector.shape_cast %569 : vector<1x1x128xf32> to vector<1x128xf32>
    %571 = vector.broadcast %570 : vector<1x128xf32> to vector<10x128xf32>
    %572 = arith.addf %568, %571 : vector<10x128xf32>
    %573 = arith.mulf %572, %572 : vector<10x128xf32>
    %574 = arith.mulf %572, %573 : vector<10x128xf32>
    %cst_317 = arith.constant 4.471500e-02 : f32
    %575 = vector.broadcast %cst_317 : f32 to vector<10x128xf32>
    %576 = arith.mulf %575, %574 : vector<10x128xf32>
    %577 = arith.addf %572, %576 : vector<10x128xf32>
    %cst_318 = arith.constant 0.797884583 : f32
    %578 = vector.broadcast %cst_318 : f32 to vector<10x128xf32>
    %579 = arith.mulf %578, %577 : vector<10x128xf32>
    %580 = math.tanh %579 : vector<10x128xf32>
    %cst_319 = arith.constant 1.000000e+00 : f32
    %581 = vector.broadcast %cst_319 : f32 to vector<10x128xf32>
    %582 = arith.addf %581, %580 : vector<10x128xf32>
    %cst_320 = arith.constant 5.000000e-01 : f32
    %583 = vector.broadcast %cst_320 : f32 to vector<10x128xf32>
    %584 = arith.mulf %583, %582 : vector<10x128xf32>
    %585 = arith.mulf %572, %584 : vector<10x128xf32>
    %c1_321 = arith.constant 1 : index
    %c0_322 = arith.constant 0 : index
    %c0_323 = arith.constant 0 : index
    %586 = vector.load %arg20[%c1_321, %c0_322, %c0_323] : memref<2x128x32xf32, #tpu.memory_space<vmem>>, vector<1x128x32xf32>
    %587 = vector.shape_cast %586 : vector<1x128x32xf32> to vector<128x32xf32>
    %588 = arith.truncf %585 : vector<10x128xf32> to vector<10x128xbf16>
    %589 = arith.truncf %587 : vector<128x32xf32> to vector<128x32xbf16>
    %cst_324 = arith.constant dense<0.000000e+00> : vector<10x32xf32>
    %590 = tpu.matmul %588, %589, %cst_324 {dimension_numbers = #tpu.dot_dimension_numbers<[1], [0], [0], [1], [0, 0, 1, 1], [], []>} : vector<10x128xbf16>, vector<128x32xbf16>, vector<10x32xf32> -> vector<10x32xf32>
    %591 = arith.addf %537, %590 : vector<10x32xf32>
    %c1_325 = arith.constant 1 : index
    %c0_326 = arith.constant 0 : index
    %c0_327 = arith.constant 0 : index
    %592 = vector.load %arg21[%c1_325, %c0_326, %c0_327] : memref<2x1x32xf32, #tpu.memory_space<vmem>>, vector<1x1x32xf32>
    %593 = vector.shape_cast %592 : vector<1x1x32xf32> to vector<1x32xf32>
    %594 = vector.broadcast %593 : vector<1x32xf32> to vector<10x32xf32>
    %595 = arith.addf %591, %594 : vector<10x32xf32>
    %c0_328 = arith.constant 0 : index
    %c0_329 = arith.constant 0 : index
    %596 = vector.load %arg22[%c0_328, %c0_329] : memref<1x32xf32, #tpu.memory_space<vmem>>, vector<1x32xf32>
    %c0_330 = arith.constant 0 : index
    %c0_331 = arith.constant 0 : index
    %597 = vector.load %arg23[%c0_330, %c0_331] : memref<1x32xf32, #tpu.memory_space<vmem>>, vector<1x32xf32>
    %cst_332 = arith.constant dense<0.000000e+00> : vector<10xf32>
    %598 = vector.multi_reduction <add>, %595, %cst_332 [1] : vector<10x32xf32> to vector<10xf32>
    %599 = vector.shape_cast %598 : vector<10xf32> to vector<10x1xf32>
    %cst_333 = arith.constant 3.200000e+01 : f32
    %600 = vector.broadcast %cst_333 : f32 to vector<10x1xf32>
    %601 = arith.divf %599, %600 : vector<10x1xf32>
    %602 = vector.broadcast %601 : vector<10x1xf32> to vector<10x32xf32>
    %603 = arith.subf %595, %602 : vector<10x32xf32>
    %604 = arith.mulf %603, %603 : vector<10x32xf32>
    %cst_334 = arith.constant dense<0.000000e+00> : vector<10xf32>
    %605 = vector.multi_reduction <add>, %604, %cst_334 [1] : vector<10x32xf32> to vector<10xf32>
    %606 = vector.shape_cast %605 : vector<10xf32> to vector<10x1xf32>
    %cst_335 = arith.constant 3.200000e+01 : f32
    %607 = vector.broadcast %cst_335 : f32 to vector<10x1xf32>
    %608 = arith.divf %606, %607 : vector<10x1xf32>
    %609 = vector.broadcast %601 : vector<10x1xf32> to vector<10x32xf32>
    %610 = arith.subf %595, %609 : vector<10x32xf32>
    %cst_336 = arith.constant 9.99999997E-7 : f32
    %611 = vector.broadcast %cst_336 : f32 to vector<10x1xf32>
    %612 = arith.addf %608, %611 : vector<10x1xf32>
    %613 = math.rsqrt %612 : vector<10x1xf32>
    %614 = vector.broadcast %613 : vector<10x1xf32> to vector<10x32xf32>
    %615 = arith.mulf %610, %614 : vector<10x32xf32>
    %616 = vector.broadcast %596 : vector<1x32xf32> to vector<10x32xf32>
    %617 = arith.mulf %615, %616 : vector<10x32xf32>
    %618 = vector.broadcast %597 : vector<1x32xf32> to vector<10x32xf32>
    %619 = arith.addf %617, %618 : vector<10x32xf32>
    %c0_337 = arith.constant 0 : index
    %c0_338 = arith.constant 0 : index
    %620 = vector.load %arg4[%c0_337, %c0_338] : memref<2x10xf32, #tpu.memory_space<vmem>>, vector<2x10xf32>
    %cst_339 = arith.constant dense<0.000000e+00> : vector<2x32xf32>
    %621 = tpu.matmul %620, %619, %cst_339 {dimension_numbers = #tpu.dot_dimension_numbers<[1], [0], [0], [1], [0, 0, 1, 1], [], []>} : vector<2x10xf32>, vector<10x32xf32>, vector<2x32xf32> -> vector<2x32xf32>
    %c0_340 = arith.constant 0 : index
    %c0_341 = arith.constant 0 : index
    %622 = vector.load %arg27[%c0_340, %c0_341] : memref<2x32xf32, #tpu.memory_space<vmem>>, vector<2x32xf32>
    tpu.vector_store %arg27[%c0_340, %c0_341], %621 {strides = array<i32>} : memref<2x32xf32, #tpu.memory_space<vmem>>, vector<2x32xf32>,
    %c0_342 = arith.constant 0 : index
    %c0_343 = arith.constant 0 : index
    %623 = vector.load %arg24[%c0_342, %c0_343] : memref<32x10xf32, #tpu.memory_space<vmem>>, vector<32x10xf32>
    %624 = arith.truncf %621 : vector<2x32xf32> to vector<2x32xbf16>
    %625 = arith.truncf %623 : vector<32x10xf32> to vector<32x10xbf16>
    %cst_344 = arith.constant dense<0.000000e+00> : vector<2x10xf32>
    %626 = tpu.matmul %624, %625, %cst_344 {dimension_numbers = #tpu.dot_dimension_numbers<[1], [0], [0], [1], [0, 0, 1, 1], [], []>} : vector<2x32xbf16>, vector<32x10xbf16>, vector<2x10xf32> -> vector<2x10xf32>
    %c0_345 = arith.constant 0 : index
    %c0_346 = arith.constant 0 : index
    %627 = vector.load %arg25[%c0_345, %c0_346] : memref<1x10xf32, #tpu.memory_space<vmem>>, vector<1x10xf32>
    %628 = vector.broadcast %627 : vector<1x10xf32> to vector<2x10xf32>
    %629 = arith.addf %626, %628 : vector<2x10xf32>
    %c0_347 = arith.constant 0 : index
    %c0_348 = arith.constant 0 : index
    %630 = vector.load %arg26[%c0_347, %c0_348] : memref<2x10xf32, #tpu.memory_space<vmem>>, vector<2x10xf32>
    tpu.vector_store %arg26[%c0_347, %c0_348], %629 {strides = array<i32>} : memref<2x10xf32, #tpu.memory_space<vmem>>, vector<2x10xf32>,
    return
  }
  func.func @transform_0(%arg0: i32) -> (i32, i32) {
    %c0_i32 = arith.constant 0 : i32
    %c0_i32_0 = arith.constant 0 : i32
    %c0_i32_1 = arith.constant 0 : i32
    return %c0_i32, %c0_i32_0 : i32, i32
  }
  func.func @transform_1(%arg0: i32) -> (i32, i32) {
    %c0_i32 = arith.constant 0 : i32
    %c0_i32_0 = arith.constant 0 : i32
    %c0_i32_1 = arith.constant 0 : i32
    return %c0_i32, %c0_i32_0 : i32, i32
  }
  func.func @transform_2(%arg0: i32) -> (i32, i32) {
    %c0_i32 = arith.constant 0 : i32
    %c0_i32_0 = arith.constant 0 : i32
    %c0_i32_1 = arith.constant 0 : i32
    return %c0_i32, %c0_i32_0 : i32, i32
  }
  func.func @transform_3(%arg0: i32) -> (i32, i32) {
    %c0_i32 = arith.constant 0 : i32
    %c0_i32_0 = arith.constant 0 : i32
    %c0_i32_1 = arith.constant 0 : i32
    return %c0_i32, %c0_i32_0 : i32, i32
  }
  func.func @transform_4(%arg0: i32) -> (i32, i32) {
    %c0_i32 = arith.constant 0 : i32
    %c0_i32_0 = arith.constant 0 : i32
    %c0_i32_1 = arith.constant 0 : i32
    return %c0_i32, %c0_i32_0 : i32, i32
  }
  func.func @transform_5(%arg0: i32) -> (i32, i32, i32) {
    %c0_i32 = arith.constant 0 : i32
    %c0_i32_0 = arith.constant 0 : i32
    %c0_i32_1 = arith.constant 0 : i32
    %c0_i32_2 = arith.constant 0 : i32
    return %c0_i32, %c0_i32_0, %c0_i32_1 : i32, i32, i32
  }
  func.func @transform_6(%arg0: i32) -> (i32, i32, i32) {
    %c0_i32 = arith.constant 0 : i32
    %c0_i32_0 = arith.constant 0 : i32
    %c0_i32_1 = arith.constant 0 : i32
    %c0_i32_2 = arith.constant 0 : i32
    return %c0_i32, %c0_i32_0, %c0_i32_1 : i32, i32, i32
  }
  func.func @transform_7(%arg0: i32) -> (i32, i32, i32) {
    %c0_i32 = arith.constant 0 : i32
    %c0_i32_0 = arith.constant 0 : i32
    %c0_i32_1 = arith.constant 0 : i32
    %c0_i32_2 = arith.constant 0 : i32
    return %c0_i32, %c0_i32_0, %c0_i32_1 : i32, i32, i32
  }
  func.func @transform_8(%arg0: i32) -> (i32, i32, i32) {
    %c0_i32 = arith.constant 0 : i32
    %c0_i32_0 = arith.constant 0 : i32
    %c0_i32_1 = arith.constant 0 : i32
    %c0_i32_2 = arith.constant 0 : i32
    return %c0_i32, %c0_i32_0, %c0_i32_1 : i32, i32, i32
  }
  func.func @transform_9(%arg0: i32) -> (i32, i32, i32) {
    %c0_i32 = arith.constant 0 : i32
    %c0_i32_0 = arith.constant 0 : i32
    %c0_i32_1 = arith.constant 0 : i32
    %c0_i32_2 = arith.constant 0 : i32
    return %c0_i32, %c0_i32_0, %c0_i32_1 : i32, i32, i32
  }
  func.func @transform_10(%arg0: i32) -> (i32, i32, i32) {
    %c0_i32 = arith.constant 0 : i32
    %c0_i32_0 = arith.constant 0 : i32
    %c0_i32_1 = arith.constant 0 : i32
    %c0_i32_2 = arith.constant 0 : i32
    return %c0_i32, %c0_i32_0, %c0_i32_1 : i32, i32, i32
  }
  func.func @transform_11(%arg0: i32) -> (i32, i32, i32) {
    %c0_i32 = arith.constant 0 : i32
    %c0_i32_0 = arith.constant 0 : i32
    %c0_i32_1 = arith.constant 0 : i32
    %c0_i32_2 = arith.constant 0 : i32
    return %c0_i32, %c0_i32_0, %c0_i32_1 : i32, i32, i32
  }
  func.func @transform_12(%arg0: i32) -> (i32, i32, i32) {
    %c0_i32 = arith.constant 0 : i32
    %c0_i32_0 = arith.constant 0 : i32
    %c0_i32_1 = arith.constant 0 : i32
    %c0_i32_2 = arith.constant 0 : i32
    return %c0_i32, %c0_i32_0, %c0_i32_1 : i32, i32, i32
  }
  func.func @transform_13(%arg0: i32) -> (i32, i32, i32) {
    %c0_i32 = arith.constant 0 : i32
    %c0_i32_0 = arith.constant 0 : i32
    %c0_i32_1 = arith.constant 0 : i32
    %c0_i32_2 = arith.constant 0 : i32
    return %c0_i32, %c0_i32_0, %c0_i32_1 : i32, i32, i32
  }
  func.func @transform_14(%arg0: i32) -> (i32, i32, i32) {
    %c0_i32 = arith.constant 0 : i32
    %c0_i32_0 = arith.constant 0 : i32
    %c0_i32_1 = arith.constant 0 : i32
    %c0_i32_2 = arith.constant 0 : i32
    return %c0_i32, %c0_i32_0, %c0_i32_1 : i32, i32, i32
  }
  func.func @transform_15(%arg0: i32) -> (i32, i32, i32) {
    %c0_i32 = arith.constant 0 : i32
    %c0_i32_0 = arith.constant 0 : i32
    %c0_i32_1 = arith.constant 0 : i32
    %c0_i32_2 = arith.constant 0 : i32
    return %c0_i32, %c0_i32_0, %c0_i32_1 : i32, i32, i32
  }
  func.func @transform_16(%arg0: i32) -> (i32, i32, i32) {
    %c0_i32 = arith.constant 0 : i32
    %c0_i32_0 = arith.constant 0 : i32
    %c0_i32_1 = arith.constant 0 : i32
    %c0_i32_2 = arith.constant 0 : i32
    return %c0_i32, %c0_i32_0, %c0_i32_1 : i32, i32, i32
  }
  func.func @transform_17(%arg0: i32) -> (i32, i32, i32) {
    %c0_i32 = arith.constant 0 : i32
    %c0_i32_0 = arith.constant 0 : i32
    %c0_i32_1 = arith.constant 0 : i32
    %c0_i32_2 = arith.constant 0 : i32
    return %c0_i32, %c0_i32_0, %c0_i32_1 : i32, i32, i32
  }
  func.func @transform_18(%arg0: i32) -> (i32, i32, i32) {
    %c0_i32 = arith.constant 0 : i32
    %c0_i32_0 = arith.constant 0 : i32
    %c0_i32_1 = arith.constant 0 : i32
    %c0_i32_2 = arith.constant 0 : i32
    return %c0_i32, %c0_i32_0, %c0_i32_1 : i32, i32, i32
  }
  func.func @transform_19(%arg0: i32) -> (i32, i32, i32) {
    %c0_i32 = arith.constant 0 : i32
    %c0_i32_0 = arith.constant 0 : i32
    %c0_i32_1 = arith.constant 0 : i32
    %c0_i32_2 = arith.constant 0 : i32
    return %c0_i32, %c0_i32_0, %c0_i32_1 : i32, i32, i32
  }
  func.func @transform_20(%arg0: i32) -> (i32, i32, i32) {
    %c0_i32 = arith.constant 0 : i32
    %c0_i32_0 = arith.constant 0 : i32
    %c0_i32_1 = arith.constant 0 : i32
    %c0_i32_2 = arith.constant 0 : i32
    return %c0_i32, %c0_i32_0, %c0_i32_1 : i32, i32, i32
  }
  func.func @transform_21(%arg0: i32) -> (i32, i32) {
    %c0_i32 = arith.constant 0 : i32
    %c0_i32_0 = arith.constant 0 : i32
    %c0_i32_1 = arith.constant 0 : i32
    return %c0_i32, %c0_i32_0 : i32, i32
  }
  func.func @transform_22(%arg0: i32) -> (i32, i32) {
    %c0_i32 = arith.constant 0 : i32
    %c0_i32_0 = arith.constant 0 : i32
    %c0_i32_1 = arith.constant 0 : i32
    return %c0_i32, %c0_i32_0 : i32, i32
  }
  func.func @transform_23(%arg0: i32) -> (i32, i32) {
    %c0_i32 = arith.constant 0 : i32
    %c0_i32_0 = arith.constant 0 : i32
    %c0_i32_1 = arith.constant 0 : i32
    return %c0_i32, %c0_i32_0 : i32, i32
  }
  func.func @transform_24(%arg0: i32) -> (i32, i32) {
    %c0_i32 = arith.constant 0 : i32
    %c0_i32_0 = arith.constant 0 : i32
    %c0_i32_1 = arith.constant 0 : i32
    return %c0_i32, %c0_i32_0 : i32, i32
  }
  func.func @transform_25(%arg0: i32) -> (i32, i32) {
    %c0_i32 = arith.constant 0 : i32
    %c0_i32_0 = arith.constant 0 : i32
    %c0_i32_1 = arith.constant 0 : i32
    return %c0_i32, %c0_i32_0 : i32, i32
  }
  func.func @transform_26(%arg0: i32) -> (i32, i32) {
    %c0_i32 = arith.constant 0 : i32
    %c0_i32_0 = arith.constant 0 : i32
    %c0_i32_1 = arith.constant 0 : i32
    return %c0_i32, %c0_i32_0 : i32, i32
  }
}

</mosaic_0001>

<bundles_post_ra>
// kernel: basenet_forward.1
= control target key start
LH: loop header
LB: loop body
LE: loop exit
PB: predicated region body
PF: predicated region fallthrough
CT: control target
= control target key end

     0   :  { %s6414_s0 = inlined_call_operand.vmem [shape: f32[10,768], index: 0, kind: input, shape index: {}]   ;;  %s6415_s1 = inlined_call_operand.vmem [shape: f32[10,32], index: 1, kind: input, shape index: {}]   ;;  %s6416_s2 = inlined_call_operand.vmem [shape: f32[10,10], index: 2, kind: input, shape index: {}]   ;;  %s6417_s3 = inlined_call_operand.vmem [shape: f32[2,10], index: 3, kind: input, shape index: {}]   ;;  %s6418_s4 = inlined_call_operand.vmem [shape: f32[768,32], index: 4, kind: input, shape index: {}]   ;;  %s6419_s5 = inlined_call_operand.vmem [shape: f32[8,32,8], index: 5, kind: input, shape index: {}]   ;;  %s6420_s6 = inlined_call_operand.vmem [shape: f32[8,1,8], index: 6, kind: input, shape index: {}]   ;;  %s6421_s7 = inlined_call_operand.vmem [shape: f32[8,32,8], index: 7, kind: input, shape index: {}]   ;;  %s6422_s8 = inlined_call_operand.vmem [shape: f32[8,1,8], index: 8, kind: input, shape index: {}]   ;;  %s6423_s9 = inlined_call_operand.vmem [shape: f32[8,32,8], index: 9, kind: input, shape index: {}]   ;;  %s6424_s10 = inlined_call_operand.vmem [shape: f32[8,1,8], index: 10, kind: input, shape index: {}]   ;;  %s6425_s11 = inlined_call_operand.vmem [shape: f32[8,8,32], index: 11, kind: input, shape index: {}]   ;;  %s6426_s12 = inlined_call_operand.vmem [shape: f32[2,1,32], index: 12, kind: input, shape index: {}]   ;;  %s6427_s13 = inlined_call_operand.vmem [shape: f32[2,1,32], index: 13, kind: input, shape index: {}]   ;;  %s6428_s14 = inlined_call_operand.vmem [shape: f32[2,1,32], index: 14, kind: input, shape index: {}]   ;;  %s6429_s15 = inlined_call_operand.vmem [shape: f32[2,1,32], index: 15, kind: input, shape index: {}]   ;;  %s6430_s16 = inlined_call_operand.vmem [shape: f32[2,1,32], index: 16, kind: input, shape index: {}]   ;;  %s6431_s17 = inlined_call_operand.vmem [shape: f32[2,32,128], index: 17, kind: input, shape index: {}]   ;;  %s6432_s18 = inlined_call_operand.vmem [shape: f32[2,1,128], index: 18, kind: input, shape index: {}]   ;;  %s6433_s19 = inlined_call_operand.vmem [shape: f32[2,128,32], index: 19, kind: input, shape index: {}]   ;;  %s6434_s20 = inlined_call_operand.vmem [shape: f32[2,1,32], index: 20, kind: input, shape index: {}]   ;;  %s6435_s21 = inlined_call_operand.vmem [shape: f32[1,32], index: 21, kind: input, shape index: {}]   ;;  %s6436_s22 = inlined_call_operand.vmem [shape: f32[1,32], index: 22, kind: input, shape index: {}]   ;;  %s6437_s23 = inlined_call_operand.vmem [shape: f32[32,10], index: 23, kind: input, shape index: {}]   ;;  %s6438_s24 = inlined_call_operand.vmem [shape: f32[1,10], index: 24, kind: input, shape index: {}]   ;;  %s6439_s25 = inlined_call_operand.hbm [shape: f32[2,10], index: 25, kind: output, shape index: {0}]   ;;  %s6440_s26 = inlined_call_operand.hbm [shape: f32[2,32], index: 26, kind: output, shape index: {1}]  }
   0x1   :  { %6451 = sst [smem:[#allocation8_spill]] %s6414_s0 }
   0x2   :  { %6452 = sst [smem:[#allocation9_spill]] %s6415_s1 }
   0x3   :  { %6453 = sst [smem:[#allocation10_spill]] %s6416_s2 }
   0x4   :  { %6454 = sst [smem:[#allocation11_spill]] %s6417_s3 }
   0x5   :  { %6455 = sst [smem:[#allocation12_spill]] %s6418_s4 }
   0x6   :  { %6456 = sst [smem:[#allocation13_spill]] %s6419_s5 }
   0x7   :  { %6457 = sst [smem:[#allocation14_spill]] %s6420_s6 }
   0x8   :  { %6458 = sst [smem:[#allocation15_spill]] %s6421_s7 }
   0x9   :  { %6459 = sst [smem:[#allocation16_spill]] %s6422_s8 }
   0xa   :  { %6460 = sst [smem:[#allocation17_spill]] %s6423_s9 }
   0xb   :  { %6461 = sst [smem:[#allocation18_spill]] %s6424_s10 }
   0xc   :  { %32 = vsyncpa [#allocation3], 0  ;;  %s6462_s7 = sld [smem:[#allocation12_spill]]  ;;  %s6463_s6 = sld [smem:[#allocation8_spill]] }
  0x12   :  { %v113_v0 = vld [vmem:[%s6462_s7 + $0x80] sm:$0xff]  ;;  %v114_v1 = vld [vmem:[%s6462_s7 + $0x88] sm:$0xff]  ;;  %v115_v11 = vld [vmem:[%s6462_s7 + $0x90] sm:$0xff] }
  0x13   :  { %v97_v2 = vld [vmem:[%s6462_s7] sm:$0xff]  ;;  %v207_v3 = vpack.c.bf16 %v114_v1, %v113_v0  ;;  %v98_v4 = vld [vmem:[%s6462_s7 + $0x8] sm:$0xff]  ;;  %v116_v13 = vld [vmem:[%s6462_s7 + $0x98] sm:$0xff] }
  0x14   :  { %v145_v5 = vld [vmem:[%s6462_s7 + $0x180] sm:$0xff]  ;;  %v146_v6 = vld [vmem:[%s6462_s7 + $0x188] sm:$0xff]  ;;  %v199_v7 = vpack.c.bf16 %v98_v4, %v97_v2  ;;  %v99_v14 = vld [vmem:[%s6462_s7 + $0x10] sm:$0xff]  ;;  %v208_v16 = vpack.c.bf16 %v116_v13, %v115_v11 }
  0x15   :  { %v223_v8 = vpack.c.bf16 %v146_v6, %v145_v5  ;;  %v129_v9 = vld [vmem:[%s6462_s7 + $0x100] sm:$0xff]  ;;  %v130_v10 = vld [vmem:[%s6462_s7 + $0x108] sm:$0xff]  ;;  %4090 = vmatprep.subr.bf16.mxu0 %v207_v3  ;;  %v100_v15 = vld [vmem:[%s6462_s7 + $0x18] sm:$0xff] }
  0x16   :  { %v215_v12 = vpack.c.bf16 %v130_v10, %v129_v9  ;;  %4091 = vmatpush3.bf16.msra.mxu0 %v199_v7  ;;  %v200_v17 = vpack.c.bf16 %v100_v15, %v99_v14  ;;  %v147_v18 = vld [vmem:[%s6462_s7 + $0x190] sm:$0xff]  ;;  %v148_v19 = vld [vmem:[%s6462_s7 + $0x198] sm:$0xff]  ;;  %v117_v23 = vld [vmem:[%s6462_s7 + $0xa0] sm:$0xff] }
  0x17   :  { %4112 = vmatprep.subr.bf16.mxu1 %v223_v8  ;;  %v131_v20 = vld [vmem:[%s6462_s7 + $0x110] sm:$0xff]  ;;  %v224_v21 = vpack.c.bf16 %v148_v19, %v147_v18  ;;  %v132_v22 = vld [vmem:[%s6462_s7 + $0x118] sm:$0xff]  ;;  %v118_v24 = vld [vmem:[%s6462_s7 + $0xa8] sm:$0xff]  ;;  %4092 = vmatprep.subr.bf16.mxu0 %v208_v16 }
  0x18   :  { %4113 = vmatpush3.bf16.msra.mxu1 %v215_v12  ;;  %v216_v25 = vpack.c.bf16 %v132_v22, %v131_v20  ;;  %v209_v26 = vpack.c.bf16 %v118_v24, %v117_v23  ;;  %v101_v27 = vld [vmem:[%s6462_s7 + $0x20] sm:$0xff]  ;;  %v102_v28 = vld [vmem:[%s6462_s7 + $0x28] sm:$0xff]  ;;  %v119_v35 = vld [vmem:[%s6462_s7 + $0xb0] sm:$0xff] }
  0x19   :  { %v149_v29 = vld [vmem:[%s6462_s7 + $0x1a0] sm:$0xff]  ;;  %4114 = vmatprep.subr.bf16.mxu1 %v224_v21  ;;  %v150_v30 = vld [vmem:[%s6462_s7 + $0x1a8] sm:$0xff]  ;;  %v201_v33 = vpack.c.bf16 %v102_v28, %v101_v27  ;;  %v120_v36 = vld [vmem:[%s6462_s7 + $0xb8] sm:$0xff] }
  0x1a   :  { %v133_v31 = vld [vmem:[%s6462_s7 + $0x120] sm:$0xff]  ;;  %v134_v32 = vld [vmem:[%s6462_s7 + $0x128] sm:$0xff]  ;;  %4093 = vmatpush3.bf16.msra.mxu0 %v200_v17  ;;  %v225_v34 = vpack.c.bf16 %v150_v30, %v149_v29  ;;  %v103_v37 = vld [vmem:[%s6462_s7 + $0x30] sm:$0xff]  ;;  %v210_v39 = vpack.c.bf16 %v120_v36, %v119_v35 }
  0x1b   :  { %4094 = vmatprep.subr.bf16.mxu0 %v209_v26  ;;  %v217_v38 = vpack.c.bf16 %v134_v32, %v133_v31  ;;  %v104_v40 = vld [vmem:[%s6462_s7 + $0x38] sm:$0xff]  ;;  %v151_v41 = vld [vmem:[%s6462_s7 + $0x1b0] sm:$0xff]  ;;  %v121_v46 = vld [vmem:[%s6462_s7 + $0xc0] sm:$0xff] }
  0x1c   :  { %4115 = vmatpush3.bf16.msra.mxu1 %v216_v25  ;;  %v152_v42 = vld [vmem:[%s6462_s7 + $0x1b8] sm:$0xff]  ;;  %v135_v44 = vld [vmem:[%s6462_s7 + $0x130] sm:$0xff]  ;;  %v122_v47 = vld [vmem:[%s6462_s7 + $0xc8] sm:$0xff]  ;;  %v202_v48 = vpack.c.bf16 %v104_v40, %v103_v37 }
  0x1d   :  { %4116 = vmatprep.subr.bf16.mxu1 %v225_v34  ;;  %v226_v43 = vpack.c.bf16 %v152_v42, %v151_v41  ;;  %v136_v45 = vld [vmem:[%s6462_s7 + $0x138] sm:$0xff]  ;;  %v153_v49 = vld [vmem:[%s6462_s7 + $0x1c0] sm:$0xff]  ;;  %v154_v50 = vld [vmem:[%s6462_s7 + $0x1c8] sm:$0xff]  ;;  %v211_v52 = vpack.c.bf16 %v122_v47, %v121_v46 }
  0x1e   :  { %4095 = vmatpush3.bf16.msra.mxu0 %v201_v33  ;;  %v218_v51 = vpack.c.bf16 %v136_v45, %v135_v44  ;;  %v105_v53 = vld [vmem:[%s6462_s7 + $0x40] sm:$0xff]  ;;  %v106_v54 = vld [vmem:[%s6462_s7 + $0x48] sm:$0xff]  ;;  %v227_v56 = vpack.c.bf16 %v154_v50, %v153_v49  ;;  %v123_v58 = vld [vmem:[%s6462_s7 + $0xd0] sm:$0xff] }
  0x1f   :  { %4096 = vmatprep.subr.bf16.mxu0 %v210_v39  ;;  %v137_v55 = vld [vmem:[%s6462_s7 + $0x140] sm:$0xff]  ;;  %v138_v57 = vld [vmem:[%s6462_s7 + $0x148] sm:$0xff]  ;;  %v124_v59 = vld [vmem:[%s6462_s7 + $0xd8] sm:$0xff]  ;;  %v203_v62 = vpack.c.bf16 %v106_v54, %v105_v53 }
  0x20   :  { %4117 = vmatpush3.bf16.msra.mxu1 %v217_v38  ;;  %v155_v60 = vld [vmem:[%s6462_s7 + $0x1d0] sm:$0xff]  ;;  %v156_v61 = vld [vmem:[%s6462_s7 + $0x1d8] sm:$0xff]  ;;  %v219_v63 = vpack.c.bf16 %v138_v57, %v137_v55  ;;  %v212_v0 = vpack.c.bf16 %v124_v59, %v123_v58  ;;  %v125_v6 = vld [vmem:[%s6462_s7 + $0xe0] sm:$0xff] }
  0x21   :  { %4118 = vmatprep.subr.bf16.mxu1 %v226_v43  ;;  %v107_v1 = vld [vmem:[%s6462_s7 + $0x50] sm:$0xff]  ;;  %v108_v2 = vld [vmem:[%s6462_s7 + $0x58] sm:$0xff]  ;;  %v228_v4 = vpack.c.bf16 %v156_v61, %v155_v60  ;;  %v126_v7 = vld [vmem:[%s6462_s7 + $0xe8] sm:$0xff] }
  0x22   :  { %4097 = vmatpush3.bf16.msra.mxu0 %v202_v48  ;;  %v139_v3 = vld [vmem:[%s6462_s7 + $0x150] sm:$0xff]  ;;  %v140_v5 = vld [vmem:[%s6462_s7 + $0x158] sm:$0xff]  ;;  %v157_v8 = vld [vmem:[%s6462_s7 + $0x1e0] sm:$0xff]  ;;  %v204_v10 = vpack.c.bf16 %v108_v2, %v107_v1  ;;  %v213_v15 = vpack.c.bf16 %v126_v7, %v125_v6 }
  0x23   :  { %4098 = vmatprep.subr.bf16.mxu0 %v211_v52  ;;  %v158_v9 = vld [vmem:[%s6462_s7 + $0x1e8] sm:$0xff]  ;;  %v109_v11 = vld [vmem:[%s6462_s7 + $0x60] sm:$0xff]  ;;  %v220_v14 = vpack.c.bf16 %v140_v5, %v139_v3  ;;  %v92_v18 = vld [vmem:[%s6463_s6 + $0x38] sm:$0x3] }
  0x24   :  { %4119 = vmatpush3.bf16.msra.mxu1 %v218_v51  ;;  %v110_v12 = vld [vmem:[%s6462_s7 + $0x68] sm:$0xff]  ;;  %v141_v16 = vld [vmem:[%s6462_s7 + $0x160] sm:$0xff]  ;;  %v229_v19 = vpack.c.bf16 %v158_v9, %v157_v8  ;;  %v127_v20 = vld [vmem:[%s6462_s7 + $0xf0] sm:$0xff] }
  0x25   :  { %4120 = vmatprep.subr.bf16.mxu1 %v227_v56  ;;  %v86_v13 = vld [vmem:[%s6463_s6 + $0x8] sm:$0xff]  ;;  %v128_v21 = vld [vmem:[%s6462_s7 + $0xf8] sm:$0xff]  ;;  %v159_v22 = vld [vmem:[%s6462_s7 + $0x1f0] sm:$0xff]  ;;  %v205_v27 = vpack.c.bf16 %v110_v12, %v109_v11 }
  0x26   :  { %4099 = vmatpush3.bf16.msra.mxu0 %v203_v62  ;;  %v142_v17 = vld [vmem:[%s6462_s7 + $0x168] sm:$0xff]  ;;  %v194_v23 = vpack.c.bf16 %v92_v18, %v86_v13  ;;  %v160_v24 = vld [vmem:[%s6462_s7 + $0x1f8] sm:$0xff]  ;;  %v214_v30 = vpack.c.bf16 %v128_v21, %v127_v20  ;;  %v111_v31 = vld [vmem:[%s6462_s7 + $0x70] sm:$0xff] }
  0x27   :  { %4100 = vmatprep.subr.bf16.mxu0 %v212_v0  ;;  %v88_v25 = vld [vmem:[%s6463_s6 + $0x18] sm:$0xff]  ;;  %v94_v26 = vld [vmem:[%s6463_s6 + $0x48] sm:$0x3]  ;;  %v221_v29 = vpack.c.bf16 %v142_v17, %v141_v16  ;;  %v143_v33 = vld [vmem:[%s6462_s7 + $0x170] sm:$0xff]  ;;  %v230_v34 = vpack.c.bf16 %v160_v24, %v159_v22 }
  0x28   :  { %4121 = vmatpush3.bf16.msra.mxu1 %v219_v63  ;;  %281 = vmatprep.mubr.bf16.mxu0 %v194_v23  ;;  %v196_v28 = vpack.c.bf16 %v94_v26, %v88_v25  ;;  %v112_v32 = vld [vmem:[%s6462_s7 + $0x78] sm:$0xff]  ;;  %v177_v36 = vld [vmem:[%s6462_s7 + $0x280] sm:$0xff]  ;;  %v178_v37 = vld [vmem:[%s6462_s7 + $0x288] sm:$0xff] }
  0x29   :  { %4122 = vmatprep.subr.bf16.mxu1 %v228_v4  ;;  %v144_v35 = vld [vmem:[%s6462_s7 + $0x178] sm:$0xff]  ;;  %v206_v38 = vpack.c.bf16 %v112_v32, %v111_v31  ;;  %v85_v39 = vld [vmem:[%s6463_s6] sm:$0xff]  ;;  %v91_v40 = vld [vmem:[%s6463_s6 + $0x30] sm:$0x3]  ;;  %v239_v43 = vpack.c.bf16 %v178_v37, %v177_v36 }
  0x2a   :  { %4101 = vmatpush3.bf16.msra.mxu0 %v204_v10  ;;  %322 = vmatprep.mubr.bf16.mxu1 %v196_v28  ;;  %v161_v41 = vld [vmem:[%s6462_s7 + $0x200] sm:$0xff]  ;;  %v222_v42 = vpack.c.bf16 %v144_v35, %v143_v33  ;;  %v162_v44 = vld [vmem:[%s6462_s7 + $0x208] sm:$0xff]  ;;  %v87_v45 = vld [vmem:[%s6463_s6 + $0x10] sm:$0xff]  ;;  %v193_v49 = vpack.c.bf16 %v91_v40, %v85_v39 }
  0x2b   :  { %4102 = vmatprep.subr.bf16.mxu0 %v213_v15  ;;  %v93_v46 = vld [vmem:[%s6463_s6 + $0x40] sm:$0x3]  ;;  %v179_v47 = vld [vmem:[%s6462_s7 + $0x290] sm:$0xff]  ;;  %v180_v48 = vld [vmem:[%s6462_s7 + $0x298] sm:$0xff]  ;;  %v231_v50 = vpack.c.bf16 %v162_v44, %v161_v41 }
  0x2c   :  { %4123 = vmatpush3.bf16.msra.mxu1 %v220_v14  ;;  %v195_v51 = vpack.c.bf16 %v93_v46, %v87_v45  ;;  %v240_v52 = vpack.c.bf16 %v180_v48, %v179_v47  ;;  %v163_v53 = vld [vmem:[%s6462_s7 + $0x210] sm:$0xff]  ;;  %v164_v54 = vld [vmem:[%s6462_s7 + $0x218] sm:$0xff]  ;;  %v181_v55 = vld [vmem:[%s6462_s7 + $0x2a0] sm:$0xff] }
  0x2d   :  { %4124 = vmatprep.subr.bf16.mxu1 %v229_v19  ;;  %v182_v56 = vld [vmem:[%s6462_s7 + $0x2a8] sm:$0xff]  ;;  %v96_v58 = vld [vmem:[%s6463_s6 + $0x58] sm:$0x3]  ;;  %v232_v59 = vpack.c.bf16 %v164_v54, %v163_v53 }
  0x2e   :  { %4103 = vmatpush3.bf16.msra.mxu0 %v205_v27  ;;  %v90_v57 = vld [vmem:[%s6463_s6 + $0x28] sm:$0xff] }
  0x2f   :  { %4104 = vmatprep.subr.bf16.mxu0 %v214_v30  ;;  %v198_v60 = vpack.c.bf16 %v96_v58, %v90_v57 }
  0x30   :  { %4125 = vmatpush3.bf16.msra.mxu1 %v221_v29 }
  0x31   :  { %4126 = vmatprep.subr.bf16.mxu1 %v230_v34 }
  0x32   :  { %4105 = vmatpush3.bf16.msra.mxu0 %v206_v38 }
  0x33   :  { %4134 = vmatprep.subr.bf16.mxu0 %v239_v43 }
  0x34   :  { %4127 = vmatpush3.bf16.msra.mxu1 %v222_v42 }
  0x35   :  { %282 = vmatmul.mubr.bf16.vlgmr.msra.gmra.mrb[0].mxu0 %v193_v49 }
  0x36   :  { %4135 = vmatpush3.bf16.msra.mxu0 %v231_v50 }
  0x37   :  { %323 = vmatmul.mubr.bf16.vlgmr.msra.gmra.mrb[0].mxu1 %v195_v51 }
  0x38   :  { %33 = vsyncpa [#allocation5], 0  ;;  %4136 = vmatprep.subr.bf16.mxu0 %v240_v52  ;;  %v241_v61 = vpack.c.bf16 %v182_v56, %v181_v55  ;;  %v165_v62 = vld [vmem:[%s6462_s7 + $0x220] sm:$0xff]  ;;  %v166_v63 = vld [vmem:[%s6462_s7 + $0x228] sm:$0xff]  ;;  %363 = vmatprep.mubr.bf16.mxu0 %v198_v60  ;;  %s6464_s8 = sld [smem:[#allocation9_spill]]  ;;  %vm376_vm0 = vcmask 261120  }
  0x39   :  { %v183_v0 = vld [vmem:[%s6462_s7 + $0x2b0] sm:$0xff]  ;;  %v184_v1 = vld [vmem:[%s6462_s7 + $0x2b8] sm:$0xff]  ;;  %v233_v2 = vpack.c.bf16 %v166_v63, %v165_v62  ;;  %v185_v6 = vld [vmem:[%s6462_s7 + $0x2c0] sm:$0xff]  ;;  %vm380_vm1 = vcmask 254976   ;;  %s6465_s0 = sld [smem:[#allocation13_spill]]  ;;  %s6466_s10 = sld [smem:[#allocation15_spill]] }
  0x3a   :  { %4137 = vmatpush3.bf16.msra.mxu0 %v232_v59  ;;  %v242_v3 = vpack.c.bf16 %v184_v1, %v183_v0  ;;  %v167_v4 = vld [vmem:[%s6462_s7 + $0x230] sm:$0xff]  ;;  %v168_v5 = vld [vmem:[%s6462_s7 + $0x238] sm:$0xff]  ;;  %v186_v7 = vld [vmem:[%s6462_s7 + $0x2c8] sm:$0xff]  ;;  %vm4866_vm2 = vmmov 0   ;;  %s6467_s2 = sld [smem:[#allocation17_spill]]  ;;  %s6469_s30 = sld [smem:[#allocation16_spill]] }
  0x3b   :  { %4138 = vmatprep.subr.bf16.mxu0 %v241_v61  ;;  %v234_v8 = vpack.c.bf16 %v168_v5, %v167_v4  ;;  %v243_v9 = vpack.c.bf16 %v186_v7, %v185_v6  ;;  %v169_v10 = vld [vmem:[%s6462_s7 + $0x240] sm:$0xff]  ;;  %v170_v11 = vld [vmem:[%s6462_s7 + $0x248] sm:$0xff]  ;;  %v187_v12 = vld [vmem:[%s6462_s7 + $0x2d0] sm:$0xff]  ;;  %vm589_vm3 = vcmask 64512   ;;  %s6470_s28 = sld [smem:[#allocation18_spill]]  ;;  %vm670_vm4 = vcmask 1044480  }
  0x3c   :  { %v188_v13 = vld [vmem:[%s6462_s7 + $0x2d8] sm:$0xff]  ;;  %v235_v14 = vpack.c.bf16 %v170_v11, %v169_v10  ;;  %v171_v16 = vld [vmem:[%s6462_s7 + $0x250] sm:$0xff]  ;;  %v189_v18 = vld [vmem:[%s6462_s7 + $0x2e0] sm:$0xff]  ;;  %s6471_s4 = sld [smem:[#allocation10_spill]]  ;;  %vm641_vm5 = vcmask 80896   ;;  %vm645_vm6 = vcmask 74752  }
  0x3d   :  { %v244_v15 = vpack.c.bf16 %v188_v13, %v187_v12  ;;  %v172_v17 = vld [vmem:[%s6462_s7 + $0x258] sm:$0xff]  ;;  %v190_v19 = vld [vmem:[%s6462_s7 + $0x2e8] sm:$0xff]  ;;  %v173_v22 = vld [vmem:[%s6462_s7 + $0x260] sm:$0xff]  ;;  %v4865_v13 = vmov 0.0   ;;  %vm1017_vm7 = vcmask 1043456   ;;  %vm3696_vm8 = vcmask 1041408  }
  0x3e   :  { %4139 = vmatpush3.bf16.msra.mxu0 %v233_v2  ;;  %v236_v20 = vpack.c.bf16 %v172_v17, %v171_v16  ;;  %v245_v21 = vpack.c.bf16 %v190_v19, %v189_v18  ;;  %v174_v23 = vld [vmem:[%s6462_s7 + $0x268] sm:$0xff]  ;;  %v191_v24 = vld [vmem:[%s6462_s7 + $0x2f0] sm:$0xff]  ;;  %v192_v25 = vld [vmem:[%s6462_s7 + $0x2f8] sm:$0xff]  ;;  %4306 = vmatprep.subr.bf16.mxu1 %v4865_v13  ;;  %vm4868_vm9 = vmmov 1  }
  0x3f   :  { %4140 = vmatprep.subr.bf16.mxu0 %v242_v3  ;;  %v237_v26 = vpack.c.bf16 %v174_v23, %v173_v22  ;;  %v246_v27 = vpack.c.bf16 %v192_v25, %v191_v24  ;;  %v175_v28 = vld [vmem:[%s6462_s7 + $0x270] sm:$0xff]  ;;  %v176_v29 = vld [vmem:[%s6462_s7 + $0x278] sm:$0xff]  ;;  %v89_v31 = vld [vmem:[%s6463_s6 + $0x20] sm:$0xff]  ;;  %4310 = vmatprep.mubr.msk.bf16.mxu1 %vm4866_vm2, %v4865_v13 }
  0x40   :  { %v238_v30 = vpack.c.bf16 %v176_v29, %v175_v28  ;;  %v95_v32 = vld [vmem:[%s6463_s6 + $0x50] sm:$0x3]  ;;  %v247_v35 = vld [vmem:[%s6464_s8] sm:$0xff]  ;;  %v248_v41 = vld [vmem:[%s6464_s8 + $0x8] sm:$0x3]  ;;  %s6468_s6 = sld [smem:[#allocation14_spill]] }
  0x41   :  { %v197_v33 = vpack.c.bf16 %v95_v32, %v89_v31  ;;  %v3874_v10 = vld [vmem:[%s6466_s10 + $0x20] sm:$0xff]  ;;  %v3875_v12 = vld [vmem:[%s6466_s10 + $0x28] sm:$0xff]  ;;  %v424_v16 = vld [vmem:[%s6465_s0 + $0x18] sm:$0xff] }
  0x42   :  { %4141 = vmatpush3.bf16.msra.mxu0 %v234_v8  ;;  %v421_v8 = vld [vmem:[%s6465_s0] sm:$0xff]  ;;  %v3876_v17 = vld [vmem:[%s6466_s10 + $0x30] sm:$0xff]  ;;  %v3877_v19 = vld [vmem:[%s6466_s10 + $0x38] sm:$0xff] }
  0x43   :  { %4142 = vmatprep.subr.bf16.mxu0 %v243_v9  ;;  %v422_v9 = vld [vmem:[%s6465_s0 + $0x8] sm:$0xff]  ;;  %v3857_v29 = vld [vmem:[%s6427_s13] ss:$0 sm:$0xff]  ;;  %vm4715_vm10 = vmpackc.low %vm3696_vm8, %vm4868_vm9 }
  0x44   :  { %v426_v11 = vpack.c.bf16 %v422_v9, %v421_v8 }
  0x46   :  { %4143 = vmatpush3.bf16.msra.mxu0 %v235_v14  ;;  %v779_v14 = vpack.c.bf16 %v3875_v12, %v3874_v10  ;;  %4307 = vmatpush3.bf16.msra.mxu1 %v426_v11 }
  0x47   :  { %4144 = vmatprep.subr.bf16.mxu0 %v244_v15  ;;  %4308 = vmatprep.subr.bf16.mxu1 %v4865_v13  ;;  %v423_v15 = vld [vmem:[%s6465_s0 + $0x10] sm:$0xff] }
  0x48   :  { %v427_v18 = vpack.c.bf16 %v424_v16, %v423_v15  ;;  %v3863_v15 = vld [vmem:[%s6470_s28] ss:$0 sm:$0xff] }
  0x4a   :  { %4145 = vmatpush3.bf16.msra.mxu0 %v236_v20  ;;  %v780_v20 = vpack.c.bf16 %v3877_v19, %v3876_v17  ;;  %4309 = vmatpush3.bf16.msra.mxu1 %v427_v18 }
  0x4b   :  { %4146 = vmatprep.subr.bf16.mxu0 %v245_v21  ;;  %4314 = vmatprep.subr.bf16.mxu1 %v4865_v13 }
  0x4e   :  { %4147 = vmatpush3.bf16.msra.mxu0 %v237_v26 }
  0x4f   :  { %4148 = vmatprep.subr.bf16.mxu0 %v246_v27 }
  0x52   :  { %4149 = vmatpush3.bf16.msra.mxu0 %v238_v30 }
  0x53   :  { %4350 = vmatprep.subr.bf16.mxu0 %v4865_v13 }
  0x55   :  { %364 = vmatmul.mubr.bf16.vlgmr.msra.gmra.mrb[4].mxu0 %v197_v33  ;;  %v3858_v33 = vld [vmem:[%s6428_s14] ss:$0 sm:$0xff] }
  0x56   :  { %4351 = vmatpush3.bf16.msra.mxu0 %v779_v14  ;;  %4354 = vmatprep.mubr.msk.bf16.mxu0 %vm4866_vm2, %v4865_v13 }
  0x57   :  { %4352 = vmatprep.subr.bf16.mxu0 %v4865_v13 }
  0x5a   :  { %4353 = vmatpush3.bf16.msra.mxu0 %v780_v20 }
  0x5b   :  { %4366 = vmatprep.subr.bf16.mxu0 %v4865_v13 }
 0x108   :  { %v4106_v34 = vpop.f32.mrb[0].mxu0 }
 0x109   :  { %v4107_v36 = vpop.f32.mrb[1].mxu0 }
 0x10a   :  { %v4128_v37 = vpop.f32.mrb[0].mxu1  ;;  %v4108_v38 = vadd.f32 %v4107_v36, %v4106_v34  ;;  %v4109_v39 = vpop.f32.mrb[2].mxu0  ;;  %v480_v36 = vld [vmem:[%s6466_s10 + $0x8] sm:$0xff] }
 0x10b   :  { %v4129_v40 = vpop.f32.mrb[1].mxu1  ;;  %v4110_v42 = vpop.f32.mrb[3].mxu0 }
 0x10c   :  { %v4130_v43 = vadd.f32 %v4129_v40, %v4128_v37  ;;  %v4131_v44 = vpop.f32.mrb[2].mxu1  ;;  %v284_v45 = vadd.f32 %v4108_v38, %v247_v35  ;;  %v4111_v46 = vadd.f32 %v4110_v42, %v4109_v39  ;;  %v479_v35 = vld [vmem:[%s6466_s10] sm:$0xff]  ;;  %v482_v42 = vld [vmem:[%s6466_s10 + $0x18] sm:$0xff] }
 0x10d   :  { %v4132_v47 = vpop.f32.mrb[3].mxu1  ;;  %v483_v39 = vpack.c.bf16 %v480_v36, %v479_v35 }
 0x10e   :  { %v4133_v48 = vadd.f32 %v4132_v47, %v4131_v44  ;;  %v287_v49 = vadd.f32 %v4111_v46, %v248_v41  ;;  %v325_v50 = vadd.f32 %v4130_v43, %v284_v45  ;;  %v481_v41 = vld [vmem:[%s6466_s10 + $0x10] sm:$0xff]  ;;  %v533_v44 = vld [vmem:[%s6467_s2] sm:$0xff]  ;;  %v534_v45 = vld [vmem:[%s6467_s2 + $0x8] sm:$0xff] }
 0x10f   :  { %v484_v43 = vpack.c.bf16 %v482_v42, %v481_v41  ;;  %v537_v46 = vpack.c.bf16 %v534_v45, %v533_v44  ;;  %v535_v47 = vld [vmem:[%s6467_s2 + $0x10] sm:$0xff] }
 0x110   :  { %v328_v51 = vadd.f32 %v4133_v48, %v287_v49  ;;  %v536_v48 = vld [vmem:[%s6467_s2 + $0x18] sm:$0xff] }
 0x111   :  { %v538_v49 = vpack.c.bf16 %v536_v48, %v535_v47 }
 0x128   :  { %v4150_v52 = vpop.f32.mrb[4].mxu0 }
 0x129   :  { %v4151_v53 = vpop.f32.mrb[5].mxu0 }
 0x12a   :  { %v4152_v54 = vadd.f32 %v4151_v53, %v4150_v52  ;;  %v4153_v55 = vpop.f32.mrb[6].mxu0  ;;  %v3879_v52 = vld [vmem:[%s6469_s30 + $0x1] ss:$0 sm:$0xff] }
 0x12b   :  { %v4154_v56 = vpop.f32.mrb[7].mxu0 }
 0x12c   :  { %v5336_v57 = vadd.f32 %v4152_v54, %v325_v50  ;;  %v4155_v58 = vadd.f32 %v4154_v56, %v4153_v55  ;;  %v3859_v50 = vld [vmem:[%s6468_s6] ss:$0 sm:$0xff] }
 0x12e   :  { %v5338_v59 = vadd.f32 %v4155_v58, %v328_v51  ;;  %v377_v60 = vsel %vm376_vm0, %v5336_v57, 0.0 }
 0x12f   :  { %378 = vadd.xlane.f32.xlu0 %v377_v60 }
 0x130   :  { %v381_v61 = vsel %vm380_vm1, %v5338_v59, 0.0 }
 0x133   :  { %382 = vadd.xlane.f32.xlu0 %v381_v61 }
 0x1bc   :  { %v379_v62 = vpop.xlane.xlu0 %378 }
 0x1bd   :  { %v385_v63 = vmul.f32 0.03125, %v379_v62 }
 0x1bf   :  { %v387_v0 = vsub.f32 %v5336_v57, %v385_v63 }
 0x1c0   :  { %v383_v1 = vpop.xlane.xlu0 %382 }
 0x1c1   :  { %v386_v2 = vmul.f32 0.03125, %v383_v1  ;;  %v389_v3 = vmul.f32 %v387_v0, %v387_v0 }
 0x1c3   :  { %v388_v4 = vsub.f32 %v5338_v59, %v386_v2  ;;  %v391_v5 = vsel %vm376_vm0, %v389_v3, 0.0 }
 0x1c4   :  { %392 = vadd.xlane.f32.xlu1 %v391_v5  ;;  %v3861_v5 = vld [vmem:[%s6469_s30] ss:$0 sm:$0xff] }
 0x1c5   :  { %v390_v6 = vmul.f32 %v388_v4, %v388_v4 }
 0x1c7   :  { %v394_v7 = vsel %vm380_vm1, %v390_v6, 0.0 }
 0x1c8   :  { %395 = vadd.xlane.f32.xlu1 %v394_v7 }
 0x251   :  { %v393_v21 = vpop.xlane.xlu1 %392 }
 0x252   :  { %v397_v22 = vmul.f32 0.03125, %v393_v21 }
 0x254   :  { %v399_v23 = vadd.f32 1e-06, %v397_v22 }
 0x255   :  { %v396_v24 = vpop.xlane.xlu1 %395 }
 0x256   :  { %4723 = vrsqrt.f32 %v399_v23  ;;  %v398_v25 = vmul.f32 0.03125, %v396_v24 }
 0x258   :  { %v400_v26 = vadd.f32 1e-06, %v398_v25  ;;  %v5458_v25 = vld [vmem:[%s6471_s4] sm:$0xff] }
 0x25a   :  { %4725 = vrsqrt.f32 %v400_v26 }
 0x260   :  { %v4724_v27 = vpop.eup %4723 }
 0x261   :  { %v403_v28 = vmul.f32 %v4724_v27, %v387_v0 }
 0x263   :  { %v411_v31 = vmul.f32 %v3857_v29, %v403_v28 }
 0x264   :  { %v4726_v30 = vpop.eup %4725 }
 0x265   :  { %v404_v32 = vmul.f32 %v4726_v30, %v388_v4  ;;  %v419_v37 = vadd.f32 %v3858_v33, %v411_v31 }
 0x267   :  { %v412_v34 = vmul.f32 %v3857_v29, %v404_v32  ;;  %v5463_v29 = vld [vmem:[%s6471_s4 + $0x8] sm:$0x3] }
 0x269   :  { %v420_v38 = vadd.f32 %v3858_v33, %v412_v34 }
 0x26b   :  { %v5394_v40 = vpack.c.bf16 %v420_v38, %v419_v37 }
 0x26d   :  { %4311 = vmatmul.mubr.msk.bf16.vlgmr.msra.gmra.mrb[4].mxu1 %vm376_vm0, %v5394_v40  ;;  %4355 = vmatmul.mubr.msk.bf16.vlgmr.msra.gmra.mrb[8].mxu0 %vm376_vm0, %v5394_v40 }
 0x26e   :  { %4315 = vmatpush3.bf16.msra.mxu1 %v483_v39  ;;  %4318 = vmatprep.mubr.msk.bf16.mxu1 %vm4866_vm2, %v4865_v13 }
 0x26f   :  { %4316 = vmatprep.subr.bf16.mxu1 %v4865_v13  ;;  %4368 = vmatprep.mubr.msk.bf16.mxu0 %vm4866_vm2, %v4865_v13 }
 0x272   :  { %4317 = vmatpush3.bf16.msra.mxu1 %v484_v43 }
 0x273   :  { %4322 = vmatprep.subr.bf16.mxu1 %v4865_v13 }
 0x275   :  { %4319 = vmatmul.mubr.msk.bf16.vlgmr.msra.gmra.mrb[8].mxu1 %vm376_vm0, %v5394_v40 }
 0x276   :  { %4323 = vmatpush3.bf16.msra.mxu1 %v537_v46  ;;  %4326 = vmatprep.mubr.msk.bf16.mxu1 %vm4866_vm2, %v4865_v13 }
 0x277   :  { %4324 = vmatprep.subr.bf16.mxu1 %v4865_v13 }
 0x27a   :  { %4325 = vmatpush3.bf16.msra.mxu1 %v538_v49 }
 0x27b   :  { %4330 = vmatprep.subr.bf16.mxu1 %v4865_v13 }
 0x27d   :  { %4327 = vmatmul.mubr.msk.bf16.vlgmr.msra.gmra.mrb[12].mxu1 %vm376_vm0, %v5394_v40 }
 0x27e   :  { %4332 = vmatprep.mubr.msk.bf16.mxu1 %vm4866_vm2, %v4865_v13 }
 0x340   :  { %v472_v51 = vpop.f32.mrb[4].mxu1  ;;  %v823_v53 = vpop.f32.mrb[8].mxu0 }
 0x341   :  { %v4312_v54 = vpop.f32.mrb[5].mxu1  ;;  %v4356_v55 = vpop.f32.mrb[9].mxu0  ;;  %v473_v60 = vadd.f32 %v3859_v50, %v472_v51  ;;  %v824_v61 = vadd.f32 %v3879_v52, %v823_v53  ;;  %v3868_v51 = vld [vmem:[%s6465_s0 + $0x28] sm:$0xff] }
 0x342   :  { %v475_v56 = vpop.f32.mrb[6].mxu1  ;;  %v826_v58 = vpop.f32.mrb[10].mxu0 }
 0x343   :  { %v476_v62 = vadd.f32 %v3859_v50, %v475_v56  ;;  %v827_v63 = vadd.f32 %v3879_v52, %v826_v58  ;;  %v4313_v0 = vpop.f32.mrb[7].mxu1  ;;  %v4357_v1 = vpop.f32.mrb[11].mxu0  ;;  %v3867_v50 = vld [vmem:[%s6465_s0 + $0x20] sm:$0xff]  ;;  %v3869_v58 = vld [vmem:[%s6465_s0 + $0x30] sm:$0xff] }
 0x344   :  { %v723_v55 = vpack.c.bf16 %v3868_v51, %v3867_v50  ;;  %v3883_v1 = vld [vmem:[%s6467_s2 + $0x30] sm:$0xff] }
 0x345   :  { %v587_v2 = vpack.c.bf16 %v476_v62, %v473_v60  ;;  %v887_v3 = vpack.c.bf16 %v827_v63, %v824_v61  ;;  %v3870_v60 = vld [vmem:[%s6465_s0 + $0x38] sm:$0xff]  ;;  %v3881_v62 = vld [vmem:[%s6467_s2 + $0x20] sm:$0xff]  ;;  %v3882_v63 = vld [vmem:[%s6467_s2 + $0x28] sm:$0xff] }
 0x346   :  { %v724_v61 = vpack.c.bf16 %v3870_v60, %v3869_v58  ;;  %v835_v0 = vpack.c.bf16 %v3882_v63, %v3881_v62  ;;  %v3900_v62 = vld [vmem:[%s6466_s10 + $0x40] sm:$0xff]  ;;  %v3901_v63 = vld [vmem:[%s6466_s10 + $0x48] sm:$0xff] }
 0x347   :  { %v892_v4 = vsel %vm589_vm3, %v887_v3, 0 }
 0x348   :  { %v526_v6 = vpop.f32.mrb[8].mxu1  ;;  %4367 = vmatpush3.bf16.xpose.msra.mxu0 %v892_v4 }
 0x349   :  { %v4320_v7 = vpop.f32.mrb[9].mxu1  ;;  %4378 = vmatprep.subr.bf16.mxu0 %v4865_v13  ;;  %v527_v9 = vadd.f32 %v3861_v5, %v526_v6 }
 0x34a   :  { %v529_v8 = vpop.f32.mrb[10].mxu1 }
 0x34b   :  { %v530_v10 = vadd.f32 %v3861_v5, %v529_v8  ;;  %v4321_v11 = vpop.f32.mrb[11].mxu1 }
 0x34d   :  { %v588_v12 = vpack.c.bf16 %v530_v10, %v527_v9  ;;  %v3872_v9 = vld [vmem:[%s6468_s6 + $0x1] ss:$0 sm:$0xff] }
 0x34f   :  { %v594_v14 = vsel %vm589_vm3, %v588_v12, 0 }
 0x350   :  { %v580_v16 = vpop.f32.mrb[12].mxu1  ;;  %4331 = vmatpush3.bf16.xpose.msra.mxu1 %v594_v14 }
 0x351   :  { %v4328_v17 = vpop.f32.mrb[13].mxu1  ;;  %4336 = vmatprep.subr.bf16.mxu1 %v4865_v13  ;;  %v581_v19 = vadd.f32 %v3863_v15, %v580_v16 }
 0x352   :  { %v583_v18 = vpop.f32.mrb[14].mxu1 }
 0x353   :  { %v584_v20 = vadd.f32 %v3863_v15, %v583_v18  ;;  %v4329_v21 = vpop.f32.mrb[15].mxu1  ;;  %v3886_v18 = vld [vmem:[%s6470_s28 + $0x1] ss:$0 sm:$0xff] }
 0x355   :  { %v666_v22 = vpack.c.bf16 %v584_v20, %v581_v19 }
 0x357   :  { %4333 = vmatmul.mubr.msk.bf16.vlgmr.msra.gmra.mrb[16].mxu1 %vm589_vm3, %v587_v2  ;;  %v672_v23 = vsel %vm670_vm4, %v666_v22, 0  ;;  %v3884_v2 = vld [vmem:[%s6467_s2 + $0x38] sm:$0xff] }
 0x358   :  { %4337 = vmatpush3.bf16.msra.mxu1 %v672_v23  ;;  %4338 = vmatprep.mubr.msk.bf16.mxu1 %vm4866_vm2, %v4865_v13  ;;  %v836_v3 = vpack.c.bf16 %v3884_v2, %v3883_v1  ;;  %v3902_v1 = vld [vmem:[%s6466_s10 + $0x50] sm:$0xff]  ;;  %v3903_v2 = vld [vmem:[%s6466_s10 + $0x58] sm:$0xff] }
 0x359   :  { %4342 = vmatprep.subr.bf16.mxu1 %v4865_v13 }
 0x42a   :  { %v630_v24 = vpop.f32.mrb[16].mxu1 }
 0x42b   :  { %v637_v26 = vmul.f32 0.35355338, %v630_v24  ;;  %v4334_v27 = vpop.f32.mrb[17].mxu1 }
 0x42c   :  { %v633_v28 = vpop.f32.mrb[18].mxu1 }
 0x42d   :  { %v638_v30 = vmul.f32 0.35355338, %v633_v28  ;;  %v4335_v31 = vpop.f32.mrb[19].mxu1  ;;  %v639_v32 = vadd.f32 %v637_v26, %v5458_v25 }
 0x42f   :  { %v642_v33 = vsel %vm641_vm5, %v639_v32, -inf  ;;  %v640_v34 = vadd.f32 %v638_v30, %v5463_v29 }
 0x430   :  { %643 = vmax.xlane.f32.xlu0 %v642_v33 }
 0x431   :  { %v646_v35 = vsel %vm645_vm6, %v640_v34, -inf }
 0x432   :  { %647 = vmax.xlane.f32.xlu1 %v646_v35 }
 0x4bd   :  { %v644_v36 = vpop.xlane.xlu0 %643 }
 0x4be   :  { %v649_v37 = vsub.f32 %v639_v32, %v644_v36 }
 0x4bf   :  { %v648_v38 = vpop.xlane.xlu1 %647 }
 0x4c0   :  { %v651_v39 = vmul.f32 1.442695, %v649_v37  ;;  %v650_v41 = vsub.f32 %v640_v34, %v648_v38 }
 0x4c2   :  { %4727 = vpow2.f32 %v651_v39  ;;  %v653_v42 = vmul.f32 1.442695, %v650_v41 }
 0x4c4   :  { %4729 = vpow2.f32 %v653_v42 }
 0x4cc   :  { %v4728_v43 = vpop.eup %4727 }
 0x4cd   :  { %v655_v44 = vsel %vm641_vm5, %v4728_v43, 0.0 }
 0x4ce   :  { %v4730_v45 = vpop.eup %4729  ;;  %656 = vadd.xlane.f32.xlu0 %v655_v44 }
 0x4cf   :  { %v658_v46 = vsel %vm645_vm6, %v4730_v45, 0.0 }
 0x4d0   :  { %659 = vadd.xlane.f32.xlu1 %v658_v46 }
 0x55b   :  { %v657_v47 = vpop.xlane.xlu0 %656 }
 0x55c   :  { %4731 = vrcp.f32 %v657_v47 }
 0x55d   :  { %v660_v48 = vpop.xlane.xlu1 %659 }
 0x55e   :  { %4733 = vrcp.f32 %v660_v48 }
 0x566   :  { %v4732_v49 = vpop.eup %4731 }
 0x567   :  { %v662_v53 = vmul.f32 %v4732_v49, %v4728_v43 }
 0x568   :  { %v4734_v52 = vpop.eup %4733 }
 0x569   :  { %v664_v54 = vmul.f32 %v4734_v52, %v4730_v45  ;;  %v715_v52 = vld [vmem:[%s6425_s11] sm:$0xff] }
 0x56b   :  { %v665_v56 = vpack.c.bf16 %v664_v54, %v662_v53  ;;  %v717_v54 = vpack.c.bf16 %v715_v52, %v715_v52 }
 0x56d   :  { %4339 = vmatmul.mubr.msk.bf16.vlgmr.msra.gmra.mrb[20].mxu1 %vm641_vm5, %v665_v56 }
 0x56e   :  { %4343 = vmatpush3.bf16.msra.mxu1 %v723_v55  ;;  %4346 = vmatprep.mubr.msk.bf16.mxu1 %vm4866_vm2, %v4865_v13 }
 0x56f   :  { %4344 = vmatprep.subr.bf16.mxu1 %v4865_v13 }
 0x572   :  { %4345 = vmatpush3.bf16.msra.mxu1 %v724_v61  ;;  %v1066_v61 = vsel %vm1017_vm7, %v717_v54, 0 }
 0x573   :  { %4358 = vmatprep.subr.bf16.mxu1 %v4865_v13 }
 0x575   :  { %4347 = vmatmul.mubr.msk.bf16.vlgmr.msra.gmra.mrb[24].mxu1 %vm376_vm0, %v5394_v40 }
 0x576   :  { %4359 = vmatpush3.bf16.msra.mxu1 %v835_v0  ;;  %4362 = vmatprep.mubr.msk.bf16.mxu1 %vm4866_vm2, %v4865_v13  ;;  %v1170_v0 = vpack.c.bf16 %v3901_v63, %v3900_v62 }
 0x577   :  { %4360 = vmatprep.subr.bf16.mxu1 %v4865_v13 }
 0x57a   :  { %4361 = vmatpush3.bf16.msra.mxu1 %v836_v3  ;;  %v1171_v3 = vpack.c.bf16 %v3903_v2, %v3902_v1 }
 0x57b   :  { %4372 = vmatprep.subr.bf16.mxu1 %v4865_v13 }
 0x57d   :  { %4363 = vmatmul.mubr.msk.bf16.vlgmr.msra.gmra.mrb[28].mxu1 %vm376_vm0, %v5394_v40 }
 0x57e   :  { %4374 = vmatprep.mubr.msk.bf16.mxu1 %vm4866_vm2, %v4865_v13 }
 0x640   :  { %v5510_v4 = vpop.f32.mrb[20].mxu1 }
 0x641   :  { %v4340_v5 = vpop.f32.mrb[21].mxu1 }
 0x642   :  { %v5512_v6 = vpop.f32.mrb[22].mxu1 }
 0x643   :  { %v716_v7 = vpack.c.bf16 %v5512_v6, %v5510_v4  ;;  %v4341_v8 = vpop.f32.mrb[23].mxu1  ;;  %v3890_v4 = vld [vmem:[%s6425_s11 + $0x8] sm:$0xff] }
 0x644   :  { %v1013_v5 = vpack.c.bf16 %v3890_v4, %v3890_v4  ;;  %v3894_v8 = vld [vmem:[%s6465_s0 + $0x48] sm:$0xff] }
 0x646   :  { %v1019_v6 = vsel %vm1017_vm7, %v1013_v5, 0 }
 0x648   :  { %v767_v10 = vpop.f32.mrb[24].mxu1 }
 0x649   :  { %v4348_v11 = vpop.f32.mrb[25].mxu1  ;;  %v768_v14 = vadd.f32 %v3872_v9, %v767_v10 }
 0x64a   :  { %v770_v12 = vpop.f32.mrb[26].mxu1 }
 0x64b   :  { %v771_v15 = vadd.f32 %v3872_v9, %v770_v12  ;;  %v4349_v16 = vpop.f32.mrb[27].mxu1 }
 0x64c   :  { %v3895_v16 = vld [vmem:[%s6465_s0 + $0x50] sm:$0xff] }
 0x64d   :  { %v886_v17 = vpack.c.bf16 %v771_v15, %v768_v14 }
 0x64f   :  { %4369 = vmatmul.mubr.msk.bf16.vlgmr.msra.gmra.mrb[12].mxu0 %vm589_vm3, %v886_v17  ;;  %v3896_v17 = vld [vmem:[%s6465_s0 + $0x58] sm:$0xff] }
 0x650   :  { %v879_v19 = vpop.f32.mrb[28].mxu1  ;;  %4380 = vmatprep.mubr.msk.bf16.mxu0 %vm4866_vm2, %v4865_v13  ;;  %4379 = vmatpush3.bf16.msra.mxu0 %v1019_v6 }
 0x651   :  { %v4364_v20 = vpop.f32.mrb[29].mxu1  ;;  %v880_v22 = vadd.f32 %v3886_v18, %v879_v19  ;;  %4390 = vmatprep.subr.bf16.mxu0 %v4865_v13  ;;  %v3907_v19 = vld [vmem:[%s6467_s2 + $0x40] sm:$0xff] }
 0x652   :  { %v882_v21 = vpop.f32.mrb[30].mxu1  ;;  %v3908_v20 = vld [vmem:[%s6467_s2 + $0x48] sm:$0xff] }
 0x653   :  { %v883_v23 = vadd.f32 %v3886_v18, %v882_v21  ;;  %v4365_v24 = vpop.f32.mrb[31].mxu1  ;;  %v1115_v18 = vpack.c.bf16 %v3896_v17, %v3895_v16 }
 0x654   :  { %v1226_v24 = vpack.c.bf16 %v3908_v20, %v3907_v19 }
 0x655   :  { %v962_v26 = vpack.c.bf16 %v883_v23, %v880_v22 }
 0x657   :  { %v967_v27 = vsel %vm670_vm4, %v962_v26, 0 }
 0x658   :  { %4373 = vmatpush3.bf16.msra.mxu1 %v967_v27  ;;  %v3909_v27 = vld [vmem:[%s6467_s2 + $0x50] sm:$0xff] }
 0x659   :  { %4384 = vmatprep.subr.bf16.mxu1 %v4865_v13 }
 0x722   :  { %v928_v28 = vpop.f32.mrb[12].mxu0 }
 0x723   :  { %v935_v30 = vmul.f32 0.35355338, %v928_v28  ;;  %v4370_v31 = vpop.f32.mrb[13].mxu0  ;;  %v3910_v28 = vld [vmem:[%s6467_s2 + $0x58] sm:$0xff] }
 0x724   :  { %v931_v32 = vpop.f32.mrb[14].mxu0  ;;  %v3905_v31 = vld [vmem:[%s6469_s30 + $0x2] ss:$0 sm:$0xff] }
 0x725   :  { %v936_v33 = vmul.f32 0.35355338, %v931_v32  ;;  %v4371_v34 = vpop.f32.mrb[15].mxu0  ;;  %v937_v35 = vadd.f32 %v935_v30, %v5458_v25  ;;  %v1227_v30 = vpack.c.bf16 %v3910_v28, %v3909_v27  ;;  %v3918_v27 = vld [vmem:[%s6465_s0 + $0x60] sm:$0xff]  ;;  %v3919_v28 = vld [vmem:[%s6465_s0 + $0x68] sm:$0xff] }
 0x727   :  { %v939_v36 = vsel %vm641_vm5, %v937_v35, -inf  ;;  %v938_v37 = vadd.f32 %v936_v33, %v5463_v29 }
 0x728   :  { %940 = vmax.xlane.f32.xlu0 %v939_v36 }
 0x729   :  { %v942_v38 = vsel %vm645_vm6, %v938_v37, -inf }
 0x72a   :  { %943 = vmax.xlane.f32.xlu1 %v942_v38 }
 0x7b5   :  { %v941_v39 = vpop.xlane.xlu0 %940 }
 0x7b6   :  { %v945_v41 = vsub.f32 %v937_v35, %v941_v39 }
 0x7b7   :  { %v944_v42 = vpop.xlane.xlu1 %943 }
 0x7b8   :  { %v947_v43 = vmul.f32 1.442695, %v945_v41  ;;  %v946_v44 = vsub.f32 %v938_v37, %v944_v42 }
 0x7ba   :  { %4735 = vpow2.f32 %v947_v43  ;;  %v949_v45 = vmul.f32 1.442695, %v946_v44 }
 0x7bc   :  { %4737 = vpow2.f32 %v949_v45 }
 0x7c4   :  { %v4736_v46 = vpop.eup %4735 }
 0x7c5   :  { %v951_v47 = vsel %vm641_vm5, %v4736_v46, 0.0 }
 0x7c6   :  { %v4738_v48 = vpop.eup %4737  ;;  %952 = vadd.xlane.f32.xlu0 %v951_v47  ;;  %v3898_v47 = vld [vmem:[%s6468_s6 + $0x2] ss:$0 sm:$0xff] }
 0x7c7   :  { %v954_v49 = vsel %vm645_vm6, %v4738_v48, 0.0 }
 0x7c8   :  { %955 = vadd.xlane.f32.xlu1 %v954_v49 }
 0x853   :  { %v953_v50 = vpop.xlane.xlu0 %952 }
 0x854   :  { %4739 = vrcp.f32 %v953_v50 }
 0x855   :  { %v956_v51 = vpop.xlane.xlu1 %955 }
 0x856   :  { %4741 = vrcp.f32 %v956_v51 }
 0x85e   :  { %v4740_v53 = vpop.eup %4739 }
 0x85f   :  { %v958_v56 = vmul.f32 %v4740_v53, %v4736_v46 }
 0x860   :  { %v4742_v55 = vpop.eup %4741 }
 0x861   :  { %v960_v58 = vmul.f32 %v4742_v55, %v4738_v48  ;;  %v3912_v55 = vld [vmem:[%s6470_s28 + $0x2] ss:$0 sm:$0xff] }
 0x863   :  { %v961_v60 = vpack.c.bf16 %v960_v58, %v958_v56 }
 0x865   :  { %4375 = vmatmul.mubr.msk.bf16.vlgmr.msra.gmra.mrb[32].mxu1 %vm641_vm5, %v961_v60 }
 0x866   :  { %4385 = vmatpush3.bf16.msra.mxu1 %v1066_v61  ;;  %4386 = vmatprep.mubr.msk.bf16.mxu1 %vm4866_vm2, %v4865_v13 }
 0x867   :  { %4398 = vmatprep.subr.bf16.mxu1 %v4865_v13 }
 0x86d   :  { %4387 = vmatmul.mubr.msk.bf16.vlgmr.msra.gmra.mrb[36].mxu1 %vm589_vm3, %v716_v7  ;;  %v3893_v7 = vld [vmem:[%s6465_s0 + $0x40] sm:$0xff] }
 0x86e   :  { %4399 = vmatpush3.bf16.msra.mxu1 %v1170_v0  ;;  %4402 = vmatprep.mubr.msk.bf16.mxu1 %vm4866_vm2, %v4865_v13  ;;  %v1114_v12 = vpack.c.bf16 %v3894_v8, %v3893_v7 }
 0x86f   :  { %4400 = vmatprep.subr.bf16.mxu1 %v4865_v13 }
 0x872   :  { %4401 = vmatpush3.bf16.msra.mxu1 %v1171_v3 }
 0x873   :  { %4414 = vmatprep.subr.bf16.mxu1 %v4865_v13 }
 0x875   :  { %4403 = vmatmul.mubr.msk.bf16.vlgmr.msra.gmra.mrb[40].mxu1 %vm376_vm0, %v5394_v40 }
 0x876   :  { %4416 = vmatprep.mubr.msk.bf16.mxu1 %vm4866_vm2, %v4865_v13 }
 0x938   :  { %v1003_v9 = vpop.f32.mrb[32].mxu1 }
 0x939   :  { %v4376_v10 = vpop.f32.mrb[33].mxu1 }
 0x93a   :  { %v1006_v11 = vpop.f32.mrb[34].mxu1 }
 0x93b   :  { %v1012_v14 = vpack.c.bf16 %v1006_v11, %v1003_v9  ;;  %v4377_v15 = vpop.f32.mrb[35].mxu1 }
 0x93d   :  { %4381 = vmatmul.mubr.msk.bf16.vlgmr.msra.gmra.mrb[16].mxu0 %vm589_vm3, %v1012_v14 }
 0x93e   :  { %4391 = vmatpush3.bf16.msra.mxu0 %v1114_v12  ;;  %4394 = vmatprep.mubr.msk.bf16.mxu0 %vm4866_vm2, %v4865_v13 }
 0x93f   :  { %4392 = vmatprep.subr.bf16.mxu0 %v4865_v13 }
 0x940   :  { %v1102_v21 = vpop.f32.mrb[36].mxu1 }
 0x941   :  { %v4388_v22 = vpop.f32.mrb[37].mxu1 }
 0x942   :  { %v1105_v23 = vpop.f32.mrb[38].mxu1  ;;  %4393 = vmatpush3.bf16.msra.mxu0 %v1115_v18 }
 0x943   :  { %v4389_v26 = vpop.f32.mrb[39].mxu1  ;;  %4406 = vmatprep.subr.bf16.mxu0 %v4865_v13 }
 0x945   :  { %4395 = vmatmul.mubr.msk.bf16.vlgmr.msra.gmra.mrb[20].mxu0 %vm376_vm0, %v5394_v40 }
 0x946   :  { %4407 = vmatpush3.bf16.msra.mxu0 %v1226_v24  ;;  %4410 = vmatprep.mubr.msk.bf16.mxu0 %vm4866_vm2, %v4865_v13 }
 0x947   :  { %4408 = vmatprep.subr.bf16.mxu0 %v4865_v13 }
 0x948   :  { %v1214_v32 = vpop.f32.mrb[40].mxu1 }
 0x949   :  { %v4404_v33 = vpop.f32.mrb[41].mxu1  ;;  %v1215_v35 = vadd.f32 %v3905_v31, %v1214_v32 }
 0x94a   :  { %v1217_v34 = vpop.f32.mrb[42].mxu1  ;;  %4409 = vmatpush3.bf16.msra.mxu0 %v1227_v30  ;;  %v1459_v33 = vpack.c.bf16 %v3919_v28, %v3918_v27 }
 0x94b   :  { %v1218_v36 = vadd.f32 %v3905_v31, %v1217_v34  ;;  %v4405_v37 = vpop.f32.mrb[43].mxu1  ;;  %4420 = vmatprep.subr.bf16.mxu0 %v4865_v13 }
 0x94d   :  { %v1278_v38 = vpack.c.bf16 %v1218_v36, %v1215_v35  ;;  %4411 = vmatmul.mubr.msk.bf16.vlgmr.msra.gmra.mrb[24].mxu0 %vm376_vm0, %v5394_v40  ;;  %v3920_v35 = vld [vmem:[%s6465_s0 + $0x70] sm:$0xff]  ;;  %v3921_v36 = vld [vmem:[%s6465_s0 + $0x78] sm:$0xff] }
 0x94e   :  { %4422 = vmatprep.mubr.msk.bf16.mxu0 %vm4866_vm2, %v4865_v13  ;;  %v1460_v37 = vpack.c.bf16 %v3921_v36, %v3920_v35 }
 0x94f   :  { %v1283_v39 = vsel %vm589_vm3, %v1278_v38, 0  ;;  %v3932_v38 = vld [vmem:[%s6467_s2 + $0x60] sm:$0xff] }
 0x950   :  { %4415 = vmatpush3.bf16.xpose.msra.mxu1 %v1283_v39  ;;  %v3933_v39 = vld [vmem:[%s6467_s2 + $0x68] sm:$0xff] }
 0x951   :  { %4426 = vmatprep.subr.bf16.mxu1 %v4865_v13 }
 0xa10   :  { %v1055_v41 = vpop.f32.mrb[16].mxu0 }
 0xa11   :  { %v5614_v42 = vadd.f32 %v1102_v21, %v1055_v41  ;;  %v4382_v43 = vpop.f32.mrb[17].mxu0  ;;  %v1571_v41 = vpack.c.bf16 %v3933_v39, %v3932_v38 }
 0xa12   :  { %v1058_v44 = vpop.f32.mrb[18].mxu0  ;;  %v3934_v43 = vld [vmem:[%s6467_s2 + $0x70] sm:$0xff] }
 0xa13   :  { %v5616_v45 = vadd.f32 %v1105_v23, %v1058_v44  ;;  %v4383_v46 = vpop.f32.mrb[19].mxu0  ;;  %v3935_v44 = vld [vmem:[%s6467_s2 + $0x78] sm:$0xff] }
 0xa14   :  { %v1572_v46 = vpack.c.bf16 %v3935_v44, %v3934_v43 }
 0xa18   :  { %v1158_v48 = vpop.f32.mrb[20].mxu0 }
 0xa19   :  { %v4396_v49 = vpop.f32.mrb[21].mxu0  ;;  %v1159_v51 = vadd.f32 %v3898_v47, %v1158_v48 }
 0xa1a   :  { %v1161_v50 = vpop.f32.mrb[22].mxu0 }
 0xa1b   :  { %v1162_v52 = vadd.f32 %v3898_v47, %v1161_v50  ;;  %v4397_v53 = vpop.f32.mrb[23].mxu0  ;;  %v3916_v47 = vld [vmem:[%s6425_s11 + $0x10] sm:$0xff]  ;;  %v3925_v50 = vld [vmem:[%s6466_s10 + $0x60] sm:$0xff] }
 0xa1c   :  { %v1404_v48 = vpack.c.bf16 %v3916_v47, %v3916_v47 }
 0xa1d   :  { %v1277_v54 = vpack.c.bf16 %v1162_v52, %v1159_v51  ;;  %v3926_v51 = vld [vmem:[%s6466_s10 + $0x68] sm:$0xff] }
 0xa1e   :  { %v1409_v49 = vsel %vm1017_vm7, %v1404_v48, 0 }
 0xa1f   :  { %4417 = vmatmul.mubr.msk.bf16.vlgmr.msra.gmra.mrb[44].mxu1 %vm589_vm3, %v1277_v54 }
 0xa20   :  { %v1270_v56 = vpop.f32.mrb[24].mxu0  ;;  %4428 = vmatprep.mubr.msk.bf16.mxu1 %vm4866_vm2, %v4865_v13  ;;  %4427 = vmatpush3.bf16.msra.mxu1 %v1409_v49 }
 0xa21   :  { %v4412_v58 = vpop.f32.mrb[25].mxu0  ;;  %v1271_v61 = vadd.f32 %v3912_v55, %v1270_v56  ;;  %4440 = vmatprep.subr.bf16.mxu1 %v4865_v13 }
 0xa22   :  { %v1273_v60 = vpop.f32.mrb[26].mxu0 }
 0xa23   :  { %v1274_v62 = vadd.f32 %v3912_v55, %v1273_v60  ;;  %v4413_v63 = vpop.f32.mrb[27].mxu0  ;;  %v1515_v55 = vpack.c.bf16 %v3926_v51, %v3925_v50  ;;  %v3927_v60 = vld [vmem:[%s6466_s10 + $0x70] sm:$0xff] }
 0xa24   :  { %v3923_v63 = vld [vmem:[%s6468_s6 + $0x3] ss:$0 sm:$0xff] }
 0xa25   :  { %v1353_v0 = vpack.c.bf16 %v1274_v62, %v1271_v61  ;;  %v3928_v61 = vld [vmem:[%s6466_s10 + $0x78] sm:$0xff] }
 0xa26   :  { %v1516_v62 = vpack.c.bf16 %v3928_v61, %v3927_v60  ;;  %v3941_v61 = vld [vmem:[%s6425_s11 + $0x18] sm:$0xff] }
 0xa27   :  { %v1358_v1 = vsel %vm670_vm4, %v1353_v0, 0 }
 0xa28   :  { %4421 = vmatpush3.bf16.msra.mxu0 %v1358_v1 }
 0xa29   :  { %4432 = vmatprep.subr.bf16.mxu0 %v4865_v13 }
 0xaf2   :  { %v1319_v2 = vpop.f32.mrb[44].mxu1 }
 0xaf3   :  { %v1326_v3 = vmul.f32 0.35355338, %v1319_v2  ;;  %v4418_v4 = vpop.f32.mrb[45].mxu1 }
 0xaf4   :  { %v1322_v5 = vpop.f32.mrb[46].mxu1 }
 0xaf5   :  { %v1327_v6 = vmul.f32 0.35355338, %v1322_v5  ;;  %v4419_v7 = vpop.f32.mrb[47].mxu1  ;;  %v1328_v8 = vadd.f32 %v1326_v3, %v5458_v25 }
 0xaf6   :  { %v3937_v7 = vld [vmem:[%s6470_s28 + $0x3] ss:$0 sm:$0xff] }
 0xaf7   :  { %v1330_v9 = vsel %vm641_vm5, %v1328_v8, -inf  ;;  %v1329_v10 = vadd.f32 %v1327_v6, %v5463_v29 }
 0xaf8   :  { %1331 = vmax.xlane.f32.xlu0 %v1330_v9 }
 0xaf9   :  { %v1333_v11 = vsel %vm645_vm6, %v1329_v10, -inf }
 0xafa   :  { %1334 = vmax.xlane.f32.xlu1 %v1333_v11 }
 0xb85   :  { %v1332_v12 = vpop.xlane.xlu0 %1331 }
 0xb86   :  { %v1336_v14 = vsub.f32 %v1328_v8, %v1332_v12 }
 0xb87   :  { %v1335_v15 = vpop.xlane.xlu1 %1334 }
 0xb88   :  { %v1338_v16 = vmul.f32 1.442695, %v1336_v14  ;;  %v1337_v17 = vsub.f32 %v1329_v10, %v1335_v15 }
 0xb8a   :  { %4743 = vpow2.f32 %v1338_v16  ;;  %v1340_v18 = vmul.f32 1.442695, %v1337_v17 }
 0xb8c   :  { %4745 = vpow2.f32 %v1340_v18 }
 0xb94   :  { %v4744_v19 = vpop.eup %4743 }
 0xb95   :  { %v1342_v20 = vsel %vm641_vm5, %v4744_v19, 0.0 }
 0xb96   :  { %v4746_v21 = vpop.eup %4745  ;;  %1343 = vadd.xlane.f32.xlu0 %v1342_v20 }
 0xb97   :  { %v1345_v22 = vsel %vm645_vm6, %v4746_v21, 0.0 }
 0xb98   :  { %1346 = vadd.xlane.f32.xlu1 %v1345_v22  ;;  %v3930_v22 = vld [vmem:[%s6469_s30 + $0x3] ss:$0 sm:$0xff] }
 0xc23   :  { %v1344_v23 = vpop.xlane.xlu0 %1343 }
 0xc24   :  { %4747 = vrcp.f32 %v1344_v23 }
 0xc25   :  { %v1347_v24 = vpop.xlane.xlu1 %1346 }
 0xc26   :  { %4749 = vrcp.f32 %v1347_v24 }
 0xc2e   :  { %v4748_v26 = vpop.eup %4747 }
 0xc2f   :  { %v1349_v31 = vmul.f32 %v4748_v26, %v4744_v19 }
 0xc30   :  { %v4750_v30 = vpop.eup %4749 }
 0xc31   :  { %v1351_v32 = vmul.f32 %v4750_v30, %v4746_v21 }
 0xc33   :  { %v1352_v34 = vpack.c.bf16 %v1351_v32, %v1349_v31 }
 0xc35   :  { %4423 = vmatmul.mubr.msk.bf16.vlgmr.msra.gmra.mrb[28].mxu0 %vm641_vm5, %v1352_v34 }
 0xc36   :  { %4433 = vmatpush3.bf16.msra.mxu0 %v1459_v33  ;;  %4436 = vmatprep.mubr.msk.bf16.mxu0 %vm4866_vm2, %v4865_v13 }
 0xc37   :  { %4434 = vmatprep.subr.bf16.mxu0 %v4865_v13 }
 0xc3a   :  { %4435 = vmatpush3.bf16.msra.mxu0 %v1460_v37 }
 0xc3b   :  { %4448 = vmatprep.subr.bf16.mxu0 %v4865_v13 }
 0xc3d   :  { %4437 = vmatmul.mubr.msk.bf16.vlgmr.msra.gmra.mrb[32].mxu0 %vm376_vm0, %v5394_v40 }
 0xc3e   :  { %4449 = vmatpush3.bf16.msra.mxu0 %v1571_v41  ;;  %4452 = vmatprep.mubr.msk.bf16.mxu0 %vm4866_vm2, %v4865_v13 }
 0xc3f   :  { %4450 = vmatprep.subr.bf16.mxu0 %v4865_v13 }
 0xc42   :  { %4451 = vmatpush3.bf16.msra.mxu0 %v1572_v46 }
 0xc43   :  { %4462 = vmatprep.subr.bf16.mxu0 %v4865_v13 }
 0xc45   :  { %4453 = vmatmul.mubr.msk.bf16.vlgmr.msra.gmra.mrb[36].mxu0 %vm376_vm0, %v5394_v40 }
 0xc46   :  { %4464 = vmatprep.mubr.msk.bf16.mxu0 %vm4866_vm2, %v4865_v13 }
 0xd08   :  { %v1394_v52 = vpop.f32.mrb[28].mxu0 }
 0xd09   :  { %v4424_v53 = vpop.f32.mrb[29].mxu0 }
 0xd0a   :  { %v1397_v54 = vpop.f32.mrb[30].mxu0 }
 0xd0b   :  { %v1403_v56 = vpack.c.bf16 %v1397_v54, %v1394_v52  ;;  %v4425_v58 = vpop.f32.mrb[31].mxu0 }
 0xd0d   :  { %4429 = vmatmul.mubr.msk.bf16.vlgmr.msra.gmra.mrb[48].mxu1 %vm589_vm3, %v1403_v56 }
 0xd0e   :  { %4441 = vmatpush3.bf16.msra.mxu1 %v1515_v55  ;;  %4444 = vmatprep.mubr.msk.bf16.mxu1 %vm4866_vm2, %v4865_v13 }
 0xd0f   :  { %4442 = vmatprep.subr.bf16.mxu1 %v4865_v13 }
 0xd10   :  { %v1503_v0 = vpop.f32.mrb[32].mxu0 }
 0xd11   :  { %v4438_v1 = vpop.f32.mrb[33].mxu0  ;;  %v1504_v3 = vadd.f32 %v3923_v63, %v1503_v0 }
 0xd12   :  { %v1506_v2 = vpop.f32.mrb[34].mxu0  ;;  %4443 = vmatpush3.bf16.msra.mxu1 %v1516_v62  ;;  %v1749_v62 = vpack.c.bf16 %v3941_v61, %v3941_v61  ;;  %v1936_v61 = vld [vmem:[%s6433_s19 + $0x30] sm:$0xff] }
 0xd13   :  { %v1507_v4 = vadd.f32 %v3923_v63, %v1506_v2  ;;  %v4439_v5 = vpop.f32.mrb[35].mxu0  ;;  %4456 = vmatprep.subr.bf16.mxu1 %v4865_v13 }
 0xd14   :  { %v1754_v63 = vsel %vm1017_vm7, %v1749_v62, 0  ;;  %v1937_v62 = vld [vmem:[%s6433_s19 + $0x38] sm:$0xff] }
 0xd15   :  { %v1622_v6 = vpack.c.bf16 %v1507_v4, %v1504_v3  ;;  %4445 = vmatmul.mubr.msk.bf16.vlgmr.msra.gmra.mrb[52].mxu1 %vm376_vm0, %v5394_v40 }
 0xd16   :  { %4458 = vmatprep.mubr.msk.bf16.mxu1 %vm4866_vm2, %v4865_v13 }
 0xd18   :  { %v1615_v8 = vpop.f32.mrb[36].mxu0 }
 0xd19   :  { %v4454_v9 = vpop.f32.mrb[37].mxu0  ;;  %v1616_v11 = vadd.f32 %v3937_v7, %v1615_v8  ;;  %v3943_v8 = vld [vmem:[%s6426_s12] ss:$0 sm:$0xff] }
 0xd1a   :  { %v1618_v10 = vpop.f32.mrb[38].mxu0 }
 0xd1b   :  { %v1619_v12 = vadd.f32 %v3937_v7, %v1618_v10  ;;  %v4455_v14 = vpop.f32.mrb[39].mxu0 }
 0xd1d   :  { %v1698_v15 = vpack.c.bf16 %v1619_v12, %v1616_v11 }
 0xd1f   :  { %v1703_v16 = vsel %vm670_vm4, %v1698_v15, 0 }
 0xd20   :  { %4463 = vmatpush3.bf16.msra.mxu0 %v1703_v16 }
 0xd21   :  { %4474 = vmatprep.subr.bf16.mxu0 %v4865_v13 }
 0xde0   :  { %v1445_v40 = vpop.f32.mrb[48].mxu1 }
 0xde1   :  { %v5709_v17 = vadd.f32 %v1445_v40, %v5614_v42  ;;  %v4430_v18 = vpop.f32.mrb[49].mxu1 }
 0xde2   :  { %v1448_v19 = vpop.f32.mrb[50].mxu1 }
 0xde3   :  { %v5712_v20 = vadd.f32 %v1448_v19, %v5616_v45  ;;  %v4431_v21 = vpop.f32.mrb[51].mxu1 }
 0xde8   :  { %v1559_v23 = vpop.f32.mrb[52].mxu1 }
 0xde9   :  { %v4446_v24 = vpop.f32.mrb[53].mxu1  ;;  %v1560_v27 = vadd.f32 %v3930_v22, %v1559_v23 }
 0xdea   :  { %v1562_v26 = vpop.f32.mrb[54].mxu1 }
 0xdeb   :  { %v1563_v28 = vadd.f32 %v3930_v22, %v1562_v26  ;;  %v4447_v30 = vpop.f32.mrb[55].mxu1 }
 0xded   :  { %v1623_v31 = vpack.c.bf16 %v1563_v28, %v1560_v27  ;;  %v1854_v27 = vld [vmem:[%s6431_s17] sm:$0xff]  ;;  %v1855_v28 = vld [vmem:[%s6431_s17 + $0x8] sm:$0xff] }
 0xdee   :  { %v1859_v30 = vpack.c.bf16 %v1855_v28, %v1854_v27 }
 0xdef   :  { %v1628_v42 = vsel %vm589_vm3, %v1623_v31, 0  ;;  %v1856_v31 = vld [vmem:[%s6431_s17 + $0x10] sm:$0xff] }
 0xdf0   :  { %4457 = vmatpush3.bf16.xpose.msra.mxu1 %v1628_v42  ;;  %v1857_v42 = vld [vmem:[%s6431_s17 + $0x18] sm:$0xff] }
 0xdf1   :  { %4468 = vmatprep.subr.bf16.mxu1 %v4865_v13 }
 0xdf7   :  { %4459 = vmatmul.mubr.msk.bf16.vlgmr.msra.gmra.mrb[56].mxu1 %vm589_vm3, %v1622_v6 }
 0xdf8   :  { %4470 = vmatprep.mubr.msk.bf16.mxu1 %vm4866_vm2, %v4865_v13  ;;  %4469 = vmatpush3.bf16.msra.mxu1 %v1754_v63  ;;  %v1950_v63 = vpack.c.bf16 %v1937_v62, %v1936_v61  ;;  %v3954_v61 = vld [vmem:[%s6465_s0 + $0x88] sm:$0xff] }
 0xdf9   :  { %4482 = vmatprep.subr.bf16.mxu1 %v4865_v13 }
 0xeca   :  { %v1664_v45 = vpop.f32.mrb[56].mxu1 }
 0xecb   :  { %v1671_v32 = vmul.f32 0.35355338, %v1664_v45  ;;  %v4460_v33 = vpop.f32.mrb[57].mxu1  ;;  %v1860_v45 = vpack.c.bf16 %v1857_v42, %v1856_v31 }
 0xecc   :  { %v1667_v34 = vpop.f32.mrb[58].mxu1 }
 0xecd   :  { %v1672_v35 = vmul.f32 0.35355338, %v1667_v34  ;;  %v4461_v36 = vpop.f32.mrb[59].mxu1  ;;  %v1673_v37 = vadd.f32 %v1671_v32, %v5458_v25 }
 0xecf   :  { %v1675_v38 = vsel %vm641_vm5, %v1673_v37, -inf  ;;  %v1674_v39 = vadd.f32 %v1672_v35, %v5463_v29 }
 0xed0   :  { %1676 = vmax.xlane.f32.xlu0 %v1675_v38 }
 0xed1   :  { %v1678_v41 = vsel %vm645_vm6, %v1674_v39, -inf }
 0xed2   :  { %1679 = vmax.xlane.f32.xlu1 %v1678_v41 }
 0xf5d   :  { %v1677_v43 = vpop.xlane.xlu0 %1676 }
 0xf5e   :  { %v1681_v44 = vsub.f32 %v1673_v37, %v1677_v43 }
 0xf5f   :  { %v1680_v46 = vpop.xlane.xlu1 %1679 }
 0xf60   :  { %v1683_v47 = vmul.f32 1.442695, %v1681_v44  ;;  %v1682_v48 = vsub.f32 %v1674_v39, %v1680_v46  ;;  %v3944_v39 = vld [vmem:[%s6429_s15] ss:$0 sm:$0xff] }
 0xf62   :  { %4751 = vpow2.f32 %v1683_v47  ;;  %v1685_v49 = vmul.f32 1.442695, %v1682_v48  ;;  %v3945_v47 = vld [vmem:[%s6430_s16] ss:$0 sm:$0xff] }
 0xf64   :  { %4753 = vpow2.f32 %v1685_v49 }
 0xf6c   :  { %v4752_v50 = vpop.eup %4751 }
 0xf6d   :  { %v1687_v51 = vsel %vm641_vm5, %v4752_v50, 0.0 }
 0xf6e   :  { %v4754_v25 = vpop.eup %4753  ;;  %1688 = vadd.xlane.f32.xlu0 %v1687_v51 }
 0xf6f   :  { %v1690_v52 = vsel %vm645_vm6, %v4754_v25, 0.0 }
 0xf70   :  { %1691 = vadd.xlane.f32.xlu1 %v1690_v52  ;;  %v1931_v52 = vld [vmem:[%s6433_s19 + $0x8] sm:$0xff] }
 0xffb   :  { %v1689_v29 = vpop.xlane.xlu0 %1688 }
 0xffc   :  { %4755 = vrcp.f32 %v1689_v29 }
 0xffd   :  { %v1692_v53 = vpop.xlane.xlu1 %1691 }
 0xffe   :  { %4757 = vrcp.f32 %v1692_v53  ;;  %v1932_v53 = vld [vmem:[%s6433_s19 + $0x10] sm:$0xff] }
0x1006   :  { %v4756_v54 = vpop.eup %4755 }
0x1007   :  { %v1694_v56 = vmul.f32 %v4756_v54, %v4752_v50  ;;  %v1933_v54 = vld [vmem:[%s6433_s19 + $0x18] sm:$0xff] }
0x1008   :  { %v4758_v55 = vpop.eup %4757 }
0x1009   :  { %v1696_v58 = vmul.f32 %v4758_v55, %v4754_v25  ;;  %v1930_v25 = vld [vmem:[%s6433_s19] sm:$0xff]  ;;  %v1948_v55 = vpack.c.bf16 %v1933_v54, %v1932_v53 }
0x100a   :  { %v1947_v29 = vpack.c.bf16 %v1931_v52, %v1930_v25 }
0x100b   :  { %v1697_v60 = vpack.c.bf16 %v1696_v58, %v1694_v56  ;;  %v1934_v56 = vld [vmem:[%s6433_s19 + $0x20] sm:$0xff]  ;;  %v1935_v58 = vld [vmem:[%s6433_s19 + $0x28] sm:$0xff] }
0x100d   :  { %4465 = vmatmul.mubr.msk.bf16.vlgmr.msra.gmra.mrb[40].mxu0 %vm641_vm5, %v1697_v60  ;;  %v1949_v60 = vpack.c.bf16 %v1935_v58, %v1934_v56 }
0x100e   :  { %4478 = vmatprep.mubr.msk.bf16.mxu0 %vm4866_vm2, %v4865_v13  ;;  %4475 = vmatpush3.bf16.msra.mxu0 %v1859_v30 }
0x100f   :  { %4476 = vmatprep.subr.bf16.mxu0 %v4865_v13 }
0x1012   :  { %4477 = vmatpush3.bf16.msra.mxu0 %v1860_v45 }
0x1013   :  { %4502 = vmatprep.subr.bf16.mxu0 %v4865_v13 }
0x10e0   :  { %v1739_v0 = vpop.f32.mrb[40].mxu0 }
0x10e1   :  { %v4466_v1 = vpop.f32.mrb[41].mxu0 }
0x10e2   :  { %v1742_v2 = vpop.f32.mrb[42].mxu0  ;;  %v1939_v1 = vld [vmem:[%s6433_s19 + $0x48] sm:$0xff] }
0x10e3   :  { %v1748_v3 = vpack.c.bf16 %v1742_v2, %v1739_v0  ;;  %v4467_v4 = vpop.f32.mrb[43].mxu0  ;;  %v1938_v0 = vld [vmem:[%s6433_s19 + $0x40] sm:$0xff] }
0x10e4   :  { %v1951_v2 = vpack.c.bf16 %v1939_v1, %v1938_v0  ;;  %v1941_v4 = vld [vmem:[%s6433_s19 + $0x58] sm:$0xff] }
0x10e5   :  { %4471 = vmatmul.mubr.msk.bf16.vlgmr.msra.gmra.mrb[60].mxu1 %vm589_vm3, %v1748_v3  ;;  %v1940_v3 = vld [vmem:[%s6433_s19 + $0x50] sm:$0xff]  ;;  %v3956_v0 = vld [vmem:[%s6465_s0 + $0x98] sm:$0xff] }
0x10e6   :  { %4498 = vmatprep.mubr.msk.bf16.mxu1 %vm4866_vm2, %v4865_v13  ;;  %4483 = vmatpush3.bf16.msra.mxu1 %v1947_v29 }
0x10e7   :  { %4484 = vmatprep.subr.bf16.mxu1 %v4865_v13 }
0x10ea   :  { %4485 = vmatpush3.bf16.msra.mxu1 %v1948_v55 }
0x10eb   :  { %4486 = vmatprep.subr.bf16.mxu1 %v4865_v13 }
0x10ee   :  { %4487 = vmatpush3.bf16.msra.mxu1 %v1949_v60  ;;  %v3953_v60 = vld [vmem:[%s6465_s0 + $0x80] sm:$0xff] }
0x10ef   :  { %4488 = vmatprep.subr.bf16.mxu1 %v4865_v13  ;;  %v2059_v62 = vpack.c.bf16 %v3954_v61, %v3953_v60 }
0x10f2   :  { %4489 = vmatpush3.bf16.msra.mxu1 %v1950_v63  ;;  %v3955_v63 = vld [vmem:[%s6465_s0 + $0x90] sm:$0xff] }
0x10f3   :  { %4490 = vmatprep.subr.bf16.mxu1 %v4865_v13  ;;  %v2060_v1 = vpack.c.bf16 %v3956_v0, %v3955_v63  ;;  %v3980_v63 = vld [vmem:[%s6465_s0 + $0xb8] sm:$0xff] }
0x10f6   :  { %4491 = vmatpush3.bf16.msra.mxu1 %v1951_v2 }
0x10f7   :  { %4492 = vmatprep.subr.bf16.mxu1 %v4865_v13 }
0x11b8   :  { %v1790_v5 = vpop.f32.mrb[60].mxu1 }
0x11b9   :  { %v1797_v6 = vadd.f32 %v1790_v5, %v5709_v17  ;;  %v4472_v7 = vpop.f32.mrb[61].mxu1  ;;  %v1952_v5 = vpack.c.bf16 %v1941_v4, %v1940_v3 }
0x11ba   :  { %v1793_v9 = vpop.f32.mrb[62].mxu1  ;;  %v1943_v7 = vld [vmem:[%s6433_s19 + $0x68] sm:$0xff] }
0x11bb   :  { %v1799_v10 = vadd.f32 %v1797_v6, %v5336_v57  ;;  %v1798_v11 = vadd.f32 %v1793_v9, %v5712_v20  ;;  %v4473_v12 = vpop.f32.mrb[63].mxu1  ;;  %4493 = vmatpush3.bf16.msra.mxu1 %v1952_v5  ;;  %v1942_v6 = vld [vmem:[%s6433_s19 + $0x60] sm:$0xff]  ;;  %v1944_v9 = vld [vmem:[%s6433_s19 + $0x70] sm:$0xff] }
0x11bc   :  { %4494 = vmatprep.subr.bf16.mxu1 %v4865_v13  ;;  %v3946_v12 = vld [vmem:[%s6432_s18] ss:$0 sm:$0xff] }
0x11bd   :  { %v5745_v14 = vadd.f32 %v3943_v8, %v1799_v10  ;;  %v1800_v15 = vadd.f32 %v1798_v11, %v5338_v59  ;;  %v1945_v10 = vld [vmem:[%s6433_s19 + $0x78] sm:$0xff] }
0x11be   :  { %v1954_v11 = vpack.c.bf16 %v1945_v10, %v1944_v9  ;;  %v3951_v9 = vld [vmem:[%s6427_s13 + $0x1] ss:$0 sm:$0xff] }
0x11bf   :  { %v5748_v16 = vadd.f32 %v3943_v8, %v1800_v15  ;;  %v1812_v40 = vsel %vm376_vm0, %v5745_v14, 0.0  ;;  %v1953_v8 = vpack.c.bf16 %v1943_v7, %v1942_v6 }
0x11c0   :  { %1813 = vadd.xlane.f32.xlu0 %v1812_v40 }
0x11c1   :  { %v1815_v17 = vsel %vm380_vm1, %v5748_v16, 0.0  ;;  %4495 = vmatpush3.bf16.msra.mxu1 %v1953_v8 }
0x11c2   :  { %1816 = vadd.xlane.f32.xlu1 %v1815_v17  ;;  %4496 = vmatprep.subr.bf16.mxu1 %v4865_v13 }
0x11c5   :  { %4497 = vmatpush3.bf16.msra.mxu1 %v1954_v11 }
0x11c6   :  { %4532 = vmatprep.subr.bf16.mxu1 %v4865_v13 }
0x124d   :  { %v1814_v18 = vpop.xlane.xlu0 %1813 }
0x124e   :  { %v1818_v19 = vmul.f32 0.03125, %v1814_v18 }
0x124f   :  { %v1817_v57 = vpop.xlane.xlu1 %1816 }
0x1250   :  { %v1820_v20 = vsub.f32 %v5745_v14, %v1818_v19  ;;  %v1819_v21 = vmul.f32 0.03125, %v1817_v57 }
0x1252   :  { %v1821_v22 = vsub.f32 %v5748_v16, %v1819_v21  ;;  %v1822_v23 = vmul.f32 %v1820_v20, %v1820_v20 }
0x1254   :  { %v1824_v59 = vsel %vm376_vm0, %v1822_v23, 0.0  ;;  %v1823_v24 = vmul.f32 %v1821_v22, %v1821_v22 }
0x1255   :  { %1825 = vadd.xlane.f32.xlu0 %v1824_v59 }
0x1256   :  { %v1827_v26 = vsel %vm380_vm1, %v1823_v24, 0.0 }
0x1257   :  { %1828 = vadd.xlane.f32.xlu1 %v1827_v26 }
0x12e2   :  { %v1826_v32 = vpop.xlane.xlu0 %1825 }
0x12e3   :  { %v1830_v33 = vmul.f32 0.03125, %v1826_v32 }
0x12e4   :  { %v1829_v34 = vpop.xlane.xlu1 %1828 }
0x12e5   :  { %v1832_v35 = vadd.f32 1e-06, %v1830_v33  ;;  %v1831_v36 = vmul.f32 0.03125, %v1829_v34 }
0x12e7   :  { %4759 = vrsqrt.f32 %v1832_v35  ;;  %v1833_v37 = vadd.f32 1e-06, %v1831_v36 }
0x12e9   :  { %4761 = vrsqrt.f32 %v1833_v37 }
0x12f1   :  { %v4760_v38 = vpop.eup %4759 }
0x12f2   :  { %v1836_v41 = vmul.f32 %v4760_v38, %v1820_v20 }
0x12f3   :  { %v4762_v43 = vpop.eup %4761 }
0x12f4   :  { %v1844_v44 = vmul.f32 %v3944_v39, %v1836_v41  ;;  %v1837_v46 = vmul.f32 %v4762_v43, %v1821_v22 }
0x12f6   :  { %v1845_v48 = vmul.f32 %v3944_v39, %v1837_v46  ;;  %v1852_v49 = vadd.f32 %v3945_v47, %v1844_v44  ;;  %v3948_v39 = vld [vmem:[%s6434_s20] ss:$0 sm:$0xff] }
0x12f8   :  { %v1853_v50 = vadd.f32 %v3945_v47, %v1845_v48 }
0x12fa   :  { %v1858_v51 = vpack.c.bf16 %v1853_v50, %v1852_v49 }
0x12fc   :  { %4479 = vmatmul.mubr.msk.bf16.vlgmr.msra.gmra.mrb[44].mxu0 %vm376_vm0, %v1858_v51 }
0x12fd   :  { %4506 = vmatprep.mubr.msk.bf16.mxu0 %vm4866_vm2, %v4865_v13  ;;  %4503 = vmatpush3.bf16.msra.mxu0 %v2059_v62  ;;  %v3979_v62 = vld [vmem:[%s6465_s0 + $0xb0] sm:$0xff] }
0x12fe   :  { %4504 = vmatprep.subr.bf16.mxu0 %v4865_v13 }
0x1301   :  { %4505 = vmatpush3.bf16.msra.mxu0 %v2060_v1  ;;  %v2359_v1 = vpack.c.bf16 %v3980_v63, %v3979_v62  ;;  %v3987_v62 = vld [vmem:[%s6466_s10 + $0xb8] sm:$0xff] }
0x1302   :  { %4510 = vmatprep.subr.bf16.mxu0 %v4865_v13 }
0x13cf   :  { %v1905_v15 = vpop.f32.mrb[44].mxu0 }
0x13d0   :  { %v1906_v40 = vadd.f32 %v3946_v12, %v1905_v15  ;;  %v4480_v17 = vpop.f32.mrb[45].mxu0 }
0x13d1   :  { %v1908_v18 = vpop.f32.mrb[46].mxu0 }
0x13d2   :  { %v1912_v19 = vmul.f32 %v1906_v40, %v1906_v40  ;;  %v1909_v57 = vadd.f32 %v3946_v12, %v1908_v18  ;;  %v4481_v20 = vpop.f32.mrb[47].mxu0  ;;  %v3960_v18 = vld [vmem:[%s6466_s10 + $0x80] sm:$0xff] }
0x13d4   :  { %v1914_v21 = vmul.f32 %v1912_v19, %v1906_v40  ;;  %v1913_v22 = vmul.f32 %v1909_v57, %v1909_v57  ;;  %v3961_v19 = vld [vmem:[%s6466_s10 + $0x88] sm:$0xff] }
0x13d6   :  { %v1916_v23 = vmul.f32 0.044715, %v1914_v21  ;;  %v1915_v59 = vmul.f32 %v1913_v22, %v1909_v57  ;;  %v2118_v21 = vpack.c.bf16 %v3961_v19, %v3960_v18  ;;  %v5983_v19 = vld [vmem:[%s6471_s4 + $0x8] sm:$0x3] }
0x13d8   :  { %v1918_v24 = vadd.f32 %v1916_v23, %v1906_v40  ;;  %v1917_v26 = vmul.f32 0.044715, %v1915_v59  ;;  %v3962_v23 = vld [vmem:[%s6466_s10 + $0x90] sm:$0xff]  ;;  %v3963_v59 = vld [vmem:[%s6466_s10 + $0x98] sm:$0xff] }
0x13da   :  { %v1920_v27 = vmul.f32 0.7978846, %v1918_v24  ;;  %v1919_v28 = vadd.f32 %v1917_v26, %v1909_v57  ;;  %v2119_v24 = vpack.c.bf16 %v3963_v59, %v3962_v23  ;;  %v3967_v26 = vld [vmem:[%s6467_s2 + $0x80] sm:$0xff] }
0x13dc   :  { %4763 = vtanh.f32 %v1920_v27  ;;  %v1921_v30 = vmul.f32 0.7978846, %v1919_v28  ;;  %v3968_v27 = vld [vmem:[%s6467_s2 + $0x88] sm:$0xff] }
0x13dd   :  { %v2174_v28 = vpack.c.bf16 %v3968_v27, %v3967_v26 }
0x13de   :  { %4765 = vtanh.f32 %v1921_v30  ;;  %v3969_v30 = vld [vmem:[%s6467_s2 + $0x90] sm:$0xff] }
0x13e6   :  { %v4764_v31 = vpop.eup %4763 }
0x13e7   :  { %v1924_v42 = vadd.f32 1.0, %v4764_v31  ;;  %v3970_v31 = vld [vmem:[%s6467_s2 + $0x98] sm:$0xff] }
0x13e8   :  { %v4766_v45 = vpop.eup %4765 }
0x13e9   :  { %v1926_v32 = vmul.f32 0.5, %v1924_v42  ;;  %v1925_v33 = vadd.f32 1.0, %v4766_v45  ;;  %v2175_v42 = vpack.c.bf16 %v3970_v31, %v3969_v30  ;;  %v3958_v45 = vld [vmem:[%s6468_s6 + $0x4] ss:$0 sm:$0xff]  ;;  %v3996_v31 = vld [vmem:[%s6470_s28 + $0x5] ss:$0 sm:$0xff] }
0x13eb   :  { %v1927_v34 = vmul.f32 0.5, %v1925_v33  ;;  %v1928_v35 = vmul.f32 %v1926_v32, %v1906_v40  ;;  %v3952_v40 = vld [vmem:[%s6428_s14 + $0x1] ss:$0 sm:$0xff] }
0x13ed   :  { %v1929_v36 = vmul.f32 %v1927_v34, %v1909_v57 }
0x13ef   :  { %v1946_v37 = vpack.c.bf16 %v1929_v36, %v1928_v35 }
0x13f1   :  { %4499 = vmatmul.mubr.bf16.vlgmr.msra.gmra.mrb[64].mxu1 %v1946_v37 }
0x13f2   :  { %4534 = vmatprep.mubr.msk.bf16.mxu1 %vm4866_vm2, %v4865_v13 }
0x14c4   :  { %v1989_v38 = vpop.f32.mrb[64].mxu1 }
0x14c5   :  { %v1996_v41 = vadd.f32 %v1989_v38, %v5745_v14  ;;  %v4500_v43 = vpop.f32.mrb[65].mxu1 }
0x14c6   :  { %v1992_v44 = vpop.f32.mrb[66].mxu1 }
0x14c7   :  { %v5846_v46 = vadd.f32 %v3948_v39, %v1996_v41  ;;  %v1997_v47 = vadd.f32 %v1992_v44, %v5748_v16  ;;  %v4501_v48 = vpop.f32.mrb[67].mxu1 }
0x14c9   :  { %v5849_v49 = vadd.f32 %v3948_v39, %v1997_v47  ;;  %v2011_v50 = vsel %vm376_vm0, %v5846_v46, 0.0  ;;  %v3965_v39 = vld [vmem:[%s6469_s30 + $0x4] ss:$0 sm:$0xff] }
0x14ca   :  { %2012 = vadd.xlane.f32.xlu0 %v2011_v50 }
0x14cb   :  { %v2014_v51 = vsel %vm380_vm1, %v5849_v49, 0.0 }
0x14cc   :  { %2015 = vadd.xlane.f32.xlu1 %v2014_v51 }
0x1557   :  { %v2013_v25 = vpop.xlane.xlu0 %2012 }
0x1558   :  { %v2017_v52 = vmul.f32 0.03125, %v2013_v25 }
0x1559   :  { %v2016_v14 = vpop.xlane.xlu1 %2015 }
0x155a   :  { %v2019_v29 = vsub.f32 %v5846_v46, %v2017_v52  ;;  %v2018_v53 = vmul.f32 0.03125, %v2016_v14  ;;  %v3972_v52 = vld [vmem:[%s6470_s28 + $0x4] ss:$0 sm:$0xff] }
0x155c   :  { %v2020_v54 = vsub.f32 %v5849_v49, %v2018_v53  ;;  %v2021_v16 = vmul.f32 %v2019_v29, %v2019_v29  ;;  %v3977_v53 = vld [vmem:[%s6465_s0 + $0xa0] sm:$0xff] }
0x155e   :  { %v2023_v55 = vsel %vm376_vm0, %v2021_v16, 0.0  ;;  %v2022_v56 = vmul.f32 %v2020_v54, %v2020_v54 }
0x155f   :  { %2024 = vadd.xlane.f32.xlu0 %v2023_v55 }
0x1560   :  { %v2026_v58 = vsel %vm380_vm1, %v2022_v56, 0.0 }
0x1561   :  { %2027 = vadd.xlane.f32.xlu1 %v2026_v58 }
0x15ec   :  { %v2025_v2 = vpop.xlane.xlu0 %2024 }
0x15ed   :  { %v2029_v3 = vmul.f32 0.03125, %v2025_v2  ;;  %v3991_v2 = vld [vmem:[%s6467_s2 + $0xa0] sm:$0xff] }
0x15ee   :  { %v2028_v4 = vpop.xlane.xlu1 %2027 }
0x15ef   :  { %v2031_v5 = vadd.f32 1e-06, %v2029_v3  ;;  %v2030_v6 = vmul.f32 0.03125, %v2028_v4  ;;  %v3992_v3 = vld [vmem:[%s6467_s2 + $0xa8] sm:$0xff] }
0x15f0   :  { %v2470_v4 = vpack.c.bf16 %v3992_v3, %v3991_v2 }
0x15f1   :  { %4767 = vrsqrt.f32 %v2031_v5  ;;  %v2032_v7 = vadd.f32 1e-06, %v2030_v6  ;;  %v3993_v5 = vld [vmem:[%s6467_s2 + $0xb0] sm:$0xff]  ;;  %v3994_v6 = vld [vmem:[%s6467_s2 + $0xb8] sm:$0xff] }
0x15f3   :  { %4769 = vrsqrt.f32 %v2032_v7  ;;  %v2471_v7 = vpack.c.bf16 %v3994_v6, %v3993_v5  ;;  %v3989_v5 = vld [vmem:[%s6469_s30 + $0x5] ss:$0 sm:$0xff] }
0x15fb   :  { %v4768_v8 = vpop.eup %4767 }
0x15fc   :  { %v2035_v10 = vmul.f32 %v4768_v8, %v2019_v29 }
0x15fd   :  { %v4770_v11 = vpop.eup %4769 }
0x15fe   :  { %v2043_v12 = vmul.f32 %v3951_v9, %v2035_v10  ;;  %v2036_v15 = vmul.f32 %v4770_v11, %v2020_v54  ;;  %v3978_v54 = vld [vmem:[%s6465_s0 + $0xa8] sm:$0xff] }
0x15ff   :  { %v2358_v60 = vpack.c.bf16 %v3978_v54, %v3977_v53  ;;  %v3984_v53 = vld [vmem:[%s6466_s10 + $0xa0] sm:$0xff]  ;;  %v3985_v54 = vld [vmem:[%s6466_s10 + $0xa8] sm:$0xff] }
0x1600   :  { %v2044_v17 = vmul.f32 %v3951_v9, %v2036_v15  ;;  %v2051_v57 = vadd.f32 %v3952_v40, %v2043_v12 }
0x1602   :  { %v2052_v20 = vadd.f32 %v3952_v40, %v2044_v17  ;;  %v5976_v40 = vld [vmem:[%s6471_s4] sm:$0xff] }
0x1604   :  { %v5885_v22 = vpack.c.bf16 %v2052_v20, %v2051_v57 }
0x1606   :  { %4507 = vmatmul.mubr.msk.bf16.vlgmr.msra.gmra.mrb[48].mxu0 %vm376_vm0, %v5885_v22 }
0x1607   :  { %4511 = vmatpush3.bf16.msra.mxu0 %v2118_v21  ;;  %4514 = vmatprep.mubr.msk.bf16.mxu0 %vm4866_vm2, %v4865_v13  ;;  %v3982_v21 = vld [vmem:[%s6468_s6 + $0x5] ss:$0 sm:$0xff] }
0x1608   :  { %4512 = vmatprep.subr.bf16.mxu0 %v4865_v13 }
0x160b   :  { %4513 = vmatpush3.bf16.msra.mxu0 %v2119_v24 }
0x160c   :  { %4518 = vmatprep.subr.bf16.mxu0 %v4865_v13 }
0x160e   :  { %4515 = vmatmul.mubr.msk.bf16.vlgmr.msra.gmra.mrb[52].mxu0 %vm376_vm0, %v5885_v22 }
0x160f   :  { %4519 = vmatpush3.bf16.msra.mxu0 %v2174_v28  ;;  %4522 = vmatprep.mubr.msk.bf16.mxu0 %vm4866_vm2, %v4865_v13 }
0x1610   :  { %4520 = vmatprep.subr.bf16.mxu0 %v4865_v13 }
0x1613   :  { %4521 = vmatpush3.bf16.msra.mxu0 %v2175_v42 }
0x1614   :  { %4526 = vmatprep.subr.bf16.mxu0 %v4865_v13 }
0x1616   :  { %4523 = vmatmul.mubr.msk.bf16.vlgmr.msra.gmra.mrb[56].mxu0 %vm376_vm0, %v5885_v22 }
0x1617   :  { %4528 = vmatprep.mubr.msk.bf16.mxu0 %vm4866_vm2, %v4865_v13 }
0x16d9   :  { %v2106_v32 = vpop.f32.mrb[48].mxu0 }
0x16da   :  { %v4508_v33 = vpop.f32.mrb[49].mxu0  ;;  %v2107_v35 = vadd.f32 %v3958_v45, %v2106_v32 }
0x16db   :  { %v2109_v34 = vpop.f32.mrb[50].mxu0 }
0x16dc   :  { %v2110_v36 = vadd.f32 %v3958_v45, %v2109_v34  ;;  %v4509_v37 = vpop.f32.mrb[51].mxu0 }
0x16de   :  { %v2225_v38 = vpack.c.bf16 %v2110_v36, %v2107_v35 }
0x16e1   :  { %v2162_v41 = vpop.f32.mrb[52].mxu0 }
0x16e2   :  { %v4516_v43 = vpop.f32.mrb[53].mxu0  ;;  %v2163_v47 = vadd.f32 %v3965_v39, %v2162_v41 }
0x16e3   :  { %v2165_v44 = vpop.f32.mrb[54].mxu0 }
0x16e4   :  { %v2166_v48 = vadd.f32 %v3965_v39, %v2165_v44  ;;  %v4517_v50 = vpop.f32.mrb[55].mxu0 }
0x16e6   :  { %v2226_v51 = vpack.c.bf16 %v2166_v48, %v2163_v47 }
0x16e8   :  { %v2231_v25 = vsel %vm589_vm3, %v2226_v51, 0 }
0x16e9   :  { %v2218_v14 = vpop.f32.mrb[56].mxu0  ;;  %4527 = vmatpush3.bf16.xpose.msra.mxu0 %v2231_v25 }
0x16ea   :  { %v4524_v29 = vpop.f32.mrb[57].mxu0  ;;  %4538 = vmatprep.subr.bf16.mxu0 %v4865_v13  ;;  %v2219_v55 = vadd.f32 %v3972_v52, %v2218_v14 }
0x16eb   :  { %v2221_v16 = vpop.f32.mrb[58].mxu0 }
0x16ec   :  { %v2222_v56 = vadd.f32 %v3972_v52, %v2221_v16  ;;  %v4525_v58 = vpop.f32.mrb[59].mxu0 }
0x16ed   :  { %v2414_v58 = vpack.c.bf16 %v3985_v54, %v3984_v53  ;;  %v4013_v53 = vld [vmem:[%s6466_s10 + $0xd8] sm:$0xff] }
0x16ee   :  { %v2301_v61 = vpack.c.bf16 %v2222_v56, %v2219_v55 }
0x16f0   :  { %4529 = vmatmul.mubr.msk.bf16.vlgmr.msra.gmra.mrb[60].mxu0 %vm589_vm3, %v2225_v38  ;;  %v2306_v0 = vsel %vm670_vm4, %v2301_v61, 0  ;;  %v3986_v61 = vld [vmem:[%s6466_s10 + $0xb0] sm:$0xff] }
0x16f1   :  { %4533 = vmatpush3.bf16.msra.mxu1 %v2306_v0  ;;  %4539 = vmatpush3.bf16.msra.mxu0 %v2358_v60  ;;  %v2415_v63 = vpack.c.bf16 %v3987_v62, %v3986_v61 }
0x16f2   :  { %4540 = vmatprep.subr.bf16.mxu0 %v4865_v13  ;;  %4542 = vmatprep.mubr.msk.bf16.mxu0 %vm4866_vm2, %v4865_v13 }
0x16f3   :  { %4546 = vmatprep.subr.bf16.mxu1 %v4865_v13 }
0x16f5   :  { %4541 = vmatpush3.bf16.msra.mxu0 %v2359_v1 }
0x16f6   :  { %4554 = vmatprep.subr.bf16.mxu0 %v4865_v13 }
0x16f8   :  { %4543 = vmatmul.mubr.msk.bf16.vlgmr.msra.gmra.mrb[64].mxu0 %vm376_vm0, %v5885_v22 }
0x16f9   :  { %4555 = vmatpush3.bf16.msra.mxu0 %v2470_v4  ;;  %4558 = vmatprep.mubr.msk.bf16.mxu0 %vm4866_vm2, %v4865_v13 }
0x16fa   :  { %4556 = vmatprep.subr.bf16.mxu0 %v4865_v13 }
0x16fd   :  { %4557 = vmatpush3.bf16.msra.mxu0 %v2471_v7 }
0x16fe   :  { %4568 = vmatprep.subr.bf16.mxu0 %v4865_v13 }
0x1700   :  { %4559 = vmatmul.mubr.msk.bf16.vlgmr.msra.gmra.mrb[68].mxu0 %vm376_vm0, %v5885_v22 }
0x1701   :  { %4570 = vmatprep.mubr.msk.bf16.mxu0 %vm4866_vm2, %v4865_v13 }
0x17c3   :  { %v2267_v8 = vpop.f32.mrb[60].mxu0 }
0x17c4   :  { %v2274_v9 = vmul.f32 0.35355338, %v2267_v8  ;;  %v4530_v10 = vpop.f32.mrb[61].mxu0 }
0x17c5   :  { %v2270_v11 = vpop.f32.mrb[62].mxu0 }
0x17c6   :  { %v2275_v12 = vmul.f32 0.35355338, %v2270_v11  ;;  %v4531_v15 = vpop.f32.mrb[63].mxu0  ;;  %v2276_v17 = vadd.f32 %v5976_v40, %v2274_v9 }
0x17c8   :  { %v2278_v18 = vsel %vm641_vm5, %v2276_v17, -inf  ;;  %v2277_v57 = vadd.f32 %v5983_v19, %v2275_v12 }
0x17c9   :  { %2279 = vmax.xlane.f32.xlu0 %v2278_v18 }
0x17ca   :  { %v2281_v20 = vsel %vm645_vm6, %v2277_v57, -inf }
0x17cb   :  { %2282 = vmax.xlane.f32.xlu1 %v2281_v20  ;;  %v2402_v23 = vpop.f32.mrb[64].mxu0 }
0x17cc   :  { %v4544_v59 = vpop.f32.mrb[65].mxu0  ;;  %v5990_v26 = vadd.f32 %v3982_v21, %v2402_v23 }
0x17cd   :  { %v2405_v24 = vpop.f32.mrb[66].mxu0 }
0x17ce   :  { %v5992_v27 = vadd.f32 %v3982_v21, %v2405_v24  ;;  %v4545_v28 = vpop.f32.mrb[67].mxu0 }
0x17d0   :  { %v2521_v30 = vpack.c.bf16 %v5992_v27, %v5990_v26 }
0x17d3   :  { %v2514_v42 = vpop.f32.mrb[68].mxu0 }
0x17d4   :  { %v4560_v45 = vpop.f32.mrb[69].mxu0  ;;  %v2515_v33 = vadd.f32 %v3996_v31, %v2514_v42 }
0x17d5   :  { %v2517_v32 = vpop.f32.mrb[70].mxu0 }
0x17d6   :  { %v2518_v34 = vadd.f32 %v3996_v31, %v2517_v32  ;;  %v4561_v35 = vpop.f32.mrb[71].mxu0 }
0x17d8   :  { %v2597_v36 = vpack.c.bf16 %v2518_v34, %v2515_v33 }
0x17da   :  { %v2602_v37 = vsel %vm670_vm4, %v2597_v36, 0 }
0x17db   :  { %4569 = vmatpush3.bf16.msra.mxu0 %v2602_v37 }
0x17dc   :  { %4580 = vmatprep.subr.bf16.mxu0 %v4865_v13 }
0x1856   :  { %v2280_v38 = vpop.xlane.xlu0 %2279 }
0x1857   :  { %v2284_v39 = vsub.f32 %v2276_v17, %v2280_v38 }
0x1858   :  { %v2283_v41 = vpop.xlane.xlu1 %2282 }
0x1859   :  { %v2286_v43 = vmul.f32 1.442695, %v2284_v39  ;;  %v2285_v44 = vsub.f32 %v2277_v57, %v2283_v41  ;;  %v3976_v39 = vld [vmem:[%s6425_s11 + $0x20] sm:$0xff] }
0x185b   :  { %4771 = vpow2.f32 %v2286_v43  ;;  %v2288_v47 = vmul.f32 1.442695, %v2285_v44  ;;  %v2352_v43 = vpack.c.bf16 %v3976_v39, %v3976_v39 }
0x185d   :  { %4773 = vpow2.f32 %v2288_v47 }
0x1865   :  { %v4772_v48 = vpop.eup %4771 }
0x1866   :  { %v2290_v50 = vsel %vm641_vm5, %v4772_v48, 0.0 }
0x1867   :  { %v4774_v51 = vpop.eup %4773  ;;  %2291 = vadd.xlane.f32.xlu0 %v2290_v50 }
0x1868   :  { %v2293_v25 = vsel %vm645_vm6, %v4774_v51, 0.0 }
0x1869   :  { %2294 = vadd.xlane.f32.xlu1 %v2293_v25  ;;  %v4010_v25 = vld [vmem:[%s6466_s10 + $0xc0] sm:$0xff] }
0x18f4   :  { %v2292_v52 = vpop.xlane.xlu0 %2291 }
0x18f5   :  { %4775 = vrcp.f32 %v2292_v52  ;;  %v4011_v52 = vld [vmem:[%s6466_s10 + $0xc8] sm:$0xff] }
0x18f6   :  { %v2295_v14 = vpop.xlane.xlu1 %2294 }
0x18f7   :  { %4777 = vrcp.f32 %v2295_v14  ;;  %v2804_v14 = vpack.c.bf16 %v4011_v52, %v4010_v25 }
0x18ff   :  { %v4776_v29 = vpop.eup %4775 }
0x1900   :  { %v2297_v55 = vmul.f32 %v4776_v29, %v4772_v48  ;;  %v4012_v29 = vld [vmem:[%s6466_s10 + $0xd0] sm:$0xff] }
0x1901   :  { %v4778_v16 = vpop.eup %4777  ;;  %v2805_v54 = vpack.c.bf16 %v4013_v53, %v4012_v29 }
0x1902   :  { %v2299_v56 = vmul.f32 %v4778_v16, %v4774_v51  ;;  %v2700_v51 = vsel %vm1017_vm7, %v2352_v43, 0  ;;  %v4000_v16 = vld [vmem:[%s6425_s11 + $0x28] sm:$0xff] }
0x1904   :  { %v2300_v60 = vpack.c.bf16 %v2299_v56, %v2297_v55  ;;  %v2648_v55 = vpack.c.bf16 %v4000_v16, %v4000_v16 }
0x1906   :  { %4535 = vmatmul.mubr.msk.bf16.vlgmr.msra.gmra.mrb[68].mxu1 %vm641_vm5, %v2300_v60  ;;  %v2653_v56 = vsel %vm1017_vm7, %v2648_v55, 0  ;;  %v4004_v60 = vld [vmem:[%s6465_s0 + $0xc8] sm:$0xff] }
0x1907   :  { %4547 = vmatpush3.bf16.msra.mxu1 %v2414_v58  ;;  %4550 = vmatprep.mubr.msk.bf16.mxu1 %vm4866_vm2, %v4865_v13  ;;  %v4003_v58 = vld [vmem:[%s6465_s0 + $0xc0] sm:$0xff] }
0x1908   :  { %4548 = vmatprep.subr.bf16.mxu1 %v4865_v13 }
0x190b   :  { %4549 = vmatpush3.bf16.msra.mxu1 %v2415_v63 }
0x190c   :  { %4562 = vmatprep.subr.bf16.mxu1 %v4865_v13 }
0x190e   :  { %4551 = vmatmul.mubr.msk.bf16.vlgmr.msra.gmra.mrb[72].mxu1 %vm376_vm0, %v5885_v22 }
0x190f   :  { %4564 = vmatprep.mubr.msk.bf16.mxu1 %vm4866_vm2, %v4865_v13 }
0x19d9   :  { %v6024_v0 = vpop.f32.mrb[68].mxu1 }
0x19da   :  { %v4536_v1 = vpop.f32.mrb[69].mxu1 }
0x19db   :  { %v6026_v2 = vpop.f32.mrb[70].mxu1 }
0x19dc   :  { %v2351_v3 = vpack.c.bf16 %v6026_v2, %v6024_v0  ;;  %v4537_v4 = vpop.f32.mrb[71].mxu1  ;;  %v2748_v0 = vpack.c.bf16 %v4004_v60, %v4003_v58 }
0x19dd   :  { %v4006_v4 = vld [vmem:[%s6465_s0 + $0xd8] sm:$0xff] }
0x19e1   :  { %v2458_v6 = vpop.f32.mrb[72].mxu1 }
0x19e2   :  { %v4552_v7 = vpop.f32.mrb[73].mxu1  ;;  %v2459_v9 = vadd.f32 %v3989_v5, %v2458_v6  ;;  %v4017_v6 = vld [vmem:[%s6467_s2 + $0xc0] sm:$0xff] }
0x19e3   :  { %v2461_v8 = vpop.f32.mrb[74].mxu1  ;;  %v4018_v7 = vld [vmem:[%s6467_s2 + $0xc8] sm:$0xff] }
0x19e4   :  { %v2462_v10 = vadd.f32 %v3989_v5, %v2461_v8  ;;  %v4553_v11 = vpop.f32.mrb[75].mxu1 }
0x19e5   :  { %v2860_v11 = vpack.c.bf16 %v4018_v7, %v4017_v6 }
0x19e6   :  { %v2522_v12 = vpack.c.bf16 %v2462_v10, %v2459_v9 }
0x19e8   :  { %v2527_v15 = vsel %vm589_vm3, %v2522_v12, 0 }
0x19e9   :  { %4563 = vmatpush3.bf16.xpose.msra.mxu1 %v2527_v15  ;;  %v4019_v15 = vld [vmem:[%s6467_s2 + $0xd0] sm:$0xff] }
0x19ea   :  { %4574 = vmatprep.subr.bf16.mxu1 %v4865_v13 }
0x19f0   :  { %4565 = vmatmul.mubr.msk.bf16.vlgmr.msra.gmra.mrb[76].mxu1 %vm589_vm3, %v2521_v30 }
0x19f1   :  { %4576 = vmatprep.mubr.msk.bf16.mxu1 %vm4866_vm2, %v4865_v13  ;;  %4575 = vmatpush3.bf16.msra.mxu1 %v2653_v56 }
0x19f2   :  { %4586 = vmatprep.subr.bf16.mxu1 %v4865_v13 }
0x1ac3   :  { %v2563_v17 = vpop.f32.mrb[76].mxu1 }
0x1ac4   :  { %v2570_v18 = vmul.f32 0.35355338, %v2563_v17  ;;  %v4566_v57 = vpop.f32.mrb[77].mxu1  ;;  %v4020_v17 = vld [vmem:[%s6467_s2 + $0xd8] sm:$0xff] }
0x1ac5   :  { %v2566_v20 = vpop.f32.mrb[78].mxu1  ;;  %v4015_v57 = vld [vmem:[%s6469_s30 + $0x6] ss:$0 sm:$0xff] }
0x1ac6   :  { %v2571_v21 = vmul.f32 0.35355338, %v2566_v20  ;;  %v4567_v23 = vpop.f32.mrb[79].mxu1  ;;  %v2572_v59 = vadd.f32 %v5976_v40, %v2570_v18  ;;  %v2861_v18 = vpack.c.bf16 %v4020_v17, %v4019_v15  ;;  %v4028_v15 = vld [vmem:[%s6465_s0 + $0xe0] sm:$0xff]  ;;  %v4029_v17 = vld [vmem:[%s6465_s0 + $0xe8] sm:$0xff] }
0x1ac8   :  { %v2574_v24 = vsel %vm641_vm5, %v2572_v59, -inf  ;;  %v2573_v28 = vadd.f32 %v5983_v19, %v2571_v21 }
0x1ac9   :  { %2575 = vmax.xlane.f32.xlu0 %v2574_v24 }
0x1aca   :  { %v2577_v26 = vsel %vm645_vm6, %v2573_v28, -inf }
0x1acb   :  { %2578 = vmax.xlane.f32.xlu1 %v2577_v26 }
0x1b56   :  { %v2576_v27 = vpop.xlane.xlu0 %2575 }
0x1b57   :  { %v2580_v30 = vsub.f32 %v2572_v59, %v2576_v27 }
0x1b58   :  { %v2579_v31 = vpop.xlane.xlu1 %2578 }
0x1b59   :  { %v2582_v42 = vmul.f32 1.442695, %v2580_v30  ;;  %v2581_v45 = vsub.f32 %v2573_v28, %v2579_v31 }
0x1b5b   :  { %4779 = vpow2.f32 %v2582_v42  ;;  %v2584_v32 = vmul.f32 1.442695, %v2581_v45 }
0x1b5d   :  { %4781 = vpow2.f32 %v2584_v32 }
0x1b65   :  { %v4780_v33 = vpop.eup %4779 }
0x1b66   :  { %v2586_v34 = vsel %vm641_vm5, %v4780_v33, 0.0 }
0x1b67   :  { %v4782_v35 = vpop.eup %4781  ;;  %2587 = vadd.xlane.f32.xlu0 %v2586_v34  ;;  %v4008_v34 = vld [vmem:[%s6468_s6 + $0x6] ss:$0 sm:$0xff] }
0x1b68   :  { %v2589_v36 = vsel %vm645_vm6, %v4782_v35, 0.0 }
0x1b69   :  { %2590 = vadd.xlane.f32.xlu1 %v2589_v36 }
0x1bf4   :  { %v2588_v37 = vpop.xlane.xlu0 %2587 }
0x1bf5   :  { %4783 = vrcp.f32 %v2588_v37 }
0x1bf6   :  { %v2591_v38 = vpop.xlane.xlu1 %2590 }
0x1bf7   :  { %4785 = vrcp.f32 %v2591_v38 }
0x1bff   :  { %v4784_v41 = vpop.eup %4783 }
0x1c00   :  { %v2593_v47 = vmul.f32 %v4784_v41, %v4780_v33 }
0x1c01   :  { %v4786_v44 = vpop.eup %4785 }
0x1c02   :  { %v2595_v48 = vmul.f32 %v4786_v44, %v4782_v35  ;;  %v4022_v44 = vld [vmem:[%s6470_s28 + $0x6] ss:$0 sm:$0xff] }
0x1c04   :  { %v2596_v50 = vpack.c.bf16 %v2595_v48, %v2593_v47 }
0x1c06   :  { %4571 = vmatmul.mubr.msk.bf16.vlgmr.msra.gmra.mrb[72].mxu0 %vm641_vm5, %v2596_v50 }
0x1c07   :  { %4581 = vmatpush3.bf16.msra.mxu0 %v2700_v51  ;;  %4582 = vmatprep.mubr.msk.bf16.mxu0 %vm4866_vm2, %v4865_v13 }
0x1c08   :  { %4594 = vmatprep.subr.bf16.mxu0 %v4865_v13 }
0x1c0e   :  { %4583 = vmatmul.mubr.msk.bf16.vlgmr.msra.gmra.mrb[76].mxu0 %vm589_vm3, %v2351_v3  ;;  %v4005_v3 = vld [vmem:[%s6465_s0 + $0xd0] sm:$0xff] }
0x1c0f   :  { %4595 = vmatpush3.bf16.msra.mxu0 %v2804_v14  ;;  %4598 = vmatprep.mubr.msk.bf16.mxu0 %vm4866_vm2, %v4865_v13  ;;  %v2749_v5 = vpack.c.bf16 %v4006_v4, %v4005_v3 }
0x1c10   :  { %4596 = vmatprep.subr.bf16.mxu0 %v4865_v13 }
0x1c13   :  { %4597 = vmatpush3.bf16.msra.mxu0 %v2805_v54 }
0x1c14   :  { %4610 = vmatprep.subr.bf16.mxu0 %v4865_v13 }
0x1c16   :  { %4599 = vmatmul.mubr.msk.bf16.vlgmr.msra.gmra.mrb[80].mxu0 %vm376_vm0, %v5885_v22 }
0x1c17   :  { %4612 = vmatprep.mubr.msk.bf16.mxu0 %vm4866_vm2, %v4865_v13 }
0x1cd9   :  { %v2638_v61 = vpop.f32.mrb[72].mxu0 }
0x1cda   :  { %v4572_v62 = vpop.f32.mrb[73].mxu0 }
0x1cdb   :  { %v2641_v63 = vpop.f32.mrb[74].mxu0 }
0x1cdc   :  { %v2647_v1 = vpack.c.bf16 %v2641_v63, %v2638_v61  ;;  %v4573_v2 = vpop.f32.mrb[75].mxu0 }
0x1cde   :  { %4577 = vmatmul.mubr.msk.bf16.vlgmr.msra.gmra.mrb[80].mxu1 %vm589_vm3, %v2647_v1 }
0x1cdf   :  { %4587 = vmatpush3.bf16.msra.mxu1 %v2748_v0  ;;  %4590 = vmatprep.mubr.msk.bf16.mxu1 %vm4866_vm2, %v4865_v13 }
0x1ce0   :  { %4588 = vmatprep.subr.bf16.mxu1 %v4865_v13 }
0x1ce1   :  { %v2736_v8 = vpop.f32.mrb[76].mxu0 }
0x1ce2   :  { %v4584_v9 = vpop.f32.mrb[77].mxu0 }
0x1ce3   :  { %v2739_v10 = vpop.f32.mrb[78].mxu0  ;;  %4589 = vmatpush3.bf16.msra.mxu1 %v2749_v5 }
0x1ce4   :  { %v4585_v12 = vpop.f32.mrb[79].mxu0  ;;  %4602 = vmatprep.subr.bf16.mxu1 %v4865_v13 }
0x1ce6   :  { %4591 = vmatmul.mubr.msk.bf16.vlgmr.msra.gmra.mrb[84].mxu1 %vm376_vm0, %v5885_v22 }
0x1ce7   :  { %4603 = vmatpush3.bf16.msra.mxu1 %v2860_v11  ;;  %4606 = vmatprep.mubr.msk.bf16.mxu1 %vm4866_vm2, %v4865_v13 }
0x1ce8   :  { %4604 = vmatprep.subr.bf16.mxu1 %v4865_v13 }
0x1ce9   :  { %v2848_v20 = vpop.f32.mrb[80].mxu0 }
0x1cea   :  { %v4600_v21 = vpop.f32.mrb[81].mxu0  ;;  %v2849_v59 = vadd.f32 %v4015_v57, %v2848_v20 }
0x1ceb   :  { %v2851_v23 = vpop.f32.mrb[82].mxu0  ;;  %4605 = vmatpush3.bf16.msra.mxu1 %v2861_v18  ;;  %v3093_v21 = vpack.c.bf16 %v4029_v17, %v4028_v15 }
0x1cec   :  { %v2852_v24 = vadd.f32 %v4015_v57, %v2851_v23  ;;  %v4601_v28 = vpop.f32.mrb[83].mxu0  ;;  %4616 = vmatprep.subr.bf16.mxu1 %v4865_v13 }
0x1cee   :  { %v2912_v26 = vpack.c.bf16 %v2852_v24, %v2849_v59  ;;  %4607 = vmatmul.mubr.msk.bf16.vlgmr.msra.gmra.mrb[88].mxu1 %vm376_vm0, %v5885_v22  ;;  %v4030_v59 = vld [vmem:[%s6465_s0 + $0xf0] sm:$0xff]  ;;  %v4031_v24 = vld [vmem:[%s6465_s0 + $0xf8] sm:$0xff] }
0x1cef   :  { %4618 = vmatprep.mubr.msk.bf16.mxu1 %vm4866_vm2, %v4865_v13  ;;  %v3094_v28 = vpack.c.bf16 %v4031_v24, %v4030_v59 }
0x1cf0   :  { %v2917_v27 = vsel %vm589_vm3, %v2912_v26, 0  ;;  %v4042_v26 = vld [vmem:[%s6467_s2 + $0xe0] sm:$0xff] }
0x1cf1   :  { %4611 = vmatpush3.bf16.xpose.msra.mxu0 %v2917_v27  ;;  %v4043_v27 = vld [vmem:[%s6467_s2 + $0xe8] sm:$0xff] }
0x1cf2   :  { %4622 = vmatprep.subr.bf16.mxu0 %v4865_v13 }
0x1db1   :  { %v2689_v30 = vpop.f32.mrb[80].mxu1 }
0x1db2   :  { %v6125_v31 = vadd.f32 %v2736_v8, %v2689_v30  ;;  %v4578_v42 = vpop.f32.mrb[81].mxu1  ;;  %v3205_v30 = vpack.c.bf16 %v4043_v27, %v4042_v26 }
0x1db3   :  { %v2692_v45 = vpop.f32.mrb[82].mxu1  ;;  %v4044_v42 = vld [vmem:[%s6467_s2 + $0xf0] sm:$0xff] }
0x1db4   :  { %v6127_v32 = vadd.f32 %v2739_v10, %v2692_v45  ;;  %v4579_v33 = vpop.f32.mrb[83].mxu1  ;;  %v4045_v45 = vld [vmem:[%s6467_s2 + $0xf8] sm:$0xff] }
0x1db5   :  { %v3206_v33 = vpack.c.bf16 %v4045_v45, %v4044_v42 }
0x1db9   :  { %v2792_v35 = vpop.f32.mrb[84].mxu1 }
0x1dba   :  { %v4592_v36 = vpop.f32.mrb[85].mxu1  ;;  %v2793_v38 = vadd.f32 %v4008_v34, %v2792_v35 }
0x1dbb   :  { %v2795_v37 = vpop.f32.mrb[86].mxu1 }
0x1dbc   :  { %v2796_v39 = vadd.f32 %v4008_v34, %v2795_v37  ;;  %v4593_v41 = vpop.f32.mrb[87].mxu1  ;;  %v4026_v34 = vld [vmem:[%s6425_s11 + $0x30] sm:$0xff]  ;;  %v4035_v37 = vld [vmem:[%s6466_s10 + $0xe0] sm:$0xff] }
0x1dbd   :  { %v3038_v35 = vpack.c.bf16 %v4026_v34, %v4026_v34 }
0x1dbe   :  { %v2911_v43 = vpack.c.bf16 %v2796_v39, %v2793_v38  ;;  %v4036_v38 = vld [vmem:[%s6466_s10 + $0xe8] sm:$0xff] }
0x1dbf   :  { %v3043_v36 = vsel %vm1017_vm7, %v3038_v35, 0 }
0x1dc0   :  { %4613 = vmatmul.mubr.msk.bf16.vlgmr.msra.gmra.mrb[84].mxu0 %vm589_vm3, %v2911_v43 }
0x1dc1   :  { %v2904_v47 = vpop.f32.mrb[88].mxu1  ;;  %4624 = vmatprep.mubr.msk.bf16.mxu0 %vm4866_vm2, %v4865_v13  ;;  %4623 = vmatpush3.bf16.msra.mxu0 %v3043_v36 }
0x1dc2   :  { %v4608_v48 = vpop.f32.mrb[89].mxu1  ;;  %v2905_v51 = vadd.f32 %v4022_v44, %v2904_v47  ;;  %4636 = vmatprep.subr.bf16.mxu0 %v4865_v13 }
0x1dc3   :  { %v2907_v50 = vpop.f32.mrb[90].mxu1 }
0x1dc4   :  { %v2908_v25 = vadd.f32 %v4022_v44, %v2907_v50  ;;  %v4609_v52 = vpop.f32.mrb[91].mxu1  ;;  %v3149_v44 = vpack.c.bf16 %v4036_v38, %v4035_v37  ;;  %v4037_v50 = vld [vmem:[%s6466_s10 + $0xf0] sm:$0xff] }
0x1dc5   :  { %v4033_v52 = vld [vmem:[%s6468_s6 + $0x7] ss:$0 sm:$0xff] }
0x1dc6   :  { %v2987_v14 = vpack.c.bf16 %v2908_v25, %v2905_v51  ;;  %v4038_v51 = vld [vmem:[%s6466_s10 + $0xf8] sm:$0xff] }
0x1dc7   :  { %v3150_v25 = vpack.c.bf16 %v4038_v51, %v4037_v50  ;;  %v4051_v51 = vld [vmem:[%s6425_s11 + $0x38] sm:$0xff] }
0x1dc8   :  { %v2992_v29 = vsel %vm670_vm4, %v2987_v14, 0 }
0x1dc9   :  { %4617 = vmatpush3.bf16.msra.mxu1 %v2992_v29 }
0x1dca   :  { %4628 = vmatprep.subr.bf16.mxu1 %v4865_v13 }
0x1e93   :  { %v2953_v53 = vpop.f32.mrb[84].mxu0 }
0x1e94   :  { %v2960_v54 = vmul.f32 0.35355338, %v2953_v53  ;;  %v4614_v16 = vpop.f32.mrb[85].mxu0 }
0x1e95   :  { %v2956_v55 = vpop.f32.mrb[86].mxu0 }
0x1e96   :  { %v2961_v56 = vmul.f32 0.35355338, %v2956_v55  ;;  %v4615_v58 = vpop.f32.mrb[87].mxu0  ;;  %v2962_v60 = vadd.f32 %v5976_v40, %v2960_v54 }
0x1e97   :  { %v4047_v58 = vld [vmem:[%s6470_s28 + $0x7] ss:$0 sm:$0xff] }
0x1e98   :  { %v2964_v61 = vsel %vm641_vm5, %v2962_v60, -inf  ;;  %v2963_v62 = vadd.f32 %v5983_v19, %v2961_v56 }
0x1e99   :  { %2965 = vmax.xlane.f32.xlu0 %v2964_v61 }
0x1e9a   :  { %v2967_v63 = vsel %vm645_vm6, %v2963_v62, -inf }
0x1e9b   :  { %2968 = vmax.xlane.f32.xlu1 %v2967_v63 }
0x1f26   :  { %v2966_v0 = vpop.xlane.xlu0 %2965 }
0x1f27   :  { %v2970_v1 = vsub.f32 %v2962_v60, %v2966_v0 }
0x1f28   :  { %v2969_v2 = vpop.xlane.xlu1 %2968 }
0x1f29   :  { %v2972_v3 = vmul.f32 1.442695, %v2970_v1  ;;  %v2971_v4 = vsub.f32 %v2963_v62, %v2969_v2 }
0x1f2b   :  { %4787 = vpow2.f32 %v2972_v3  ;;  %v2974_v5 = vmul.f32 1.442695, %v2971_v4 }
0x1f2d   :  { %4789 = vpow2.f32 %v2974_v5 }
0x1f35   :  { %v4788_v6 = vpop.eup %4787 }
0x1f36   :  { %v2976_v7 = vsel %vm641_vm5, %v4788_v6, 0.0 }
0x1f37   :  { %v4790_v8 = vpop.eup %4789  ;;  %2977 = vadd.xlane.f32.xlu0 %v2976_v7 }
0x1f38   :  { %v2979_v9 = vsel %vm645_vm6, %v4790_v8, 0.0 }
0x1f39   :  { %2980 = vadd.xlane.f32.xlu1 %v2979_v9  ;;  %v4040_v9 = vld [vmem:[%s6469_s30 + $0x7] ss:$0 sm:$0xff] }
0x1fc4   :  { %v2978_v10 = vpop.xlane.xlu0 %2977 }
0x1fc5   :  { %4791 = vrcp.f32 %v2978_v10 }
0x1fc6   :  { %v2981_v11 = vpop.xlane.xlu1 %2980 }
0x1fc7   :  { %4793 = vrcp.f32 %v2981_v11 }
0x1fcf   :  { %v4792_v12 = vpop.eup %4791 }
0x1fd0   :  { %v2983_v57 = vmul.f32 %v4792_v12, %v4788_v6 }
0x1fd1   :  { %v4794_v18 = vpop.eup %4793 }
0x1fd2   :  { %v2985_v20 = vmul.f32 %v4794_v18, %v4790_v8 }
0x1fd4   :  { %v2986_v23 = vpack.c.bf16 %v2985_v20, %v2983_v57 }
0x1fd6   :  { %4619 = vmatmul.mubr.msk.bf16.vlgmr.msra.gmra.mrb[92].mxu1 %vm641_vm5, %v2986_v23 }
0x1fd7   :  { %4629 = vmatpush3.bf16.msra.mxu1 %v3093_v21  ;;  %4632 = vmatprep.mubr.msk.bf16.mxu1 %vm4866_vm2, %v4865_v13 }
0x1fd8   :  { %4630 = vmatprep.subr.bf16.mxu1 %v4865_v13 }
0x1fdb   :  { %4631 = vmatpush3.bf16.msra.mxu1 %v3094_v28 }
0x1fdc   :  { %4644 = vmatprep.subr.bf16.mxu1 %v4865_v13 }
0x1fde   :  { %4633 = vmatmul.mubr.msk.bf16.vlgmr.msra.gmra.mrb[96].mxu1 %vm376_vm0, %v5885_v22 }
0x1fdf   :  { %4645 = vmatpush3.bf16.msra.mxu1 %v3205_v30  ;;  %4648 = vmatprep.mubr.msk.bf16.mxu1 %vm4866_vm2, %v4865_v13 }
0x1fe0   :  { %4646 = vmatprep.subr.bf16.mxu1 %v4865_v13 }
0x1fe3   :  { %4647 = vmatpush3.bf16.msra.mxu1 %v3206_v33 }
0x1fe4   :  { %4658 = vmatprep.subr.bf16.mxu1 %v4865_v13 }
0x1fe6   :  { %4649 = vmatmul.mubr.msk.bf16.vlgmr.msra.gmra.mrb[100].mxu1 %vm376_vm0, %v5885_v22 }
0x1fe7   :  { %4660 = vmatprep.mubr.msk.bf16.mxu1 %vm4866_vm2, %v4865_v13 }
0x20a9   :  { %v3028_v39 = vpop.f32.mrb[92].mxu1 }
0x20aa   :  { %v4620_v41 = vpop.f32.mrb[93].mxu1 }
0x20ab   :  { %v3031_v43 = vpop.f32.mrb[94].mxu1 }
0x20ac   :  { %v3037_v47 = vpack.c.bf16 %v3031_v43, %v3028_v39  ;;  %v4621_v48 = vpop.f32.mrb[95].mxu1 }
0x20ae   :  { %4625 = vmatmul.mubr.msk.bf16.vlgmr.msra.gmra.mrb[88].mxu0 %vm589_vm3, %v3037_v47 }
0x20af   :  { %4637 = vmatpush3.bf16.msra.mxu0 %v3149_v44  ;;  %4640 = vmatprep.mubr.msk.bf16.mxu0 %vm4866_vm2, %v4865_v13 }
0x20b0   :  { %4638 = vmatprep.subr.bf16.mxu0 %v4865_v13 }
0x20b1   :  { %v3137_v14 = vpop.f32.mrb[96].mxu1 }
0x20b2   :  { %v4634_v29 = vpop.f32.mrb[97].mxu1  ;;  %v3138_v54 = vadd.f32 %v4033_v52, %v3137_v14 }
0x20b3   :  { %v3140_v53 = vpop.f32.mrb[98].mxu1  ;;  %4639 = vmatpush3.bf16.msra.mxu0 %v3150_v25  ;;  %v3383_v25 = vpack.c.bf16 %v4051_v51, %v4051_v51  ;;  %v4072_v51 = vld [vmem:[%s6433_s19 + $0xb0] sm:$0xff] }
0x20b4   :  { %v3141_v16 = vadd.f32 %v4033_v52, %v3140_v53  ;;  %v4635_v55 = vpop.f32.mrb[99].mxu1  ;;  %4652 = vmatprep.subr.bf16.mxu0 %v4865_v13 }
0x20b5   :  { %v3388_v52 = vsel %vm1017_vm7, %v3383_v25, 0  ;;  %v4073_v25 = vld [vmem:[%s6433_s19 + $0xb8] sm:$0xff] }
0x20b6   :  { %v3256_v56 = vpack.c.bf16 %v3141_v16, %v3138_v54  ;;  %4641 = vmatmul.mubr.msk.bf16.vlgmr.msra.gmra.mrb[92].mxu0 %vm376_vm0, %v5885_v22 }
0x20b7   :  { %4654 = vmatprep.mubr.msk.bf16.mxu0 %vm4866_vm2, %v4865_v13 }
0x20b9   :  { %v3249_v60 = vpop.f32.mrb[100].mxu1 }
0x20ba   :  { %v4650_v61 = vpop.f32.mrb[101].mxu1  ;;  %v3250_v63 = vadd.f32 %v4047_v58, %v3249_v60  ;;  %v4054_v60 = vld [vmem:[%s6426_s12 + $0x1] ss:$0 sm:$0xff] }
0x20bb   :  { %v3252_v62 = vpop.f32.mrb[102].mxu1 }
0x20bc   :  { %v3253_v0 = vadd.f32 %v4047_v58, %v3252_v62  ;;  %v4651_v1 = vpop.f32.mrb[103].mxu1 }
0x20be   :  { %v3332_v2 = vpack.c.bf16 %v3253_v0, %v3250_v63 }
0x20c0   :  { %v3337_v3 = vsel %vm670_vm4, %v3332_v2, 0 }
0x20c1   :  { %4659 = vmatpush3.bf16.msra.mxu1 %v3337_v3 }
0x20c2   :  { %4670 = vmatprep.subr.bf16.mxu1 %v4865_v13 }
0x2181   :  { %v3079_v22 = vpop.f32.mrb[88].mxu0 }
0x2182   :  { %v6220_v4 = vadd.f32 %v3079_v22, %v6125_v31  ;;  %v4626_v5 = vpop.f32.mrb[89].mxu0 }
0x2183   :  { %v3082_v6 = vpop.f32.mrb[90].mxu0 }
0x2184   :  { %v6223_v7 = vadd.f32 %v3082_v6, %v6127_v32  ;;  %v4627_v8 = vpop.f32.mrb[91].mxu0 }
0x2189   :  { %v3193_v10 = vpop.f32.mrb[92].mxu0 }
0x218a   :  { %v4642_v11 = vpop.f32.mrb[93].mxu0  ;;  %v3194_v15 = vadd.f32 %v4040_v9, %v3193_v10 }
0x218b   :  { %v3196_v12 = vpop.f32.mrb[94].mxu0 }
0x218c   :  { %v3197_v17 = vadd.f32 %v4040_v9, %v3196_v12  ;;  %v4643_v18 = vpop.f32.mrb[95].mxu0 }
0x218e   :  { %v3257_v57 = vpack.c.bf16 %v3197_v17, %v3194_v15  ;;  %v4059_v15 = vld [vmem:[%s6431_s17 + $0x20] sm:$0xff]  ;;  %v4060_v17 = vld [vmem:[%s6431_s17 + $0x28] sm:$0xff] }
0x218f   :  { %v3497_v18 = vpack.c.bf16 %v4060_v17, %v4059_v15 }
0x2190   :  { %v3262_v31 = vsel %vm589_vm3, %v3257_v57, 0  ;;  %v4061_v57 = vld [vmem:[%s6431_s17 + $0x30] sm:$0xff] }
0x2191   :  { %4653 = vmatpush3.bf16.xpose.msra.mxu0 %v3262_v31  ;;  %v4062_v31 = vld [vmem:[%s6431_s17 + $0x38] sm:$0xff]  ;;  %s6472_s17 = sld [smem:[#allocation11_spill]] }
0x2192   :  { %4664 = vmatprep.subr.bf16.mxu0 %v4865_v13 }
0x2198   :  { %4655 = vmatmul.mubr.msk.bf16.vlgmr.msra.gmra.mrb[96].mxu0 %vm589_vm3, %v3256_v56 }
0x2199   :  { %4666 = vmatprep.mubr.msk.bf16.mxu0 %vm4866_vm2, %v4865_v13  ;;  %4665 = vmatpush3.bf16.msra.mxu0 %v3388_v52  ;;  %v3590_v52 = vpack.c.bf16 %v4073_v25, %v4072_v51 }
0x219a   :  { %4678 = vmatprep.subr.bf16.mxu0 %v4865_v13 }
0x226b   :  { %v3298_v32 = vpop.f32.mrb[96].mxu0 }
0x226c   :  { %v3305_v20 = vmul.f32 0.35355338, %v3298_v32  ;;  %v4656_v21 = vpop.f32.mrb[97].mxu0  ;;  %v3498_v32 = vpack.c.bf16 %v4062_v31, %v4061_v57 }
0x226d   :  { %v3301_v23 = vpop.f32.mrb[98].mxu0 }
0x226e   :  { %v3306_v59 = vmul.f32 0.35355338, %v3301_v23  ;;  %v4657_v24 = vpop.f32.mrb[99].mxu0  ;;  %v3307_v28 = vadd.f32 %v5976_v40, %v3305_v20 }
0x2270   :  { %v3309_v26 = vsel %vm641_vm5, %v3307_v28, -inf  ;;  %v3308_v27 = vadd.f32 %v5983_v19, %v3306_v59 }
0x2271   :  { %3310 = vmax.xlane.f32.xlu0 %v3309_v26 }
0x2272   :  { %v3312_v30 = vsel %vm645_vm6, %v3308_v27, -inf }
0x2273   :  { %3313 = vmax.xlane.f32.xlu1 %v3312_v30 }
0x22fe   :  { %v3311_v42 = vpop.xlane.xlu0 %3310 }
0x22ff   :  { %v3315_v45 = vsub.f32 %v3307_v28, %v3311_v42 }
0x2300   :  { %v3314_v33 = vpop.xlane.xlu1 %3313 }
0x2301   :  { %v3317_v34 = vmul.f32 1.442695, %v3315_v45  ;;  %v3316_v35 = vsub.f32 %v3308_v27, %v3314_v33  ;;  %v4057_v27 = vld [vmem:[%s6429_s15 + $0x1] ss:$0 sm:$0xff]  ;;  %s4869_s15 = smov [#allocation4]  }
0x2302   :  { %s3845_s6 = sshll.u32 %s4869_s15, 4  ;;  %s3846_s6 = int_to_ptr.vmem [resolvable:$true] %s3845_s6 }
0x2303   :  { %4795 = vpow2.f32 %v3317_v34  ;;  %v3319_v36 = vmul.f32 1.442695, %v3316_v35  ;;  %v4058_v34 = vld [vmem:[%s6430_s16 + $0x1] ss:$0 sm:$0xff]  ;;  %s4817_s16 = scalar_lea.vmem %s3846_s6, 32  ;;  %p4822_p1 = scmp.lt.s32.totalorder %s3846_s6, %s3846_s6 }
0x2304   :  { %p4818_p0 = scmp.ne.s32.totalorder %s3846_s6, %s4817_s16  ;;  %p4823_p2 = scmp.lt.s32.totalorder %s4817_s16, %s4817_s16 }
0x2305   :  { %4797 = vpow2.f32 %v3319_v36 }
0x2306   :  { %p4824_p3 = por %p4823_p2, %p4822_p1 }
0x2308   :  { %p4825_p4 = pnand %p4824_p3, %p4818_p0 }
0x230d   :  { %v4796_v37 = vpop.eup %4795 }
0x230e   :  { %v3321_v38 = vsel %vm641_vm5, %v4796_v37, 0.0 }
0x230f   :  { %v4798_v40 = vpop.eup %4797  ;;  %3322 = vadd.xlane.f32.xlu0 %v3321_v38 }
0x2310   :  { %v3324_v39 = vsel %vm645_vm6, %v4798_v40, 0.0 }
0x2311   :  { %3325 = vadd.xlane.f32.xlu1 %v3324_v39  ;;  %v4067_v39 = vld [vmem:[%s6433_s19 + $0x88] sm:$0xff] }
0x239c   :  { %v3323_v19 = vpop.xlane.xlu0 %3322 }
0x239d   :  { %4799 = vrcp.f32 %v3323_v19 }
0x239e   :  { %v3326_v41 = vpop.xlane.xlu1 %3325 }
0x239f   :  { %4801 = vrcp.f32 %v3326_v41  ;;  %v4068_v41 = vld [vmem:[%s6433_s19 + $0x90] sm:$0xff] }
0x23a7   :  { %v4800_v43 = vpop.eup %4799 }
0x23a8   :  { %v3328_v47 = vmul.f32 %v4800_v43, %v4796_v37  ;;  %v4069_v43 = vld [vmem:[%s6433_s19 + $0x98] sm:$0xff] }
0x23a9   :  { %v4802_v44 = vpop.eup %4801 }
0x23aa   :  { %v3330_v48 = vmul.f32 %v4802_v44, %v4798_v40  ;;  %v4066_v40 = vld [vmem:[%s6433_s19 + $0x80] sm:$0xff]  ;;  %v3588_v44 = vpack.c.bf16 %v4069_v43, %v4068_v41 }
0x23ab   :  { %v3587_v19 = vpack.c.bf16 %v4067_v39, %v4066_v40 }
0x23ac   :  { %v3331_v50 = vpack.c.bf16 %v3330_v48, %v3328_v47  ;;  %v4070_v47 = vld [vmem:[%s6433_s19 + $0xa0] sm:$0xff]  ;;  %v4071_v48 = vld [vmem:[%s6433_s19 + $0xa8] sm:$0xff] }
0x23ae   :  { %4661 = vmatmul.mubr.msk.bf16.vlgmr.msra.gmra.mrb[104].mxu1 %vm641_vm5, %v3331_v50  ;;  %v3589_v50 = vpack.c.bf16 %v4071_v48, %v4070_v47 }
0x23af   :  { %4674 = vmatprep.mubr.msk.bf16.mxu1 %vm4866_vm2, %v4865_v13  ;;  %4671 = vmatpush3.bf16.msra.mxu1 %v3497_v18 }
0x23b0   :  { %4672 = vmatprep.subr.bf16.mxu1 %v4865_v13 }
0x23b3   :  { %4673 = vmatpush3.bf16.msra.mxu1 %v3498_v32 }
0x2481   :  { %v3373_v14 = vpop.f32.mrb[104].mxu1 }
0x2482   :  { %v4662_v29 = vpop.f32.mrb[105].mxu1 }
0x2483   :  { %v3376_v53 = vpop.f32.mrb[106].mxu1  ;;  %v4075_v29 = vld [vmem:[%s6433_s19 + $0xc8] sm:$0xff] }
0x2484   :  { %v3382_v54 = vpack.c.bf16 %v3376_v53, %v3373_v14  ;;  %v4663_v16 = vpop.f32.mrb[107].mxu1  ;;  %v4074_v14 = vld [vmem:[%s6433_s19 + $0xc0] sm:$0xff] }
0x2485   :  { %v3591_v53 = vpack.c.bf16 %v4075_v29, %v4074_v14  ;;  %v4077_v16 = vld [vmem:[%s6433_s19 + $0xd8] sm:$0xff] }
0x2486   :  { %4667 = vmatmul.mubr.msk.bf16.vlgmr.msra.gmra.mrb[100].mxu0 %vm589_vm3, %v3382_v54  ;;  %v4076_v54 = vld [vmem:[%s6433_s19 + $0xd0] sm:$0xff] }
0x2487   :  { %4694 = vmatprep.mubr.msk.bf16.mxu0 %vm4866_vm2, %v4865_v13  ;;  %4679 = vmatpush3.bf16.msra.mxu0 %v3587_v19 }
0x2488   :  { %4680 = vmatprep.subr.bf16.mxu0 %v4865_v13 }
0x248b   :  { %4681 = vmatpush3.bf16.msra.mxu0 %v3588_v44 }
0x248c   :  { %4682 = vmatprep.subr.bf16.mxu0 %v4865_v13 }
0x248f   :  { %4683 = vmatpush3.bf16.msra.mxu0 %v3589_v50  ;;  %v4867_v50 = vmov 0.0|0.0  }
0x2490   :  { %4684 = vmatprep.subr.bf16.mxu0 %v4865_v13  ;;  %4713 = vmatprep.subr.bf16.mxu1 %v4867_v50 }
0x2493   :  { %4685 = vmatpush3.bf16.msra.mxu0 %v3590_v52 }
0x2494   :  { %4686 = vmatprep.subr.bf16.mxu0 %v4865_v13 }
0x2497   :  { %4687 = vmatpush3.bf16.msra.mxu0 %v3591_v53 }
0x2498   :  { %4688 = vmatprep.subr.bf16.mxu0 %v4865_v13 }
0x2559   :  { %v3424_v55 = vpop.f32.mrb[100].mxu0 }
0x255a   :  { %v3431_v56 = vadd.f32 %v3424_v55, %v6220_v4  ;;  %v4668_v58 = vpop.f32.mrb[101].mxu0  ;;  %v3592_v55 = vpack.c.bf16 %v4077_v16, %v4076_v54  ;;  %v4084_v16 = vld [vmem:[%s6435_s21] ss:$0 sm:$0xff] }
0x255b   :  { %v3427_v61 = vpop.f32.mrb[102].mxu0  ;;  %v4079_v58 = vld [vmem:[%s6433_s19 + $0xe8] sm:$0xff] }
0x255c   :  { %v3433_v62 = vadd.f32 %v3431_v56, %v5846_v46  ;;  %v3432_v63 = vadd.f32 %v3427_v61, %v6223_v7  ;;  %v4669_v0 = vpop.f32.mrb[103].mxu0  ;;  %4689 = vmatpush3.bf16.msra.mxu0 %v3592_v55  ;;  %v4078_v56 = vld [vmem:[%s6433_s19 + $0xe0] sm:$0xff]  ;;  %v4080_v61 = vld [vmem:[%s6433_s19 + $0xf0] sm:$0xff] }
0x255d   :  { %4690 = vmatprep.subr.bf16.mxu0 %v4865_v13  ;;  %v4064_v0 = vld [vmem:[%s6432_s18 + $0x1] ss:$0 sm:$0xff] }
0x255e   :  { %v6256_v1 = vadd.f32 %v4054_v60, %v3433_v62  ;;  %v3434_v2 = vadd.f32 %v3432_v63, %v5849_v49  ;;  %v4081_v62 = vld [vmem:[%s6433_s19 + $0xf8] sm:$0xff] }
0x255f   :  { %v3594_v63 = vpack.c.bf16 %v4081_v62, %v4080_v61  ;;  %v4085_v61 = vld [vmem:[%s6436_s22] ss:$0 sm:$0xff] }
0x2560   :  { %v6259_v3 = vadd.f32 %v4054_v60, %v3434_v2  ;;  %v3449_v22 = vsel %vm376_vm0, %v6256_v1, 0.0  ;;  %v3593_v60 = vpack.c.bf16 %v4079_v58, %v4078_v56 }
0x2561   :  { %3450 = vadd.xlane.f32.xlu0 %v3449_v22 }
0x2562   :  { %v3452_v4 = vsel %vm380_vm1, %v6259_v3, 0.0  ;;  %4691 = vmatpush3.bf16.msra.mxu0 %v3593_v60 }
0x2563   :  { %3453 = vadd.xlane.f32.xlu1 %v3452_v4  ;;  %4692 = vmatprep.subr.bf16.mxu0 %v4865_v13 }
0x2566   :  { %4693 = vmatpush3.bf16.msra.mxu0 %v3594_v63 }
0x25ee   :  { %v3451_v5 = vpop.xlane.xlu0 %3450 }
0x25ef   :  { %v3455_v6 = vmul.f32 0.03125, %v3451_v5 }
0x25f0   :  { %v3454_v46 = vpop.xlane.xlu1 %3453 }
0x25f1   :  { %v3457_v7 = vsub.f32 %v6256_v1, %v3455_v6  ;;  %v3456_v8 = vmul.f32 0.03125, %v3454_v46 }
0x25f3   :  { %v3458_v9 = vsub.f32 %v6259_v3, %v3456_v8  ;;  %v3459_v10 = vmul.f32 %v3457_v7, %v3457_v7 }
0x25f5   :  { %v3461_v49 = vsel %vm376_vm0, %v3459_v10, 0.0  ;;  %v3460_v11 = vmul.f32 %v3458_v9, %v3458_v9 }
0x25f6   :  { %3462 = vadd.xlane.f32.xlu0 %v3461_v49 }
0x25f7   :  { %v3464_v12 = vsel %vm380_vm1, %v3460_v11, 0.0 }
0x25f8   :  { %3465 = vadd.xlane.f32.xlu1 %v3464_v12 }
0x2683   :  { %v3463_v20 = vpop.xlane.xlu0 %3462 }
0x2684   :  { %v3467_v21 = vmul.f32 0.03125, %v3463_v20 }
0x2685   :  { %v3466_v23 = vpop.xlane.xlu1 %3465 }
0x2686   :  { %v3469_v59 = vadd.f32 1e-06, %v3467_v21  ;;  %v3468_v24 = vmul.f32 0.03125, %v3466_v23 }
0x2688   :  { %4803 = vrsqrt.f32 %v3469_v59  ;;  %v3470_v28 = vadd.f32 1e-06, %v3468_v24 }
0x268a   :  { %4805 = vrsqrt.f32 %v3470_v28 }
0x2692   :  { %v4804_v26 = vpop.eup %4803 }
0x2693   :  { %v3473_v30 = vmul.f32 %v4804_v26, %v3457_v7 }
0x2694   :  { %v4806_v42 = vpop.eup %4805 }
0x2695   :  { %v3481_v45 = vmul.f32 %v4057_v27, %v3473_v30  ;;  %v3474_v33 = vmul.f32 %v4806_v42, %v3458_v9 }
0x2697   :  { %v3482_v35 = vmul.f32 %v4057_v27, %v3474_v33  ;;  %v3489_v36 = vadd.f32 %v4058_v34, %v3481_v45  ;;  %v4083_v27 = vld [vmem:[%s6434_s20 + $0x1] ss:$0 sm:$0xff] }
0x2699   :  { %v3490_v37 = vadd.f32 %v4058_v34, %v3482_v35 }
0x269b   :  { %v3496_v38 = vpack.c.bf16 %v3490_v37, %v3489_v36 }
0x269d   :  { %4675 = vmatmul.mubr.msk.bf16.vlgmr.msra.gmra.mrb[108].mxu1 %vm376_vm0, %v3496_v38 }
0x269e   :  { %4702 = vmatprep.mubr.msk.f32.mxu1 %vm4866_vm2, %v4865_v13 }
0x2770   :  { %v3544_v2 = vpop.f32.mrb[108].mxu1 }
0x2771   :  { %v3545_v22 = vadd.f32 %v4064_v0, %v3544_v2  ;;  %v4676_v4 = vpop.f32.mrb[109].mxu1  ;;  %v3771_v2 = vld [vmem:[%s6437_s23] sm:$0xff] }
0x2772   :  { %v3547_v5 = vpop.f32.mrb[110].mxu1 }
0x2773   :  { %v3551_v6 = vmul.f32 %v3545_v22, %v3545_v22  ;;  %v3548_v46 = vadd.f32 %v4064_v0, %v3547_v5  ;;  %v4677_v7 = vpop.f32.mrb[111].mxu1  ;;  %v3692_v5 = vld [vmem:[%s6472_s17] sm:$0x3] }
0x2774   :  { %v3774_v7 = vld [vmem:[%s6437_s23 + $0x18] sm:$0xff] }
0x2775   :  { %v3553_v8 = vmul.f32 %v3551_v6, %v3545_v22  ;;  %v3552_v9 = vmul.f32 %v3548_v46, %v3548_v46 }
0x2777   :  { %v3555_v10 = vmul.f32 0.044715, %v3553_v8  ;;  %v3554_v49 = vmul.f32 %v3552_v9, %v3548_v46 }
0x2779   :  { %v3557_v11 = vadd.f32 %v3555_v10, %v3545_v22  ;;  %v3556_v12 = vmul.f32 0.044715, %v3554_v49 }
0x277b   :  { %v3559_v15 = vmul.f32 0.7978846, %v3557_v11  ;;  %v3558_v17 = vadd.f32 %v3556_v12, %v3548_v46 }
0x277d   :  { %4807 = vtanh.f32 %v3559_v15  ;;  %v3560_v18 = vmul.f32 0.7978846, %v3558_v17 }
0x277f   :  { %4809 = vtanh.f32 %v3560_v18 }
0x2787   :  { %v4808_v57 = vpop.eup %4807 }
0x2788   :  { %v3563_v31 = vadd.f32 1.0, %v4808_v57 }
0x2789   :  { %v4810_v32 = vpop.eup %4809 }
0x278a   :  { %v3565_v20 = vmul.f32 0.5, %v3563_v31  ;;  %v3564_v21 = vadd.f32 1.0, %v4810_v32 }
0x278c   :  { %v3566_v23 = vmul.f32 0.5, %v3564_v21  ;;  %v3567_v59 = vmul.f32 %v3565_v20, %v3545_v22  ;;  %v3772_v22 = vld [vmem:[%s6437_s23 + $0x8] sm:$0xff] }
0x278d   :  { %v3776_v6 = vpack.c.bf16 %v3772_v22, %v3771_v2 }
0x278e   :  { %v3568_v24 = vmul.f32 %v3566_v23, %v3548_v46  ;;  %v3773_v46 = vld [vmem:[%s6437_s23 + $0x10] sm:$0xff] }
0x278f   :  { %v3777_v8 = vpack.c.bf16 %v3774_v7, %v3773_v46 }
0x2790   :  { %v3586_v28 = vpack.c.bf16 %v3568_v24, %v3567_v59 }
0x2792   :  { %4695 = vmatmul.mubr.bf16.vlgmr.msra.gmra.mrb[104].mxu0 %v3586_v28 }
0x2865   :  { %v3629_v26 = vpop.f32.mrb[104].mxu0 }
0x2866   :  { %v3636_v30 = vadd.f32 %v3629_v26, %v6256_v1  ;;  %v4696_v42 = vpop.f32.mrb[105].mxu0 }
0x2867   :  { %v3632_v45 = vpop.f32.mrb[106].mxu0 }
0x2868   :  { %v3637_v33 = vadd.f32 %v3632_v45, %v6259_v3  ;;  %v4697_v34 = vpop.f32.mrb[107].mxu0  ;;  %v3646_v35 = vadd.f32 %v4083_v27, %v3636_v30 }
0x286a   :  { %v3650_v36 = vsel %vm376_vm0, %v3646_v35, 0.0  ;;  %v3647_v37 = vadd.f32 %v4083_v27, %v3637_v33 }
0x286b   :  { %3651 = vadd.xlane.f32.xlu0 %v3650_v36 }
0x286c   :  { %v3653_v38 = vsel %vm380_vm1, %v3647_v37, 0.0 }
0x286d   :  { %3654 = vadd.xlane.f32.xlu1 %v3653_v38 }
0x28f8   :  { %v3652_v40 = vpop.xlane.xlu0 %3651 }
0x28f9   :  { %v3656_v39 = vmul.f32 0.03125, %v3652_v40 }
0x28fa   :  { %v3655_v19 = vpop.xlane.xlu1 %3654 }
0x28fb   :  { %v3658_v41 = vsub.f32 %v3646_v35, %v3656_v39  ;;  %v3657_v43 = vmul.f32 0.03125, %v3655_v19 }
0x28fd   :  { %v3659_v44 = vsub.f32 %v3647_v37, %v3657_v43  ;;  %v3660_v1 = vmul.f32 %v3658_v41, %v3658_v41 }
0x28ff   :  { %v3662_v47 = vsel %vm376_vm0, %v3660_v1, 0.0  ;;  %v3661_v48 = vmul.f32 %v3659_v44, %v3659_v44 }
0x2900   :  { %3663 = vadd.xlane.f32.xlu0 %v3662_v47 }
0x2901   :  { %v3665_v3 = vsel %vm380_vm1, %v3661_v48, 0.0 }
0x2902   :  { %3666 = vadd.xlane.f32.xlu1 %v3665_v3 }
0x298d   :  { %v3664_v51 = vpop.xlane.xlu0 %3663 }
0x298e   :  { %v3668_v25 = vmul.f32 0.03125, %v3664_v51 }
0x298f   :  { %v3667_v52 = vpop.xlane.xlu1 %3666 }
0x2990   :  { %v3670_v14 = vadd.f32 1e-06, %v3668_v25  ;;  %v3669_v29 = vmul.f32 0.03125, %v3667_v52 }
0x2992   :  { %4811 = vrsqrt.f32 %v3670_v14  ;;  %v3671_v53 = vadd.f32 1e-06, %v3669_v29 }
0x2994   :  { %4813 = vrsqrt.f32 %v3671_v53 }
0x299c   :  { %v4812_v54 = vpop.eup %4811 }
0x299d   :  { %v3674_v55 = vmul.f32 %v4812_v54, %v3658_v41 }
0x299e   :  { %v4814_v56 = vpop.eup %4813 }
0x299f   :  { %v3682_v58 = vmul.f32 %v4084_v16, %v3674_v55  ;;  %v3675_v60 = vmul.f32 %v4814_v56, %v3659_v44 }
0x29a1   :  { %v3683_v62 = vmul.f32 %v4084_v16, %v3675_v60  ;;  %v3690_v63 = vadd.f32 %v4085_v61, %v3682_v58 }
0x29a3   :  { %v3691_v0 = vadd.f32 %v4085_v61, %v3683_v62 }
0x29a5   :  { %v4714_v4 = vpack.c.bf16 %v3691_v0, %v3690_v63 }
0x29a7   :  { %4716 = vmatpush3.bf16.msk.msra.mxu1 %vm4715_vm10, %v4714_v4 }
0x29a8   :  { %4705 = vmatprep.subr.bf16.mxu1 %v4865_v13 }
0x29aa   :  { %4703 = vmatmul.mubr.msk.f32.vlgmr.msra.gmra.mrb[112].mxu1 %vm641_vm5, %v3692_v5 }
0x29ab   :  { %4706 = vmatpush3.bf16.msra.mxu1 %v3776_v6  ;;  %4709 = vmatprep.mubr.msk.bf16.mxu1 %vm4866_vm2, %v4865_v13 }
0x29ac   :  { %4707 = vmatprep.subr.bf16.mxu1 %v4865_v13 }
0x29af   :  { %4708 = vmatpush3.bf16.msra.mxu1 %v3777_v8 }
0x2a7d   :  { %v3766_v9 = vpop.f32.mrb[112].mxu1 }
0x2a7e   :  { %v3775_v10 = vpack.c.bf16 %v3766_v9, %v3766_v9  ;;  %3770 = vst.msk [vmem:[#allocation4] sm:$0x3] %vm380_vm1, %v3766_v9  ;;  %v4704_v49 = vpop.f32.mrb[113].mxu1 }
0x2a80   :  { %4710 = vmatmul.mubr.msk.bf16.vlgmr.msra.gmra.mrb[116].mxu1 %vm376_vm0, %v3775_v10 }
0x2a81   :  { %4828 = shalt.err (!%p4825_p4)
}
0x2a82   :  { %s4829_s30 = scalar_lea.hbm %s6440_s26, 32 }
0x2a83   :  { %p4830_p5 = scmp.ne.s32.totalorder %s6440_s26, %s4829_s30  ;;  %p4833_p6 = scmp.lt.u32.totalorder %s4829_s30, %s6440_s26 }
0x2a85   :  { %p4835_p7 = pnand %p4833_p6, %p4830_p5 }
0x2a87   :  { %4838 = shalt.err (!%p4835_p7)
}
0x2a88   :  { %3848 = dma.vmem_to_hbm [thread:$0]  %s3846_s6, 32, %s6440_s26, [#allocation5]   ;;  %v4088_v13 = vld [vmem:[%s6438_s24] ss:$0 sm:$0xff] }
0x2a89   :  { %s4870_s9 = smov [#allocation2]  }
0x2a8a   :  { %s3835_s5 = sshll.u32 %s4870_s9, 4  ;;  %s3836_s5 = int_to_ptr.vmem [resolvable:$true] %s3835_s5 }
0x2a8b   :  { %s4839_s1 = scalar_lea.vmem %s3836_s5, 32  ;;  %p4844_p9 = scmp.lt.s32.totalorder %s3836_s5, %s3836_s5 }
0x2a8c   :  { %p4840_p8 = scmp.ne.s32.totalorder %s3836_s5, %s4839_s1  ;;  %p4845_p10 = scmp.lt.s32.totalorder %s4839_s1, %s4839_s1 }
0x2a8e   :  { %p4846_p11 = por %p4845_p10, %p4844_p9 }
0x2a90   :  { %p4847_p12 = pnand %p4846_p11, %p4840_p8 }
0x2b53   :  { %v3822_v11 = vpop.f32.mrb[116].mxu1 }
0x2b54   :  { %v3823_v12 = vadd.f32 %v4088_v13, %v3822_v11  ;;  %v4711_v15 = vpop.f32.mrb[117].mxu1 }
0x2b55   :  { %v3825_v17 = vpop.f32.mrb[118].mxu1 }
0x2b56   :  { %3828 = vst.msk [vmem:[#allocation2] sm:$0x3] %vm645_vm6, %v3823_v12  ;;  %v4712_v18 = vpop.f32.mrb[119].mxu1 }
0x2b57   :  { %4850 = shalt.err (!%p4847_p12)
}
0x2b58   :  { %s4851_s24 = scalar_lea.hbm %s6439_s25, 32 }
0x2b59   :  { %p4852_p13 = scmp.ne.s32.totalorder %s6439_s25, %s4851_s24  ;;  %p4855_p0 = scmp.lt.u32.totalorder %s4851_s24, %s6439_s25 }
0x2b5b   :  { %p4857_p1 = pnand %p4855_p0, %p4852_p13 }
0x2b5d   :  { %4860 = shalt.err (!%p4857_p1)
}
0x2b5e   :  { %3838 = dma.vmem_to_hbm [thread:$0]  %s3836_s5, 32, %s6439_s25, [#allocation3]  }
0x2b5f   :  { %4861 = dma.done.wait [#allocation3], 32  }
0x2b60   :  { %4862 = vsyncadd [#allocation3], 4294967264 }
0x2b61   :  { %4863 = dma.done.wait [#allocation5], 32  }
0x2b62   :  { %4864 = vsyncadd [#allocation5], 4294967264 }
0x2b63   :  { %3855 = vsyncpa [#allocation3], 1 }
0x2b64   :  { %3856 = vsyncpa [#allocation5], 1 }

</bundles_post_ra>
